<compile_context>
chip_gen: v5e
topology: v5e:2x2
jax: 0.10.0
libtpu: 0.0.40
codegen_flags: <defaults>
</compile_context>

<pallas_src>
import jax
import jax.numpy as jnp
from jax.experimental import pallas as pl
from jax.experimental.pallas import tpu as pltpu


# ---------------------------------------------------------------------------
# small helpers
# ---------------------------------------------------------------------------
def _round_up(x, m):
    return ((x + m - 1) // m) * m


def _pad_rows(a, mp, axis=0):
    m = a.shape[axis]
    if mp == m:
        return a
    pad = [(0, 0)] * a.ndim
    pad[axis] = (0, mp - m)
    return jnp.pad(a, pad)


def _pick_tm(M, max_tm):
    """Tile size: multiple of 16 (bf16), >=2 grid steps when M allows (v7x megacore)."""
    half = _round_up(max(-(-M // 2), 16), 16)
    return min(max_tm, half)


# ---------------------------------------------------------------------------
# Kernel 1: row-tiled matmul + bias + ReLU   (conv1, 4-pixel packed -> 128 lanes)
# ---------------------------------------------------------------------------
def _matmul_bias_relu(a, w, b, *, max_tm=2048, out_dtype=jnp.bfloat16):
    """out = relu(a @ w + b); a:[M,K] bf16, w:[K,N] bf16 (N=128), b:[1,N] f32."""
    M, K = a.shape
    Kw, N = w.shape
    assert K == Kw
    tm = _pick_tm(M, max_tm)
    Mp = _round_up(M, tm)
    a = _pad_rows(a, Mp)

    def kernel(a_ref, w_ref, b_ref, o_ref):
        z = jnp.dot(a_ref[...], w_ref[...], preferred_element_type=jnp.float32)
        o_ref[...] = jnp.maximum(z + b_ref[...], 0.0).astype(o_ref.dtype)

    out_isz = jnp.dtype(out_dtype).itemsize
    cost = pl.CostEstimate(
        flops=2 * Mp * K * N,
        transcendentals=0,
        bytes_accessed=int(Mp * K * a.dtype.itemsize + K * N * w.dtype.itemsize
                           + N * 4 + Mp * N * out_isz))

    out = pl.pallas_call(
        kernel,
        out_shape=jax.ShapeDtypeStruct((Mp, N), out_dtype),
        grid=(Mp // tm,),
        in_specs=[
            pl.BlockSpec((tm, K), lambda i: (i, 0)),
            pl.BlockSpec((K, N), lambda i: (0, 0)),   # weights VMEM resident
            pl.BlockSpec((1, N), lambda i: (0, 0)),
        ],
        out_specs=pl.BlockSpec((tm, N), lambda i: (i, 0)),
        compiler_params=pltpu.CompilerParams(dimension_semantics=("parallel",)),
        cost_estimate=cost,
    )(a, w, b)
    return out[:M]


# ---------------------------------------------------------------------------
# Kernel 2: conv2 + ReLU + 2x2 maxpool, fused (tap-major max-reduction, 2-pixel packed)
# ---------------------------------------------------------------------------
def _conv_relu_maxpool(a4, w, b, *, max_tm=2048, out_dtype=jnp.bfloat16):
    """a4: [T=4, M, K] tap-major packed im2col.  out[m] = relu(max_t(a4[t, m] @ w + b))."""
    T, M, K = a4.shape
    Kw, N = w.shape
    assert K == Kw
    tm = _pick_tm(M, max_tm)
    Mp = _round_up(M, tm)
    a4 = _pad_rows(a4, Mp, axis=1)

    def kernel(a_ref, w_ref, b_ref, o_ref, acc_ref):
        t = pl.program_id(1)

        @pl.when(t == 0)
        def _():
            acc_ref[...] = jnp.full(acc_ref.shape, -jnp.inf, acc_ref.dtype)

        z = jnp.dot(a_ref[...], w_ref[...], preferred_element_type=jnp.float32)
        acc_ref[...] = jnp.maximum(acc_ref[...], z + b_ref[...])

        @pl.when(t == pl.num_programs(1) - 1)
        def _():
            o_ref[...] = jnp.maximum(acc_ref[...], 0.0).astype(o_ref.dtype)

    out_isz = jnp.dtype(out_dtype).itemsize
    cost = pl.CostEstimate(
        flops=2 * T * Mp * K * N,
        transcendentals=0,
        bytes_accessed=int(T * Mp * K * a4.dtype.itemsize + K * N * w.dtype.itemsize
                           + N * 4 + Mp * N * out_isz))

    out = pl.pallas_call(
        kernel,
        out_shape=jax.ShapeDtypeStruct((Mp, N), out_dtype),
        grid=(Mp // tm, T),                         # reduction (tap) axis last
        in_specs=[
            pl.BlockSpec((pl.Squeezed(), tm, K), lambda i, t: (t, i, 0)),
            pl.BlockSpec((K, N), lambda i, t: (0, 0)),   # weights VMEM resident
            pl.BlockSpec((1, N), lambda i, t: (0, 0)),
        ],
        out_specs=pl.BlockSpec((tm, N), lambda i, t: (i, 0)),
        scratch_shapes=[pltpu.VMEM((tm, N), jnp.float32)],
        compiler_params=pltpu.CompilerParams(
            dimension_semantics=("parallel", "arbitrary"),
            vmem_limit_bytes=32 * 1024 * 1024),
        cost_estimate=cost,
    )(a4, w, b)
    return out[:M]


# ---------------------------------------------------------------------------
# Kernel 3: fc1 + ReLU + fc2 + log_softmax, fused (M-tiled only; fc1 weights VMEM-resident)
# ---------------------------------------------------------------------------
def _mlp_head(a, w1, b1, w2, b2, *, max_tm=128):
    """a:[M,9216] bf16, w1:[9216,128] bf16, b1:[1,128] f32, w2:[128,10] f32, b2:[1,10] f32."""
    M, K = a.shape
    Kw, H = w1.shape
    assert K == Kw
    C = w2.shape[1]
    tm = _pick_tm(M, max_tm)
    Mp = _round_up(M, tm)
    a = _pad_rows(a, Mp)

    def kernel(a_ref, w1_ref, b1_ref, w2_ref, b2_ref, o_ref):
        h = jnp.maximum(
            jnp.dot(a_ref[...], w1_ref[...], preferred_element_type=jnp.float32)
            + b1_ref[...], 0.0)
        z = jnp.dot(h, w2_ref[...], preferred_element_type=jnp.float32) + b2_ref[...]
        z = z - jnp.max(z, axis=-1, keepdims=True)
        o_ref[...] = (z - jnp.log(jnp.sum(jnp.exp(z), axis=-1, keepdims=True))
                      ).astype(o_ref.dtype)

    cost = pl.CostEstimate(
        flops=2 * Mp * K * H + 2 * Mp * H * C,
        transcendentals=Mp * (C + 1),
        bytes_accessed=int(Mp * K * a.dtype.itemsize + K * H * w1.dtype.itemsize
                           + H * 4 + H * C * 4 + C * 4 + Mp * C * 4))

    out = pl.pallas_call(
        kernel,
        out_shape=jax.ShapeDtypeStruct((Mp, C), jnp.float32),
        grid=(Mp // tm,),
        in_specs=[
            pl.BlockSpec((tm, K), lambda i: (i, 0)),
            pl.BlockSpec((K, H), lambda i: (0, 0)),   # fc1 weights VMEM resident
            pl.BlockSpec((1, H), lambda i: (0, 0)),
            pl.BlockSpec((H, C), lambda i: (0, 0)),   # fc2 weights VMEM resident
            pl.BlockSpec((1, C), lambda i: (0, 0)),
        ],
        out_specs=pl.BlockSpec((tm, C), lambda i: (i, 0)),
        compiler_params=pltpu.CompilerParams(
            dimension_semantics=("parallel",),
            vmem_limit_bytes=32 * 1024 * 1024),
        cost_estimate=cost,
    )(a, w1, b1, w2, b2)
    return out[:M]


# ---------------------------------------------------------------------------
# XLA-side glue: im2col layouts + one-time parameter preparation
# ---------------------------------------------------------------------------
def _im2col_conv1(x):
    """x: [N,28,28,1] -> [N*26*26, 9]; feature order (kh, kw, cin)."""
    N = x.shape[0]
    cols = [x[:, i:i + 26, j:j + 26, :] for i in range(3) for j in range(3)]
    return jnp.concatenate(cols, axis=-1).reshape(N * 26 * 26, 9)


def _im2col_conv2_tap_major(y):
    """y: [N,26,26,32] -> [4, N*12*12, 288].

    Row (n, ph, pw) of tap t=(di,dj) is the im2col row of conv2 output position
    (2*ph+di, 2*pw+dj); feature order (kh, kw, cin).  The 2x2 max pool becomes a
    max-reduction over the leading tap axis inside the conv kernel.
    """
    N = y.shape[0]
    taps = []
    for di in range(2):
        for dj in range(2):
            feats = []
            for ki in range(3):
                for kj in range(3):
                    r0, c0 = di + ki, dj + kj
                    feats.append(y[:, r0:r0 + 24:2, c0:c0 + 24:2, :])   # [N,12,12,32]
            taps.append(jnp.concatenate(feats, axis=-1).reshape(N * 144, 288))
    return jnp.stack(taps, axis=0)


def init_params(key):
    """Same shapes / index conventions as the PyTorch module."""
    ks = jax.random.split(key, 8)

    def rnd(k, shape, scale):
        return scale * jax.random.normal(k, shape, dtype=jnp.float32)

    return {
        "conv1_w": rnd(ks[0], (32, 1, 3, 3), 0.3),
        "conv1_b": rnd(ks[1], (32,), 0.1),
        "conv2_w": rnd(ks[2], (64, 32, 3, 3), 0.05),
        "conv2_b": rnd(ks[3], (64,), 0.1),
        "fc1_w":   rnd(ks[4], (128, 9216), 0.01),
        "fc1_b":   rnd(ks[5], (128,), 0.1),
        "fc2_w":   rnd(ks[6], (10, 128), 0.05),
        "fc2_b":   rnd(ks[7], (10,), 0.1),
    }


def prepare_params(p):
    """One-time reordering/casting of weights into kernel-ready layouts (zero runtime cost)."""
    # conv weights -> [kh*kw*cin, cout]
    w1_base = jnp.transpose(p["conv1_w"], (2, 3, 1, 0)).reshape(9 * 1, 32)
    w2_base = jnp.transpose(p["conv2_w"], (2, 3, 1, 0)).reshape(9 * 32, 64)
    # Block-diagonal packing: 4 conv1 pixels / 2 conv2 pixels per matmul row -> 128-lane
    # (unmasked) outputs and fuller MXU output lanes, at zero extra MXU passes.
    w1 = jnp.kron(jnp.eye(4, dtype=jnp.float32), w1_base).astype(jnp.bfloat16)   # [36, 128]
    w2 = jnp.kron(jnp.eye(2, dtype=jnp.float32), w2_base).astype(jnp.bfloat16)   # [576, 128]
    b1 = jnp.tile(p["conv1_b"], 4).reshape(1, 128).astype(jnp.float32)
    b2 = jnp.tile(p["conv2_b"], 2).reshape(1, 128).astype(jnp.float32)
    # fc1: PyTorch flatten order is (c, h, w); our pooled activations flatten as (h, w, c),
    # so permute fc1_w's input dim once here instead of transposing activations at runtime.
    wf1 = (p["fc1_w"].reshape(128, 64, 12, 12)
           .transpose(2, 3, 1, 0).reshape(9216, 128).astype(jnp.bfloat16))
    wf2 = p["fc2_w"].T.astype(jnp.float32)                       # [128, 10], tiny -> keep f32
    return {
        "w1": w1, "b1": b1,
        "w2": w2, "b2": b2,
        "wf1": wf1, "bf1": p["fc1_b"].reshape(1, 128).astype(jnp.float32),
        "wf2": wf2, "bf2": p["fc2_b"].reshape(1, 10).astype(jnp.float32),
    }


def net_forward(pp, x_nchw):
    # x_nchw: [N, 1, 28, 28] float32 (PyTorch layout) -> NHWC bf16 internally
    N = x_nchw.shape[0]
    x = jnp.transpose(x_nchw, (0, 2, 3, 1)).astype(jnp.bfloat16)        # [N,28,28,1]

    # conv1 (1->32, 3x3) + ReLU: im2col matmul, 4 pixels packed per row (lane-dense output).
    a1 = _im2col_conv1(x).reshape(N * 169, 36)                          # [N*169, 36]  (676*9)
    y1 = _matmul_bias_relu(a1, pp["w1"], pp["b1"])                      # [N*169, 128] bf16
    y1 = y1.reshape(N, 26, 26, 32)

    # conv2 (32->64, 3x3) + ReLU + MaxPool2d(2), fused; 2 pool positions packed per row.
    a2 = _im2col_conv2_tap_major(y1).reshape(4, N * 72, 576)            # [4, N*72, 576]
    pooled = _conv_relu_maxpool(a2, pp["w2"], pp["b2"])                 # [N*72, 128] bf16

    # dropout1 / dropout2: identity in inference.
    # TODO(synk): training-mode dropout masks not implemented.

    # flatten: pooled rows are (n, ph, pw-pair) x (pair-member, c) -> plain reshape gives the
    # (h, w, c) flatten order that fc1 weights were pre-permuted to in prepare_params.
    flat = pooled.reshape(N, 12 * 12 * 64)                              # [N, 9216] bf16

    # fc1 + ReLU + fc2 + log_softmax, fused in one kernel
    return _mlp_head(flat, pp["wf1"], pp["bf1"], pp["wf2"], pp["bf2"])  # [N, 10] f32


if __name__ == "__main__":
    key = jax.random.PRNGKey(0)
    pkey, xkey = jax.random.split(key)
    params = init_params(pkey)
    prepped = prepare_params(params)                     # one-time weight reordering
    x = jax.random.normal(xkey, (2, 1, 28, 28), dtype=jnp.float32)

    out = jax.jit(net_forward)(prepped, x)
    out = jax.block_until_ready(out)

    assert out.shape == (2, 10), out.shape
    # log_softmax rows must exponentiate-sum to 1
    row_sums = jnp.exp(out).sum(axis=1)
    assert bool(jnp.allclose(row_sums, 1.0, atol=1e-3)), row_sums
    print("KERNEL_OK")
</pallas_src>

<mosaic_0001>
module attributes {stable_mosaic.version = 11 : i64} {
  func.func @kernel(%arg0: i32, %arg1: memref<176x36xbf16, #tpu.memory_space<vmem>>, %arg2: memref<36x128xbf16, #tpu.memory_space<vmem>>, %arg3: memref<1x128xf32, #tpu.memory_space<vmem>>, %arg4: memref<176x128xbf16, #tpu.memory_space<vmem>>) attributes {dimension_semantics = [#tpu.dimension_semantics<parallel>], iteration_bounds = array<i64: 2>, scalar_prefetch = 0 : i64, scratch_operands = 0 : i64, tpu.core_type = #tpu.core_type<tc>, window_params = [{transform_indices = @transform_0, window_bounds = array<i64: 176, 36>}, {pipeline_mode = #tpu.pipeline_mode<synchronous>, transform_indices = @transform_1, window_bounds = array<i64: 36, 128>}, {pipeline_mode = #tpu.pipeline_mode<synchronous>, transform_indices = @transform_2, window_bounds = array<i64: 1, 128>}, {transform_indices = @transform_3, window_bounds = array<i64: 176, 128>}]} {
    %c0 = arith.constant 0 : index
    %c0_0 = arith.constant 0 : index
    %0 = vector.load %arg1[%c0, %c0_0] : memref<176x36xbf16, #tpu.memory_space<vmem>>, vector<176x36xbf16>
    %c0_1 = arith.constant 0 : index
    %c0_2 = arith.constant 0 : index
    %1 = vector.load %arg2[%c0_1, %c0_2] : memref<36x128xbf16, #tpu.memory_space<vmem>>, vector<36x128xbf16>
    %cst = arith.constant dense<0.000000e+00> : vector<176x128xf32>
    %2 = tpu.matmul %0, %1, %cst {dimension_numbers = #tpu.dot_dimension_numbers<[1], [0], [0], [1], [0, 0, 1, 1], [], []>} : vector<176x36xbf16>, vector<36x128xbf16>, vector<176x128xf32> -> vector<176x128xf32>
    %c0_3 = arith.constant 0 : index
    %c0_4 = arith.constant 0 : index
    %3 = vector.load %arg3[%c0_3, %c0_4] : memref<1x128xf32, #tpu.memory_space<vmem>>, vector<1x128xf32>
    %4 = vector.broadcast %3 : vector<1x128xf32> to vector<176x128xf32>
    %5 = arith.addf %2, %4 : vector<176x128xf32>
    %cst_5 = arith.constant 0.000000e+00 : f32
    %6 = vector.broadcast %cst_5 : f32 to vector<176x128xf32>
    %7 = arith.maximumf %5, %6 : vector<176x128xf32>
    %8 = arith.truncf %7 : vector<176x128xf32> to vector<176x128xbf16>
    %c0_6 = arith.constant 0 : index
    %c0_7 = arith.constant 0 : index
    %9 = vector.load %arg4[%c0_6, %c0_7] : memref<176x128xbf16, #tpu.memory_space<vmem>>, vector<176x128xbf16>
    tpu.vector_store %arg4[%c0_6, %c0_7], %8 {strides = array<i32>} : memref<176x128xbf16, #tpu.memory_space<vmem>>, vector<176x128xbf16>,
    return
  }
  func.func @transform_0(%arg0: i32) -> (i32, i32) {
    %c0_i32 = arith.constant 0 : i32
    %c0_i32_0 = arith.constant 0 : i32
    return %arg0, %c0_i32 : i32, i32
  }
  func.func @transform_1(%arg0: i32) -> (i32, i32) {
    %c0_i32 = arith.constant 0 : i32
    %c0_i32_0 = arith.constant 0 : i32
    %c0_i32_1 = arith.constant 0 : i32
    return %c0_i32, %c0_i32_0 : i32, i32
  }
  func.func @transform_2(%arg0: i32) -> (i32, i32) {
    %c0_i32 = arith.constant 0 : i32
    %c0_i32_0 = arith.constant 0 : i32
    %c0_i32_1 = arith.constant 0 : i32
    return %c0_i32, %c0_i32_0 : i32, i32
  }
  func.func @transform_3(%arg0: i32) -> (i32, i32) {
    %c0_i32 = arith.constant 0 : i32
    %c0_i32_0 = arith.constant 0 : i32
    return %arg0, %c0_i32 : i32, i32
  }
}

module attributes {stable_mosaic.version = 11 : i64} {
  func.func @kernel(%arg0: i32, %arg1: i32, %arg2: memref<1x80x576xbf16, #tpu.memory_space<vmem>>, %arg3: memref<576x128xbf16, #tpu.memory_space<vmem>>, %arg4: memref<1x128xf32, #tpu.memory_space<vmem>>, %arg5: memref<80x128xbf16, #tpu.memory_space<vmem>>, %arg6: memref<80x128xf32, #tpu.memory_space<vmem>>) attributes {dimension_semantics = [#tpu.dimension_semantics<parallel>, #tpu.dimension_semantics<arbitrary>], iteration_bounds = array<i64: 2, 4>, scalar_prefetch = 0 : i64, scratch_operands = 1 : i64, tpu.core_type = #tpu.core_type<tc>, window_params = [{transform_indices = @transform_0, window_bounds = array<i64: 1, 80, 576>}, {pipeline_mode = #tpu.pipeline_mode<synchronous>, transform_indices = @transform_1, window_bounds = array<i64: 576, 128>}, {pipeline_mode = #tpu.pipeline_mode<synchronous>, transform_indices = @transform_2, window_bounds = array<i64: 1, 128>}, {transform_indices = @transform_3, window_bounds = array<i64: 80, 128>}]} {
    %c0_i32 = arith.constant 0 : i32
    %0 = arith.cmpi eq, %arg1, %c0_i32 : i32
    %1 = arith.extui %0 : i1 to i32
    %c0_i32_0 = arith.constant 0 : i32
    %2 = arith.cmpi ne, %1, %c0_i32_0 : i32
    scf.if %2 {
      %cst_12 = arith.constant 0xFF800000 : f32
      %16 = vector.broadcast %cst_12 : f32 to vector<80x128xf32>
      %c0_13 = arith.constant 0 : index
      %c0_14 = arith.constant 0 : index
      %17 = vector.load %arg6[%c0_13, %c0_14] : memref<80x128xf32, #tpu.memory_space<vmem>>, vector<80x128xf32>
      tpu.vector_store %arg6[%c0_13, %c0_14], %16 {strides = array<i32>} : memref<80x128xf32, #tpu.memory_space<vmem>>, vector<80x128xf32>,
    } else {
    }
    %c0 = arith.constant 0 : index
    %c0_1 = arith.constant 0 : index
    %c0_2 = arith.constant 0 : index
    %3 = vector.load %arg2[%c0, %c0_1, %c0_2] : memref<1x80x576xbf16, #tpu.memory_space<vmem>>, vector<1x80x576xbf16>
    %4 = vector.shape_cast %3 : vector<1x80x576xbf16> to vector<80x576xbf16>
    %c0_3 = arith.constant 0 : index
    %c0_4 = arith.constant 0 : index
    %5 = vector.load %arg3[%c0_3, %c0_4] : memref<576x128xbf16, #tpu.memory_space<vmem>>, vector<576x128xbf16>
    %cst = arith.constant dense<0.000000e+00> : vector<80x128xf32>
    %6 = tpu.matmul %4, %5, %cst {dimension_numbers = #tpu.dot_dimension_numbers<[1], [0], [0], [1], [0, 0, 1, 1], [], []>} : vector<80x576xbf16>, vector<576x128xbf16>, vector<80x128xf32> -> vector<80x128xf32>
    %c0_5 = arith.constant 0 : index
    %c0_6 = arith.constant 0 : index
    %7 = vector.load %arg6[%c0_5, %c0_6] : memref<80x128xf32, #tpu.memory_space<vmem>>, vector<80x128xf32>
    %c0_7 = arith.constant 0 : index
    %c0_8 = arith.constant 0 : index
    %8 = vector.load %arg4[%c0_7, %c0_8] : memref<1x128xf32, #tpu.memory_space<vmem>>, vector<1x128xf32>
    %9 = vector.broadcast %8 : vector<1x128xf32> to vector<80x128xf32>
    %10 = arith.addf %6, %9 : vector<80x128xf32>
    %11 = arith.maximumf %7, %10 : vector<80x128xf32>
    %c0_9 = arith.constant 0 : index
    %c0_10 = arith.constant 0 : index
    %12 = vector.load %arg6[%c0_9, %c0_10] : memref<80x128xf32, #tpu.memory_space<vmem>>, vector<80x128xf32>
    tpu.vector_store %arg6[%c0_9, %c0_10], %11 {strides = array<i32>} : memref<80x128xf32, #tpu.memory_space<vmem>>, vector<80x128xf32>,
    %c3_i32 = arith.constant 3 : i32
    %13 = arith.cmpi eq, %arg1, %c3_i32 : i32
    %14 = arith.extui %13 : i1 to i32
    %c0_i32_11 = arith.constant 0 : i32
    %15 = arith.cmpi ne, %14, %c0_i32_11 : i32
    scf.if %15 {
      %c0_12 = arith.constant 0 : index
      %c0_13 = arith.constant 0 : index
      %16 = vector.load %arg6[%c0_12, %c0_13] : memref<80x128xf32, #tpu.memory_space<vmem>>, vector<80x128xf32>
      %cst_14 = arith.constant 0.000000e+00 : f32
      %17 = vector.broadcast %cst_14 : f32 to vector<80x128xf32>
      %18 = arith.maximumf %16, %17 : vector<80x128xf32>
      %19 = arith.truncf %18 : vector<80x128xf32> to vector<80x128xbf16>
      %c0_15 = arith.constant 0 : index
      %c0_16 = arith.constant 0 : index
      %20 = vector.load %arg5[%c0_15, %c0_16] : memref<80x128xbf16, #tpu.memory_space<vmem>>, vector<80x128xbf16>
      tpu.vector_store %arg5[%c0_15, %c0_16], %19 {strides = array<i32>} : memref<80x128xbf16, #tpu.memory_space<vmem>>, vector<80x128xbf16>,
    } else {
    }
    return
  }
  func.func @transform_0(%arg0: i32, %arg1: i32) -> (i32, i32, i32) {
    %c0_i32 = arith.constant 0 : i32
    %c0_i32_0 = arith.constant 0 : i32
    return %arg1, %arg0, %c0_i32 : i32, i32, i32
  }
  func.func @transform_1(%arg0: i32, %arg1: i32) -> (i32, i32) {
    %c0_i32 = arith.constant 0 : i32
    %c0_i32_0 = arith.constant 0 : i32
    %c0_i32_1 = arith.constant 0 : i32
    return %c0_i32, %c0_i32_0 : i32, i32
  }
  func.func @transform_2(%arg0: i32, %arg1: i32) -> (i32, i32) {
    %c0_i32 = arith.constant 0 : i32
    %c0_i32_0 = arith.constant 0 : i32
    %c0_i32_1 = arith.constant 0 : i32
    return %c0_i32, %c0_i32_0 : i32, i32
  }
  func.func @transform_3(%arg0: i32, %arg1: i32) -> (i32, i32) {
    %c0_i32 = arith.constant 0 : i32
    %c0_i32_0 = arith.constant 0 : i32
    return %arg0, %c0_i32 : i32, i32
  }
}

module attributes {stable_mosaic.version = 11 : i64} {
  func.func @kernel(%arg0: i32, %arg1: memref<16x9216xbf16, #tpu.memory_space<vmem>>, %arg2: memref<9216x128xbf16, #tpu.memory_space<vmem>>, %arg3: memref<1x128xf32, #tpu.memory_space<vmem>>, %arg4: memref<128x10xf32, #tpu.memory_space<vmem>>, %arg5: memref<1x10xf32, #tpu.memory_space<vmem>>, %arg6: memref<16x10xf32, #tpu.memory_space<vmem>>) attributes {dimension_semantics = [#tpu.dimension_semantics<parallel>], iteration_bounds = array<i64: 1>, scalar_prefetch = 0 : i64, scratch_operands = 0 : i64, tpu.core_type = #tpu.core_type<tc>, window_params = [{transform_indices = @transform_0, window_bounds = array<i64: 16, 9216>}, {pipeline_mode = #tpu.pipeline_mode<synchronous>, transform_indices = @transform_1, window_bounds = array<i64: 9216, 128>}, {pipeline_mode = #tpu.pipeline_mode<synchronous>, transform_indices = @transform_2, window_bounds = array<i64: 1, 128>}, {pipeline_mode = #tpu.pipeline_mode<synchronous>, transform_indices = @transform_3, window_bounds = array<i64: 128, 10>}, {pipeline_mode = #tpu.pipeline_mode<synchronous>, transform_indices = @transform_4, window_bounds = array<i64: 1, 10>}, {transform_indices = @transform_5, window_bounds = array<i64: 16, 10>}]} {
    %c0 = arith.constant 0 : index
    %c0_0 = arith.constant 0 : index
    %0 = vector.load %arg1[%c0, %c0_0] : memref<16x9216xbf16, #tpu.memory_space<vmem>>, vector<16x9216xbf16>
    %c0_1 = arith.constant 0 : index
    %c0_2 = arith.constant 0 : index
    %1 = vector.load %arg2[%c0_1, %c0_2] : memref<9216x128xbf16, #tpu.memory_space<vmem>>, vector<9216x128xbf16>
    %cst = arith.constant dense<0.000000e+00> : vector<16x128xf32>
    %2 = tpu.matmul %0, %1, %cst {dimension_numbers = #tpu.dot_dimension_numbers<[1], [0], [0], [1], [0, 0, 1, 1], [], []>} : vector<16x9216xbf16>, vector<9216x128xbf16>, vector<16x128xf32> -> vector<16x128xf32>
    %c0_3 = arith.constant 0 : index
    %c0_4 = arith.constant 0 : index
    %3 = vector.load %arg3[%c0_3, %c0_4] : memref<1x128xf32, #tpu.memory_space<vmem>>, vector<1x128xf32>
    %4 = vector.broadcast %3 : vector<1x128xf32> to vector<16x128xf32>
    %5 = arith.addf %2, %4 : vector<16x128xf32>
    %cst_5 = arith.constant 0.000000e+00 : f32
    %6 = vector.broadcast %cst_5 : f32 to vector<16x128xf32>
    %7 = arith.maximumf %5, %6 : vector<16x128xf32>
    %c0_6 = arith.constant 0 : index
    %c0_7 = arith.constant 0 : index
    %8 = vector.load %arg4[%c0_6, %c0_7] : memref<128x10xf32, #tpu.memory_space<vmem>>, vector<128x10xf32>
    %cst_8 = arith.constant dense<0.000000e+00> : vector<16x10xf32>
    %9 = tpu.matmul %7, %8, %cst_8 {dimension_numbers = #tpu.dot_dimension_numbers<[1], [0], [0], [1], [0, 0, 1, 1], [], []>} : vector<16x128xf32>, vector<128x10xf32>, vector<16x10xf32> -> vector<16x10xf32>
    %c0_9 = arith.constant 0 : index
    %c0_10 = arith.constant 0 : index
    %10 = vector.load %arg5[%c0_9, %c0_10] : memref<1x10xf32, #tpu.memory_space<vmem>>, vector<1x10xf32>
    %11 = vector.broadcast %10 : vector<1x10xf32> to vector<16x10xf32>
    %12 = arith.addf %9, %11 : vector<16x10xf32>
    %cst_11 = arith.constant dense<0xFF800000> : vector<16xf32>
    %13 = vector.multi_reduction <maximumf>, %12, %cst_11 [1] : vector<16x10xf32> to vector<16xf32>
    %14 = vector.shape_cast %13 : vector<16xf32> to vector<16x1xf32>
    %15 = vector.broadcast %14 : vector<16x1xf32> to vector<16x10xf32>
    %16 = arith.subf %12, %15 : vector<16x10xf32>
    %17 = math.exp %16 : vector<16x10xf32>
    %cst_12 = arith.constant dense<0.000000e+00> : vector<16xf32>
    %18 = vector.multi_reduction <add>, %17, %cst_12 [1] : vector<16x10xf32> to vector<16xf32>
    %19 = vector.shape_cast %18 : vector<16xf32> to vector<16x1xf32>
    %20 = math.log %19 : vector<16x1xf32>
    %21 = vector.broadcast %20 : vector<16x1xf32> to vector<16x10xf32>
    %22 = arith.subf %16, %21 : vector<16x10xf32>
    %c0_13 = arith.constant 0 : index
    %c0_14 = arith.constant 0 : index
    %23 = vector.load %arg6[%c0_13, %c0_14] : memref<16x10xf32, #tpu.memory_space<vmem>>, vector<16x10xf32>
    tpu.vector_store %arg6[%c0_13, %c0_14], %22 {strides = array<i32>} : memref<16x10xf32, #tpu.memory_space<vmem>>, vector<16x10xf32>,
    return
  }
  func.func @transform_0(%arg0: i32) -> (i32, i32) {
    %c0_i32 = arith.constant 0 : i32
    %c0_i32_0 = arith.constant 0 : i32
    return %arg0, %c0_i32 : i32, i32
  }
  func.func @transform_1(%arg0: i32) -> (i32, i32) {
    %c0_i32 = arith.constant 0 : i32
    %c0_i32_0 = arith.constant 0 : i32
    %c0_i32_1 = arith.constant 0 : i32
    return %c0_i32, %c0_i32_0 : i32, i32
  }
  func.func @transform_2(%arg0: i32) -> (i32, i32) {
    %c0_i32 = arith.constant 0 : i32
    %c0_i32_0 = arith.constant 0 : i32
    %c0_i32_1 = arith.constant 0 : i32
    return %c0_i32, %c0_i32_0 : i32, i32
  }
  func.func @transform_3(%arg0: i32) -> (i32, i32) {
    %c0_i32 = arith.constant 0 : i32
    %c0_i32_0 = arith.constant 0 : i32
    %c0_i32_1 = arith.constant 0 : i32
    return %c0_i32, %c0_i32_0 : i32, i32
  }
  func.func @transform_4(%arg0: i32) -> (i32, i32) {
    %c0_i32 = arith.constant 0 : i32
    %c0_i32_0 = arith.constant 0 : i32
    %c0_i32_1 = arith.constant 0 : i32
    return %c0_i32, %c0_i32_0 : i32, i32
  }
  func.func @transform_5(%arg0: i32) -> (i32, i32) {
    %c0_i32 = arith.constant 0 : i32
    %c0_i32_0 = arith.constant 0 : i32
    return %arg0, %c0_i32 : i32, i32
  }
}

</mosaic_0001>

<bundles_post_ra>
// kernel: net_forward.3
= control target key start
LH: loop header
LB: loop body
LE: loop exit
PB: predicated region body
PF: predicated region fallthrough
CT: control target
= control target key end

     0   :  { %s696_s12 = smov 0   ;;  %s780_s0 = inlined_call_operand.vmem [shape: bf16[352,36], index: 0, kind: input, shape index: {}]   ;;  %s781_s1 = inlined_call_operand.vmem [shape: bf16[36,128], index: 1, kind: input, shape index: {}]   ;;  %s782_s2 = inlined_call_operand.vmem [shape: f32[1,128], index: 2, kind: input, shape index: {}]   ;;  %s783_s3 = inlined_call_operand.vmem [shape: bf16[352,128], index: 3, kind: output, shape index: {}]  }
   0x1 LB: > { %s500_s13 = sadd.s32 4294967295, %s674_s12   ;;  %p504_p0 = scmp.ge.s32.totalorder %s674_s12, 1  ;;  %s674_s12 = sphi %s696_s12, %s13_s12  }
   0x2   : > { %p138_p1 = scmp.lt.s32.totalorder %s674_s12, 3 }
   0x4   : > { %p139_p2 = pnand %p504_p0, %p138_p1 }
   0x5   : > { %s162_s16 = smul.u32 (!%p139_p2), 22, %s500_s13 }
   0x6   : > { %142 = sbr.rel (%p139_p2) target bundleno = 208 (0xd0), region = 32 }
   0x7   : > { %p163_p3 = scmp.lt.s32.totalorder (!%p139_p2), %s162_s16, 43 }
   0xb   : > { %v201_v0 = vld [vmem:[%s781_s1 + $0x10] sm:$0x3]  ;;  %vm310_vm0 = vcmask 1041408   ;;  %s785_s16 = smov (!%p163_p3, %s162_s16), 43  ;;  %v584_v4 = vld [vmem:[%s781_s1 + $0x8] sm:$0xff]  ;;  %v583_v5 = vld [vmem:[%s781_s1] sm:$0xff] }
   0xc   : > { %v270_v1 = vunpack.c.l.b16 %v201_v0  ;;  %s505_s19 = sshll.u32 %s785_s16, 2  ;;  %vm276_vm1 = vcmask 293888   ;;  %v735_v19 = vld [vmem:[%s782_s2] ss:$0 sm:$0xff] }
   0xd   : > { %s166_s24 = scalar_lea.vmem %s780_s0, %s505_s19  ;;  %s746_s29 = scalar_lea.vmem %s783_s3, %s505_s19 }
   0xe   : > { %v273_v2 = vpack.c.b16 %v270_v1, %v270_v1  ;;  %v572_v6 = vld [vmem:[%s166_s24] sm:$0xff]  ;;  %v575_v7 = vld [vmem:[%s166_s24 + $0x18] sm:$0xff]  ;;  %v578_v8 = vld [vmem:[%s166_s24 + $0x30] sm:$0xff] }
   0xf   : > { %v581_v9 = vld [vmem:[%s166_s24 + $0x48] sm:$0xff]  ;;  %v576_v11 = vld [vmem:[%s166_s24 + $0x20] sm:$0xff]  ;;  %v579_v12 = vld [vmem:[%s166_s24 + $0x38] sm:$0xff] }
  0x10   : > { %v312_v3 = vsel %vm310_vm0, %v273_v2, 0  ;;  %v573_v10 = vld [vmem:[%s166_s24 + $0x8] sm:$0xff]  ;;  %v582_v13 = vld [vmem:[%s166_s24 + $0x50] sm:$0xff]  ;;  %v580_v16 = vld [vmem:[%s166_s24 + $0x40] sm:$0xff] }
  0x11   : > { %319 = vmatpush.bf16.msra.mxu0 %v312_v3  ;;  %650 = vmatpush.bf16.msra.mxu1 %v312_v3  ;;  %v574_v14 = vld [vmem:[%s166_s24 + $0x10] sm:$0xff]  ;;  %v577_v15 = vld [vmem:[%s166_s24 + $0x28] sm:$0xff] }
  0x12   : > { %651 = vmatpush.bf16.msra.mxu2 %v312_v3  ;;  %652 = vmatpush.bf16.msra.mxu3 %v312_v3 }
  0x15   : > { %320 = vmatpush.bf16.msra.mxu0 %v584_v4  ;;  %653 = vmatpush.bf16.msra.mxu1 %v584_v4 }
  0x16   : > { %654 = vmatpush.bf16.msra.mxu2 %v584_v4  ;;  %655 = vmatpush.bf16.msra.mxu3 %v584_v4 }
  0x19   : > { %321 = vmatpush.bf16.msra.mxu0 %v583_v5  ;;  %656 = vmatpush.bf16.msra.mxu1 %v583_v5 }
  0x1a   : > { %657 = vmatpush.bf16.msra.mxu2 %v583_v5  ;;  %658 = vmatpush.bf16.msra.mxu3 %v583_v5 }
  0x1c   : > { %559 = vmatmul.msk.bf16.vlgmr.msra.gmra.mxu0 %vm276_vm1, %v572_v6  ;;  %562 = vmatmul.msk.bf16.vlgmr.msra.gmra.mxu1 %vm276_vm1, %v575_v7 }
  0x1d   : > { %565 = vmatmul.msk.bf16.vlgmr.msra.gmra.mxu2 %vm276_vm1, %v578_v8  ;;  %568 = vmatmul.msk.bf16.vlgmr.msra.gmra.mxu3 %vm276_vm1, %v581_v9 }
  0x2c   : > { %560 = vmatmul.msk.bf16.gmra.mxu0 %vm276_vm1, %v573_v10  ;;  %563 = vmatmul.msk.bf16.gmra.mxu1 %vm276_vm1, %v576_v11 }
  0x2d   : > { %566 = vmatmul.msk.bf16.gmra.mxu2 %vm276_vm1, %v579_v12  ;;  %569 = vmatmul.msk.bf16.gmra.mxu3 %vm276_vm1, %v582_v13 }
  0x3c   : > { %561 = vmatmul.msk.bf16.gmra.mxu0 %vm276_vm1, %v574_v14  ;;  %564 = vmatmul.msk.bf16.gmra.mxu1 %vm276_vm1, %v577_v15 }
  0x3d   : > { %567 = vmatmul.msk.bf16.gmra.mxu2 %vm276_vm1, %v580_v16 }
  0x99   : > { %v323_v17 = vpop.f32.mrf.mxu0  ;;  %v338_v18 = vpop.f32.mrf.mxu1 }
  0x9a   : > { %v324_v20 = vadd.f32 %v735_v19, %v323_v17  ;;  %v339_v21 = vadd.f32 %v735_v19, %v338_v18 }
  0x9c   : > { %v378_v28 = vmax.f32 %v324_v20, 0.0  ;;  %v384_v29 = vmax.f32 %v339_v21, 0.0 }
  0xa0   : > { %v353_v22 = vpop.f32.mrf.mxu2  ;;  %v368_v23 = vpop.f32.mrf.mxu3 }
  0xa1   : > { %v325_v24 = vpop.f32.mrf.mxu0  ;;  %v340_v25 = vpop.f32.mrf.mxu1  ;;  %v369_v32 = vadd.f32 %v735_v19, %v368_v23  ;;  %v354_v35 = vadd.f32 %v735_v19, %v353_v22 }
  0xa2   : > { %v326_v26 = vadd.f32 %v735_v19, %v325_v24  ;;  %v341_v27 = vadd.f32 %v735_v19, %v340_v25 }
  0xa3   : > { %v396_v39 = vmax.f32 %v369_v32, 0.0  ;;  %v390_v43 = vmax.f32 %v354_v35, 0.0 }
  0xa4   : > { %v379_v30 = vmax.f32 %v326_v26, 0.0  ;;  %v385_v31 = vmax.f32 %v341_v27, 0.0 }
  0xa6   : > { %v588_v33 = vpack.c.bf16 %v379_v30, %v378_v28  ;;  %v603_v34 = vpack.c.bf16 %v385_v31, %v384_v29 }
  0xa8   : > { %589 = vst [vmem:[%s746_s29] sm:$0xff] %v588_v33   ;;  %v355_v36 = vpop.f32.mrf.mxu2  ;;  %v370_v37 = vpop.f32.mrf.mxu3 }
  0xa9   : > { %642 = vst [vmem:[%s746_s29 + $0x18] sm:$0xff] %v603_v34   ;;  %v356_v38 = vadd.f32 %v735_v19, %v355_v36  ;;  %v328_v40 = vpop.f32.mrf.mxu0  ;;  %v343_v41 = vpop.f32.mrf.mxu1  ;;  %v371_v42 = vadd.f32 %v735_v19, %v370_v37 }
  0xaa   : > { %v329_v48 = vadd.f32 %v735_v19, %v328_v40  ;;  %v344_v49 = vadd.f32 %v735_v19, %v343_v41 }
  0xab   : > { %v391_v44 = vmax.f32 %v356_v38, 0.0  ;;  %v397_v45 = vmax.f32 %v371_v42, 0.0 }
  0xac   : > { %v380_v56 = vmax.f32 %v329_v48, 0.0  ;;  %v386_v57 = vmax.f32 %v344_v49, 0.0 }
  0xad   : > { %v618_v46 = vpack.c.bf16 %v391_v44, %v390_v43  ;;  %v633_v47 = vpack.c.bf16 %v397_v45, %v396_v39 }
  0xaf   : > { %645 = vst [vmem:[%s746_s29 + $0x30] sm:$0xff] %v618_v46  }
  0xb0   : > { %v358_v50 = vpop.f32.mrf.mxu2  ;;  %648 = vst [vmem:[%s746_s29 + $0x48] sm:$0xff] %v633_v47   ;;  %v373_v51 = vpop.f32.mrf.mxu3 }
  0xb1   : > { %v330_v52 = vpop.f32.mrf.mxu0  ;;  %v345_v53 = vpop.f32.mrf.mxu1  ;;  %v374_v60 = vadd.f32 %v735_v19, %v373_v51  ;;  %v359_v63 = vadd.f32 %v735_v19, %v358_v50 }
  0xb2   : > { %v331_v54 = vadd.f32 %v735_v19, %v330_v52  ;;  %v346_v55 = vadd.f32 %v735_v19, %v345_v53 }
  0xb3   : > { %v398_v3 = vmax.f32 %v374_v60, 0.0  ;;  %v392_v7 = vmax.f32 %v359_v63, 0.0 }
  0xb4   : > { %v381_v58 = vmax.f32 %v331_v54, 0.0  ;;  %v387_v59 = vmax.f32 %v346_v55, 0.0 }
  0xb6   : > { %v593_v61 = vpack.c.bf16 %v381_v58, %v380_v56  ;;  %v608_v62 = vpack.c.bf16 %v387_v59, %v386_v57 }
  0xb8   : > { %640 = vst [vmem:[%s746_s29 + $0x8] sm:$0xff] %v593_v61   ;;  %v360_v0 = vpop.f32.mrf.mxu2  ;;  %v375_v1 = vpop.f32.mrf.mxu3 }
  0xb9   : > { %643 = vst [vmem:[%s746_s29 + $0x20] sm:$0xff] %v608_v62   ;;  %v361_v2 = vadd.f32 %v735_v19, %v360_v0  ;;  %v333_v4 = vpop.f32.mrf.mxu0  ;;  %v348_v5 = vpop.f32.mrf.mxu1  ;;  %v376_v6 = vadd.f32 %v735_v19, %v375_v1 }
  0xba   : > { %v334_v12 = vadd.f32 %v735_v19, %v333_v4  ;;  %v349_v13 = vadd.f32 %v735_v19, %v348_v5 }
  0xbb   : > { %v393_v8 = vmax.f32 %v361_v2, 0.0  ;;  %v399_v9 = vmax.f32 %v376_v6, 0.0 }
  0xbc   : > { %v382_v20 = vmax.f32 %v334_v12, 0.0  ;;  %v388_v21 = vmax.f32 %v349_v13, 0.0 }
  0xbd   : > { %v623_v10 = vpack.c.bf16 %v393_v8, %v392_v7  ;;  %v638_v11 = vpack.c.bf16 %v399_v9, %v398_v3 }
  0xbf   : > { %646 = vst [vmem:[%s746_s29 + $0x38] sm:$0xff] %v623_v10  }
  0xc0   : > { %v363_v14 = vpop.f32.mrf.mxu2  ;;  %649 = vst [vmem:[%s746_s29 + $0x50] sm:$0xff] %v638_v11  }
  0xc1   : > { %v335_v15 = vpop.f32.mrf.mxu0  ;;  %v350_v16 = vpop.f32.mrf.mxu1  ;;  %v364_v26 = vadd.f32 %v735_v19, %v363_v14 }
  0xc2   : > { %v336_v17 = vadd.f32 %v735_v19, %v335_v15  ;;  %v351_v18 = vadd.f32 %v735_v19, %v350_v16 }
  0xc3   : > { %v394_v29 = vmax.f32 %v364_v26, 0.0 }
  0xc4   : > { %v383_v22 = vmax.f32 %v336_v17, 0.0  ;;  %v389_v23 = vmax.f32 %v351_v18, 0.0 }
  0xc6   : > { %v598_v24 = vpack.c.bf16 %v383_v22, %v382_v20  ;;  %v613_v25 = vpack.c.bf16 %v389_v23, %v388_v21 }
  0xc8   : > { %641 = vst [vmem:[%s746_s29 + $0x10] sm:$0xff] %v598_v24   ;;  %v365_v27 = vpop.f32.mrf.mxu2 }
  0xc9   : > { %644 = vst [vmem:[%s746_s29 + $0x28] sm:$0xff] %v613_v25   ;;  %v366_v28 = vadd.f32 %v735_v19, %v365_v27 }
  0xcb   : > { %v395_v30 = vmax.f32 %v366_v28, 0.0 }
  0xcd   : > { %v628_v31 = vpack.c.bf16 %v395_v30, %v394_v29 }
  0xcf   : > { %647 = vst [vmem:[%s746_s29 + $0x40] sm:$0xff] %v628_v31  }
  0xd0 PF: > { %s13_s12 = sadd.s32 1, %s674_s12  }
  0xd1   : > { %p10_p4 = scmp.ge.s32.totalorder %s13_s12, 4  }
  0xd3   :  { %12 = sbr.rel (!%p10_p4) target bundleno = 1 (0x1), region = 62 }

// kernel: net_forward.4
= control target key start
LH: loop header
LB: loop body
LE: loop exit
PB: predicated region body
PF: predicated region fallthrough
CT: control target
= control target key end

     0   :  { %s1473_s12 = smov 0   ;;  %s1475_s13 = smov 0   ;;  %s1732_s0 = inlined_call_operand.vmem [shape: bf16[4,160,576], index: 0, kind: input, shape index: {}]   ;;  %s1733_s1 = inlined_call_operand.vmem [shape: bf16[576,128], index: 1, kind: input, shape index: {}]   ;;  %s1734_s2 = inlined_call_operand.vmem [shape: f32[1,128], index: 2, kind: input, shape index: {}]   ;;  %s1735_s3 = inlined_call_operand.vmem [shape: bf16[160,128], index: 3, kind: output, shape index: {}]  }
   0x1   :  { %s1477_s14 = smov 0   ;;  %s1479_s15 = smov 0  }
   0x2   :  { %s1481_s16 = smov 0  }
   0x3 LB: > { %s22_s17 = sadd.s32 1, %s1442_s14  ;;  %s25_s18 = sadd.s32 1, %s1446_s15  ;;  %s1450_s16 = sphi %s1481_s16, %s13_s16   ;;  %s1446_s15 = sphi %s1479_s15, %s1739_s15   ;;  %s1442_s14 = sphi %s1477_s14, %s1738_s14   ;;  %s1438_s13 = sphi %s1475_s13, %s1737_s13   ;;  %s1434_s12 = sphi %s1473_s12, %s1736_s12  }
   0x4   : > { %p23_p0 = scmp.ge.s32.totalorder %s22_s17, 4  ;;  %p1006_p1 = scmp.ge.s32.totalorder %s1450_s16, 1 }
   0x5   : > { %p157_p2 = scmp.lt.s32.totalorder %s1450_s16, 9 }
   0x6   : > { %s1741_s17 = smov (%p23_p0, %s22_s17), 0  ;;  %s1743_s18 = smov (!%p23_p0, %s25_s18), %s1446_s15 }
   0x7   : > { %p158_p3 = pnand %p1006_p1, %p157_p2  ;;  %p27_p4 = scmp.ge.s32.totalorder %s1743_s18, 2 }
   0x8   : > { %s186_s19 = smul.u32 (!%p158_p3), 10, %s1438_s13  ;;  %p187_p5 = scmp.lt.s32.totalorder (!%p158_p3), %s1434_s12, 3 }
   0x9   : > { %s1745_s18 = smov (%p27_p4, %s1743_s18), 0  ;;  %161 = sbr.rel (%p158_p3) target bundleno = 324 (0x144), region = 32 }
   0xa   : > { %p189_p6 = scmp.lt.s32.totalorder (!%p158_p3), %s186_s19, 19  ;;  %p1009_p7 = scmp.ne.s32.totalorder (!%p158_p3), %s1434_s12, 0 }
   0xe   : > { %s188_s20 = scalar_select %p187_p5, %s1434_s12, 3 }
   0xf   : > { %s1747_s19 = smov (!%p189_p6, %s186_s19), 19 }
  0x10   : > { %s1369_s21 = smul.u32 100, %s188_s20  ;;  %s1008_s23 = sshll.u32 %s1747_s19, 2 }
  0x11   : > { %s1368_s22 = smul.u32 5, %s1747_s19  ;;  %s1510_s26 = scalar_lea.vmem %s1735_s3, %s1008_s23 }
  0x12   : > { %207 = sbr.rel (%p1009_p7) target bundleno = 34 (0x22), region = 36 }
  0x13   : > { %s193_s27 = sadd.s32 %s1369_s21, %s1368_s22 }
  0x14   : > { %s1007_s28 = sshll.u32 %s193_s27, 2 }
  0x15   : > { %s1515_s4 = scalar_lea.vmem %s1732_s0, %s1007_s28 }
  0x17   : > { %v1452_v0 = vmov -inf  }
  0x18   : > { %208 = vst [vmem:[#allocation2 + $0x30] sm:$0xff] %v1452_v0 }
  0x19   : > { %209 = vst [vmem:[#allocation2] sm:$0xff] %v1452_v0 }
  0x1a   : > { %210 = vst [vmem:[#allocation2 + $0x18] sm:$0xff] %v1452_v0 }
  0x1b   : > { %211 = vst [vmem:[#allocation2 + $0x10] sm:$0xff] %v1452_v0 }
  0x1c   : > { %212 = vst [vmem:[#allocation2 + $0x48] sm:$0xff] %v1452_v0 }
  0x1d   : > { %213 = vst [vmem:[#allocation2 + $0x28] sm:$0xff] %v1452_v0 }
  0x1e   : > { %214 = vst [vmem:[#allocation2 + $0x8] sm:$0xff] %v1452_v0 }
  0x1f   : > { %215 = vst [vmem:[#allocation2 + $0x20] sm:$0xff] %v1452_v0 }
  0x20   : > { %216 = vst [vmem:[#allocation2 + $0x40] sm:$0xff] %v1452_v0 }
  0x21   : > { %217 = vst [vmem:[#allocation2 + $0x38] sm:$0xff] %v1452_v0 }
  0x22 PF: > { %v1294_v1 = vld [vmem:[%s1733_s1 + $0x38] sm:$0xff]  ;;  %v1293_v2 = vld [vmem:[%s1733_s1 + $0x30] sm:$0xff]  ;;  %v1292_v5 = vld [vmem:[%s1733_s1 + $0x28] sm:$0xff]  ;;  %vm675_vm0 = vcmask 523264   ;;  %p1259_p8 = scmp.ne.s32.totalorder %s1434_s12, 3 }
  0x23   : > { %691 = vmatpush.bf16.msra.mxu0 %v1294_v1  ;;  %1352 = vmatpush.bf16.msra.mxu1 %v1294_v1  ;;  %v1318_v3 = vld [vmem:[%s1733_s1 + $0xf8] sm:$0xff]  ;;  %v1317_v4 = vld [vmem:[%s1733_s1 + $0xf0] sm:$0xff]  ;;  %v1316_v6 = vld [vmem:[%s1733_s1 + $0xe8] sm:$0xff] }
  0x24   : > { %1353 = vmatpush.bf16.msra.mxu2 %v1294_v1  ;;  %793 = vmatpush.bf16.msra.mxu3 %v1318_v3  ;;  %v1291_v7 = vld [vmem:[%s1733_s1 + $0x20] sm:$0xff]  ;;  %v1290_v9 = vld [vmem:[%s1733_s1 + $0x18] sm:$0xff]  ;;  %v1289_v11 = vld [vmem:[%s1733_s1 + $0x10] sm:$0xff] }
  0x25   : > { %v1315_v8 = vld [vmem:[%s1733_s1 + $0xe0] sm:$0xff]  ;;  %v1314_v10 = vld [vmem:[%s1733_s1 + $0xd8] sm:$0xff]  ;;  %v1313_v12 = vld [vmem:[%s1733_s1 + $0xd0] sm:$0xff] }
  0x26   : > { %v1288_v13 = vld [vmem:[%s1733_s1 + $0x8] sm:$0xff]  ;;  %v1287_v15 = vld [vmem:[%s1733_s1] sm:$0xff]  ;;  %v1264_v17 = vld [vmem:[%s1515_s4 + $0x10] sm:$0xf0] }
  0x27   : > { %692 = vmatpush.bf16.msra.mxu0 %v1293_v2  ;;  %1354 = vmatpush.bf16.msra.mxu1 %v1293_v2  ;;  %v1312_v14 = vld [vmem:[%s1733_s1 + $0xc8] sm:$0xff]  ;;  %v1012_v16 = vld [vmem:[%s1515_s4] sm:$0xf]  ;;  %v1052_v18 = vld [vmem:[%s1515_s4 + $0x50] sm:$0xf] }
  0x28   : > { %1355 = vmatpush.bf16.msra.mxu2 %v1293_v2  ;;  %794 = vmatpush.bf16.msra.mxu3 %v1317_v4  ;;  %v1274_v19 = vld [vmem:[%s1515_s4 + $0x60] sm:$0xf0]  ;;  %v1302_v20 = vld [vmem:[%s1733_s1 + $0x78] sm:$0xff]  ;;  %v1092_v21 = vld [vmem:[%s1515_s4 + $0xa0] sm:$0xf]  ;;  %v1013_v25 = vor.u32 %v1264_v17, %v1012_v16 }
  0x29   : > { %v1284_v22 = vld [vmem:[%s1515_s4 + $0xb0] sm:$0xf0]  ;;  %v1310_v23 = vld [vmem:[%s1733_s1 + $0xb8] sm:$0xff]  ;;  %v1053_v26 = vor.u32 %v1274_v19, %v1052_v18  ;;  %v1311_v28 = vld [vmem:[%s1733_s1 + $0xc0] sm:$0xff] }
  0x2a   : > { %v1322_v24 = vld [vmem:[%s1733_s1 + $0x118] sm:$0xff]  ;;  %v1093_v27 = vor.u32 %v1284_v22, %v1092_v21  ;;  %v1263_v29 = vld [vmem:[%s1515_s4 + $0xc] sm:$0xf]  ;;  %v1022_v30 = vld [vmem:[%s1515_s4 + $0x1c] sm:$0xf0] }
  0x2b   : > { %693 = vmatpush.bf16.msra.mxu0 %v1292_v5  ;;  %1356 = vmatpush.bf16.msra.mxu1 %v1292_v5  ;;  %v1301_v31 = vld [vmem:[%s1733_s1 + $0x70] sm:$0xff]  ;;  %v1025_v34 = vor.u32 %v1263_v29, %v1022_v30  ;;  %v1300_v35 = vld [vmem:[%s1733_s1 + $0x68] sm:$0xff]  ;;  %v1299_v38 = vld [vmem:[%s1733_s1 + $0x60] sm:$0xff] }
  0x2c   : > { %1357 = vmatpush.bf16.msra.mxu2 %v1292_v5  ;;  %795 = vmatpush.bf16.msra.mxu3 %v1316_v6  ;;  %v1309_v32 = vld [vmem:[%s1733_s1 + $0xb0] sm:$0xff]  ;;  %v1308_v36 = vld [vmem:[%s1733_s1 + $0xa8] sm:$0xff]  ;;  %v1307_v39 = vld [vmem:[%s1733_s1 + $0xa0] sm:$0xff] }
  0x2d   : > { %v1321_v33 = vld [vmem:[%s1733_s1 + $0x110] sm:$0xff]  ;;  %v1320_v37 = vld [vmem:[%s1733_s1 + $0x108] sm:$0xff]  ;;  %v1319_v40 = vld [vmem:[%s1733_s1 + $0x100] sm:$0xff] }
  0x2e   : > { %v1032_v41 = vld [vmem:[%s1515_s4 + $0x28] sm:$0xf]  ;;  %v1269_v42 = vld [vmem:[%s1515_s4 + $0x38] sm:$0xf0]  ;;  %v1072_v43 = vld [vmem:[%s1515_s4 + $0x78] sm:$0xf] }
  0x2f   : > { %694 = vmatpush.bf16.msra.mxu0 %v1291_v7  ;;  %1358 = vmatpush.bf16.msra.mxu1 %v1291_v7  ;;  %v1279_v44 = vld [vmem:[%s1515_s4 + $0x88] sm:$0xf0]  ;;  %v1298_v45 = vld [vmem:[%s1733_s1 + $0x58] sm:$0xff]  ;;  %v1033_v47 = vor.u32 %v1269_v42, %v1032_v41  ;;  %v1268_v49 = vld [vmem:[%s1515_s4 + $0x34] sm:$0xf] }
  0x30   : > { %1359 = vmatpush.bf16.msra.mxu2 %v1291_v7  ;;  %796 = vmatpush.bf16.msra.mxu3 %v1315_v8  ;;  %v1306_v46 = vld [vmem:[%s1733_s1 + $0x98] sm:$0xff]  ;;  %v1073_v48 = vor.u32 %v1279_v44, %v1072_v43  ;;  %v1042_v50 = vld [vmem:[%s1515_s4 + $0x44] sm:$0xf0]  ;;  %v1297_v51 = vld [vmem:[%s1733_s1 + $0x50] sm:$0xff] }
  0x31   : > { %v1305_v52 = vld [vmem:[%s1733_s1 + $0x90] sm:$0xff]  ;;  %v1045_v53 = vor.u32 %v1268_v49, %v1042_v50  ;;  %v1296_v54 = vld [vmem:[%s1733_s1 + $0x48] sm:$0xff]  ;;  %v1295_v56 = vld [vmem:[%s1733_s1 + $0x40] sm:$0xff] }
  0x32   : > { %v1304_v55 = vld [vmem:[%s1733_s1 + $0x88] sm:$0xff]  ;;  %v1303_v57 = vld [vmem:[%s1733_s1 + $0x80] sm:$0xff]  ;;  %v1265_v59 = vld [vmem:[%s1515_s4 + $0x18] sm:$0xf0] }
  0x33   : > { %695 = vmatpush.bf16.msra.mxu0 %v1290_v9  ;;  %1360 = vmatpush.bf16.msra.mxu1 %v1290_v9  ;;  %v1020_v58 = vld [vmem:[%s1515_s4 + $0x8] sm:$0xf]  ;;  %v1262_v60 = vld [vmem:[%s1515_s4 + $0x4] sm:$0xf]  ;;  %v1014_v61 = vld [vmem:[%s1515_s4 + $0x14] sm:$0xf0] }
  0x34   : > { %1361 = vmatpush.bf16.msra.mxu2 %v1290_v9  ;;  %797 = vmatpush.bf16.msra.mxu3 %v1314_v10  ;;  %v1028_v62 = vld [vmem:[%s1515_s4 + $0x10] sm:$0xf]  ;;  %v1266_v63 = vld [vmem:[%s1515_s4 + $0x20] sm:$0xf0]  ;;  %v1021_v0 = vor.u32 %v1265_v59, %v1020_v58  ;;  %v1017_v1 = vor.u32 %v1262_v60, %v1014_v61  ;;  %v1273_v3 = vld [vmem:[%s1515_s4 + $0x5c] sm:$0xf] }
  0x35   : > { %v1029_v2 = vor.u32 %v1266_v63, %v1028_v62  ;;  %v1062_v4 = vld [vmem:[%s1515_s4 + $0x6c] sm:$0xf0]  ;;  %v1270_v7 = vld [vmem:[%s1515_s4 + $0x40] sm:$0xf0]  ;;  %v1267_v8 = vld [vmem:[%s1515_s4 + $0x2c] sm:$0xf] }
  0x36   : > { %v1065_v5 = vor.u32 %v1273_v3, %v1062_v4  ;;  %v1040_v6 = vld [vmem:[%s1515_s4 + $0x30] sm:$0xf]  ;;  %v1034_v9 = vld [vmem:[%s1515_s4 + $0x3c] sm:$0xf0]  ;;  %v1048_v10 = vld [vmem:[%s1515_s4 + $0x38] sm:$0xf] }
  0x37   : > { %696 = vmatpush.bf16.msra.mxu0 %v1289_v11  ;;  %1362 = vmatpush.bf16.msra.mxu1 %v1289_v11  ;;  %v1082_v16 = vld [vmem:[%s1515_s4 + $0x94] sm:$0xf0]  ;;  %v1275_v19 = vld [vmem:[%s1515_s4 + $0x68] sm:$0xf0]  ;;  %v1054_v21 = vld [vmem:[%s1515_s4 + $0x64] sm:$0xf0] }
  0x38   : > { %1363 = vmatpush.bf16.msra.mxu2 %v1289_v11  ;;  %798 = vmatpush.bf16.msra.mxu3 %v1313_v12  ;;  %v1271_v11 = vld [vmem:[%s1515_s4 + $0x48] sm:$0xf0]  ;;  %v1041_v12 = vor.u32 %v1270_v7, %v1040_v6  ;;  %v1060_v18 = vld [vmem:[%s1515_s4 + $0x58] sm:$0xf]  ;;  %v1068_v22 = vld [vmem:[%s1515_s4 + $0x60] sm:$0xf] }
  0x39   : > { %v1080_v30 = vld [vmem:[%s1515_s4 + $0x80] sm:$0xf]  ;;  %v1282_v41 = vld [vmem:[%s1515_s4 + $0xa4] sm:$0xf]  ;;  %v1094_v42 = vld [vmem:[%s1515_s4 + $0xb4] sm:$0xf0] }
  0x3a   : > { %v1108_v43 = vld [vmem:[%s1515_s4 + $0xb0] sm:$0xf]  ;;  %v1286_v44 = vld [vmem:[%s1515_s4 + $0xc0] sm:$0xf0]  ;;  %v1684_v50 = vld [vmem:[%s1734_s2] ss:$0 sm:$0xff] }
  0x3b   : > { %697 = vmatpush.bf16.msra.mxu0 %v1288_v13  ;;  %1364 = vmatpush.bf16.msra.mxu1 %v1288_v13 }
  0x3c   : > { %1365 = vmatpush.bf16.msra.mxu2 %v1288_v13  ;;  %799 = vmatpush.bf16.msra.mxu3 %v1312_v14  ;;  %v1037_v13 = vor.u32 %v1267_v8, %v1034_v9  ;;  %v1049_v14 = vor.u32 %v1271_v11, %v1048_v10  ;;  %v320_v8 = vld [vmem:[#allocation2 + $0x30] sm:$0xff] }
  0x3f   : > { %698 = vmatpush.bf16.msra.mxu0 %v1287_v15  ;;  %1366 = vmatpush.bf16.msra.mxu1 %v1287_v15 }
  0x40   : > { %1367 = vmatpush.bf16.msra.mxu2 %v1287_v15  ;;  %800 = vmatpush.bf16.msra.mxu3 %v1311_v28  ;;  %v1278_v15 = vld [vmem:[%s1515_s4 + $0x84] sm:$0xf]  ;;  %v1102_v28 = vld [vmem:[%s1515_s4 + $0xbc] sm:$0xf0] }
  0x41   : > { %v1085_v17 = vor.u32 %v1278_v15, %v1082_v16 }
  0x42   : > { %699 = vmatmul.bf16.vlgmr.msra.gmra.mxu0 %v1013_v25  ;;  %709 = vmatmul.bf16.vlgmr.msra.gmra.mxu1 %v1053_v26 }
  0x43   : > { %725 = vmatpush.bf16.msrb.mxu1 %v1302_v20  ;;  %831 = vmatpush.bf16.msrb.mxu0 %v1322_v24  ;;  %v1272_v20 = vld [vmem:[%s1515_s4 + $0x54] sm:$0xf]  ;;  %v1061_v24 = vor.u32 %v1275_v19, %v1060_v18  ;;  %v321_v18 = vld [vmem:[#allocation2] sm:$0xff] }
  0x44   : > { %759 = vmatpush.bf16.msrb.mxu2 %v1310_v23  ;;  %801 = vmatmul.bf16.vlgmr.msra.gmra.mxu3 %v1025_v34  ;;  %v1276_v23 = vld [vmem:[%s1515_s4 + $0x70] sm:$0xf0]  ;;  %v1057_v25 = vor.u32 %v1272_v20, %v1054_v21  ;;  %v1088_v34 = vld [vmem:[%s1515_s4 + $0x88] sm:$0xf] }
  0x45   : > { %719 = vmatmul.bf16.vlgmr.msra.gmra.mxu2 %v1093_v27  ;;  %v1069_v26 = vor.u32 %v1276_v23, %v1068_v22  ;;  %v1283_v27 = vld [vmem:[%s1515_s4 + $0xac] sm:$0xf] }
  0x46   : > { %v1105_v29 = vor.u32 %v1283_v27, %v1102_v28 }
  0x47   : > { %726 = vmatpush.bf16.msrb.mxu1 %v1301_v31  ;;  %832 = vmatpush.bf16.msrb.mxu0 %v1321_v33  ;;  %v1280_v31 = vld [vmem:[%s1515_s4 + $0x90] sm:$0xf0]  ;;  %v1074_v33 = vld [vmem:[%s1515_s4 + $0x8c] sm:$0xf0] }
  0x48   : > { %760 = vmatpush.bf16.msrb.mxu2 %v1309_v32  ;;  %v1277_v32 = vld [vmem:[%s1515_s4 + $0x7c] sm:$0xf] }
  0x4b   : > { %727 = vmatpush.bf16.msrb.mxu1 %v1300_v35  ;;  %833 = vmatpush.bf16.msrb.mxu0 %v1320_v37  ;;  %v1281_v35 = vld [vmem:[%s1515_s4 + $0x98] sm:$0xf0]  ;;  %v1077_v37 = vor.u32 %v1277_v32, %v1074_v33 }
  0x4c   : > { %761 = vmatpush.bf16.msrb.mxu2 %v1308_v36  ;;  %v1081_v36 = vor.u32 %v1280_v31, %v1080_v30 }
  0x4f   : > { %728 = vmatpush.bf16.msrb.mxu1 %v1299_v38  ;;  %834 = vmatpush.bf16.msrb.mxu0 %v1319_v40  ;;  %v1089_v38 = vor.u32 %v1281_v35, %v1088_v34  ;;  %v1285_v40 = vld [vmem:[%s1515_s4 + $0xb8] sm:$0xf0] }
  0x50   : > { %762 = vmatpush.bf16.msrb.mxu2 %v1307_v39  ;;  %v1100_v39 = vld [vmem:[%s1515_s4 + $0xa8] sm:$0xf] }
  0x52   : > { %704 = vmatmul.bf16.gmra.mxu0 %v1033_v47  ;;  %714 = vmatmul.bf16.gmra.mxu1 %v1073_v48  ;;  %v1109_v47 = vor.u32 %v1286_v44, %v1108_v43 }
  0x53   : > { %729 = vmatpush.bf16.msrb.mxu1 %v1298_v45  ;;  %v1101_v45 = vor.u32 %v1285_v40, %v1100_v39  ;;  %v323_v40 = vld [vmem:[#allocation2 + $0x10] sm:$0xff] }
  0x54   : > { %763 = vmatpush.bf16.msrb.mxu2 %v1306_v46  ;;  %806 = vmatmul.bf16.gmra.mxu3 %v1045_v53  ;;  %v1097_v46 = vor.u32 %v1282_v41, %v1094_v42 }
  0x57   : > { %730 = vmatpush.bf16.msrb.mxu1 %v1297_v51 }
  0x58   : > { %764 = vmatpush.bf16.msrb.mxu2 %v1305_v52 }
  0x5b   : > { %731 = vmatpush.bf16.msrb.mxu1 %v1296_v54 }
  0x5c   : > { %765 = vmatpush.bf16.msrb.mxu2 %v1304_v55 }
  0x5f   : > { %732 = vmatpush.bf16.msrb.mxu1 %v1295_v56 }
  0x60   : > { %766 = vmatpush.bf16.msrb.mxu2 %v1303_v57 }
  0x62   : > { %733 = vmatmul.bf16.vlgmr.msrb.gmra.mxu1 %v1017_v1  ;;  %1254 = vmatmul.msk.bf16.vlgmr.msrb.gmra.mxu0 %vm675_vm0, %v1029_v2 }
  0x63   : > { %767 = vmatmul.bf16.vlgmr.msrb.gmra.mxu2 %v1021_v0 }
  0x64   : > { %811 = vmatmul.bf16.gmra.mxu3 %v1065_v5 }
  0x72   : > { %738 = vmatmul.bf16.gmra.mxu1 %v1037_v13  ;;  %1255 = vmatmul.msk.bf16.gmra.mxu0 %vm675_vm0, %v1049_v14 }
  0x73   : > { %772 = vmatmul.bf16.gmra.mxu2 %v1041_v12 }
  0x74   : > { %816 = vmatmul.bf16.gmra.mxu3 %v1085_v17 }
  0x82   : > { %743 = vmatmul.bf16.gmra.mxu1 %v1057_v25  ;;  %1256 = vmatmul.msk.bf16.gmra.mxu0 %vm675_vm0, %v1069_v26 }
  0x83   : > { %777 = vmatmul.bf16.gmra.mxu2 %v1061_v24 }
  0x84   : > { %821 = vmatmul.bf16.gmra.mxu3 %v1105_v29  ;;  %v322_v29 = vld [vmem:[#allocation2 + $0x18] sm:$0xff] }
  0x92   : > { %748 = vmatmul.bf16.gmra.mxu1 %v1077_v37  ;;  %1257 = vmatmul.msk.bf16.gmra.mxu0 %vm675_vm0, %v1089_v38 }
  0x93   : > { %782 = vmatmul.bf16.gmra.mxu2 %v1081_v36 }
  0xa2   : > { %753 = vmatmul.bf16.gmra.mxu1 %v1097_v46  ;;  %1258 = vmatmul.msk.bf16.gmra.mxu0 %vm675_vm0, %v1109_v47 }
  0xa3   : > { %787 = vmatmul.bf16.gmra.mxu2 %v1101_v45 }
  0xbf   : > { %v700_v48 = vpop.f32.mrf.mxu0  ;;  %v710_v49 = vpop.f32.mrf.mxu1 }
  0xc0   : > { %v701_v63 = vadd.f32 %v1684_v50, %v700_v48  ;;  %v711_v38 = vadd.f32 %v1684_v50, %v710_v49 }
  0xc7   : > { %v702_v52 = vpop.f32.mrf.mxu0  ;;  %v1686_v53 = vpop.f32.mrf.mxu1 }
  0xc8   : > { %v720_v51 = vpop.f32.mrf.mxu2  ;;  %v802_v59 = vpop.f32.mrf.mxu3  ;;  %v703_v5 = vadd.f32 %v1684_v50, %v702_v52 }
  0xc9   : > { %v1689_v54 = vadd.f32 %v1684_v50, %v720_v51  ;;  %v713_v51 = vadd.f32 %v1684_v50, %v1686_v53 }
  0xcf   : > { %v705_v56 = vpop.f32.mrf.mxu0  ;;  %v1691_v57 = vpop.f32.mrf.mxu1 }
  0xd0   : > { %v722_v55 = vpop.f32.mrf.mxu2  ;;  %v804_v62 = vpop.f32.mrf.mxu3  ;;  %v706_v16 = vadd.f32 %v1684_v50, %v705_v56 }
  0xd1   : > { %v1694_v58 = vadd.f32 %v1684_v50, %v722_v55  ;;  %v324_v55 = vld [vmem:[#allocation2 + $0x48] sm:$0xff] }
  0xd7   : > { %v707_v60 = vpop.f32.mrf.mxu0  ;;  %v1696_v61 = vpop.f32.mrf.mxu1 }
  0xd8   : > { %v807_v7 = vpop.f32.mrf.mxu3  ;;  %v708_v27 = vadd.f32 %v1684_v50, %v707_v60 }
  0xdf   : > { %v734_v0 = vpop.f32.mrf.mxu1  ;;  %v836_v1 = vpop.f32.mrf.mxu0 }
  0xe0   : > { %v735_v2 = vadd.f32 %v734_v0, %v701_v63  ;;  %v809_v23 = vpop.f32.mrf.mxu3 }
  0xe6   : > { %v768_v3 = vpop.f32.mrf.mxu2 }
  0xe7   : > { %v769_v4 = vadd.f32 %v768_v3, %v735_v2  ;;  %v736_v9 = vpop.f32.mrf.mxu1  ;;  %v838_v10 = vpop.f32.mrf.mxu0  ;;  %v325_v3 = vld [vmem:[#allocation2 + $0x28] sm:$0xff] }
  0xe8   : > { %v737_v12 = vadd.f32 %v736_v9, %v703_v5  ;;  %v812_v36 = vpop.f32.mrf.mxu3 }
  0xe9   : > { %v803_v6 = vadd.f32 %v802_v59, %v769_v4 }
  0xeb   : > { %v837_v11 = vadd.f32 %v836_v1, %v803_v6  ;;  %v716_v1 = vadd.f32 %v1684_v50, %v1691_v57 }
  0xed   : > { %v861_v13 = vmax.f32 %v320_v8, %v837_v11  ;;  %v718_v11 = vadd.f32 %v1684_v50, %v1696_v61 }
  0xee   : > { %v770_v14 = vpop.f32.mrf.mxu2 }
  0xef   : > { %871 = vst [vmem:[#allocation2 + $0x30] sm:$0xff] %v861_v13  ;;  %v771_v15 = vadd.f32 %v770_v14, %v737_v12  ;;  %v739_v19 = vpop.f32.mrf.mxu1  ;;  %v841_v20 = vpop.f32.mrf.mxu0  ;;  %v326_v13 = vld [vmem:[#allocation2 + $0x8] sm:$0xff] }
  0xf0   : > { %v740_v22 = vadd.f32 %v739_v19, %v706_v16  ;;  %v814_v48 = vpop.f32.mrf.mxu3 }
  0xf1   : > { %v805_v17 = vadd.f32 %v804_v62, %v771_v15 }
  0xf3   : > { %v839_v21 = vadd.f32 %v838_v10, %v805_v17 }
  0xf5   : > { %v862_v24 = vmax.f32 %v321_v18, %v839_v21 }
  0xf6   : > { %v773_v25 = vpop.f32.mrf.mxu2 }
  0xf7   : > { %872 = vst [vmem:[#allocation2] sm:$0xff] %v862_v24  ;;  %v774_v26 = vadd.f32 %v773_v25, %v740_v22  ;;  %v741_v30 = vpop.f32.mrf.mxu1  ;;  %v843_v31 = vpop.f32.mrf.mxu0  ;;  %v327_v22 = vld [vmem:[#allocation2 + $0x20] sm:$0xff] }
  0xf8   : > { %v742_v33 = vadd.f32 %v741_v30, %v708_v27  ;;  %v817_v4 = vpop.f32.mrf.mxu3  ;;  %v328_v30 = vld [vmem:[#allocation2 + $0x40] sm:$0xff] }
  0xf9   : > { %v808_v28 = vadd.f32 %v807_v7, %v774_v26 }
  0xfb   : > { %v842_v32 = vadd.f32 %v841_v20, %v808_v28 }
  0xfd   : > { %v863_v34 = vmax.f32 %v322_v29, %v842_v32 }
  0xfe   : > { %v775_v35 = vpop.f32.mrf.mxu2 }
  0xff   : > { %873 = vst [vmem:[#allocation2 + $0x18] sm:$0xff] %v863_v34  ;;  %v776_v37 = vadd.f32 %v775_v35, %v742_v33  ;;  %v744_v41 = vpop.f32.mrf.mxu1  ;;  %v846_v42 = vpop.f32.mrf.mxu0 }
 0x100   : > { %v745_v44 = vadd.f32 %v744_v41, %v711_v38  ;;  %v819_v57 = vpop.f32.mrf.mxu3 }
 0x101   : > { %v810_v39 = vadd.f32 %v809_v23, %v776_v37 }
 0x103   : > { %v844_v43 = vadd.f32 %v843_v31, %v810_v39 }
 0x105   : > { %v864_v45 = vmax.f32 %v323_v40, %v844_v43 }
 0x106   : > { %v778_v46 = vpop.f32.mrf.mxu2 }
 0x107   : > { %874 = vst [vmem:[#allocation2 + $0x10] sm:$0xff] %v864_v45  ;;  %v779_v47 = vadd.f32 %v778_v46, %v745_v44  ;;  %v746_v56 = vpop.f32.mrf.mxu1  ;;  %v848_v59 = vpop.f32.mrf.mxu0 }
 0x108   : > { %v747_v49 = vadd.f32 %v746_v56, %v713_v51  ;;  %v822_v27 = vpop.f32.mrf.mxu3 }
 0x109   : > { %v813_v52 = vadd.f32 %v812_v36, %v779_v47 }
 0x10b   : > { %v847_v60 = vadd.f32 %v846_v42, %v813_v52 }
 0x10d   : > { %v865_v62 = vmax.f32 %v324_v55, %v847_v60 }
 0x10e   : > { %v780_v63 = vpop.f32.mrf.mxu2 }
 0x10f   : > { %875 = vst [vmem:[#allocation2 + $0x48] sm:$0xff] %v865_v62  ;;  %v781_v0 = vadd.f32 %v780_v63, %v747_v49  ;;  %v749_v5 = vpop.f32.mrf.mxu1  ;;  %v851_v53 = vpop.f32.mrf.mxu0 }
 0x110   : > { %v750_v7 = vadd.f32 %v749_v5, %v716_v1  ;;  %v824_v37 = vpop.f32.mrf.mxu3 }
 0x111   : > { %v815_v2 = vadd.f32 %v814_v48, %v781_v0 }
 0x113   : > { %v849_v6 = vadd.f32 %v848_v59, %v815_v2 }
 0x115   : > { %v866_v8 = vmax.f32 %v325_v3, %v849_v6 }
 0x116   : > { %v783_v9 = vpop.f32.mrf.mxu2 }
 0x117   : > { %876 = vst [vmem:[#allocation2 + $0x28] sm:$0xff] %v866_v8  ;;  %v784_v10 = vadd.f32 %v783_v9, %v750_v7  ;;  %v751_v14 = vpop.f32.mrf.mxu1  ;;  %v853_v18 = vpop.f32.mrf.mxu0 }
 0x118   : > { %v752_v16 = vadd.f32 %v751_v14, %v718_v11 }
 0x119   : > { %v818_v12 = vadd.f32 %v817_v4, %v784_v10 }
 0x11b   : > { %v852_v15 = vadd.f32 %v851_v53, %v818_v12 }
 0x11d   : > { %v867_v17 = vmax.f32 %v326_v13, %v852_v15 }
 0x11e   : > { %v785_v19 = vpop.f32.mrf.mxu2 }
 0x11f   : > { %877 = vst [vmem:[#allocation2 + $0x8] sm:$0xff] %v867_v17  ;;  %v786_v20 = vadd.f32 %v785_v19, %v752_v16  ;;  %v754_v23 = vpop.f32.mrf.mxu1  ;;  %v856_v28 = vpop.f32.mrf.mxu0 }
 0x120   : > { %v755_v25 = vadd.f32 %v754_v23, %v1689_v54  ;;  %v329_v54 = vld [vmem:[#allocation2 + $0x38] sm:$0xff] }
 0x121   : > { %v820_v21 = vadd.f32 %v819_v57, %v786_v20 }
 0x123   : > { %v854_v24 = vadd.f32 %v853_v18, %v820_v21 }
 0x125   : > { %v868_v26 = vmax.f32 %v327_v22, %v854_v24 }
 0x126   : > { %v788_v50 = vpop.f32.mrf.mxu2 }
 0x127   : > { %878 = vst [vmem:[#allocation2 + $0x20] sm:$0xff] %v868_v26  ;;  %v789_v61 = vadd.f32 %v788_v50, %v755_v25  ;;  %v756_v31 = vpop.f32.mrf.mxu1  ;;  %v858_v39 = vpop.f32.mrf.mxu0 }
 0x128   : > { %v757_v33 = vadd.f32 %v756_v31, %v1694_v58 }
 0x129   : > { %v823_v29 = vadd.f32 %v822_v27, %v789_v61 }
 0x12b   : > { %v857_v32 = vadd.f32 %v856_v28, %v823_v29 }
 0x12d   : > { %v869_v34 = vmax.f32 %v328_v30, %v857_v32 }
 0x12e   : > { %v790_v35 = vpop.f32.mrf.mxu2 }
 0x12f   : > { %879 = vst [vmem:[#allocation2 + $0x40] sm:$0xff] %v869_v34  ;;  %v791_v36 = vadd.f32 %v790_v35, %v757_v33 }
 0x131   : > { %v825_v38 = vadd.f32 %v824_v37, %v791_v36 }
 0x133   : > { %v859_v40 = vadd.f32 %v858_v39, %v825_v38  ;;  %884 = sbr.rel (%p1259_p8) target bundleno = 324 (0x144), region = 40 }
 0x135   : > { %v870_v41 = vmax.f32 %v329_v54, %v859_v40 }
 0x137   : > { %880 = vst [vmem:[#allocation2 + $0x38] sm:$0xff] %v870_v41 }
 0x138   : > { %v885_v42 = vld [vmem:[#allocation2 + $0x30] sm:$0xff]  ;;  %v886_v43 = vld [vmem:[#allocation2] sm:$0xff]  ;;  %v887_v44 = vld [vmem:[#allocation2 + $0x18] sm:$0xff] }
 0x139   : > { %v895_v45 = vmax.f32 %v885_v42, 0.0  ;;  %v896_v46 = vmax.f32 %v886_v43, 0.0  ;;  %v888_v58 = vld [vmem:[#allocation2 + $0x10] sm:$0xff]  ;;  %v897_v47 = vmax.f32 %v887_v44, 0.0  ;;  %v889_v48 = vld [vmem:[#allocation2 + $0x48] sm:$0xff]  ;;  %v892_v60 = vld [vmem:[#allocation2 + $0x20] sm:$0xff] }
 0x13a   : > { %v890_v51 = vld [vmem:[#allocation2 + $0x28] sm:$0xff]  ;;  %v898_v52 = vmax.f32 %v888_v58, 0.0  ;;  %v899_v55 = vmax.f32 %v889_v48, 0.0  ;;  %v893_v49 = vld [vmem:[#allocation2 + $0x40] sm:$0xff]  ;;  %v902_v0 = vmax.f32 %v892_v60, 0.0 }
 0x13b   : > { %v900_v56 = vmax.f32 %v890_v51, 0.0  ;;  %v891_v59 = vld [vmem:[#allocation2 + $0x8] sm:$0xff]  ;;  %v1326_v62 = vpack.c.bf16 %v896_v46, %v895_v45  ;;  %v903_v2 = vmax.f32 %v893_v49, 0.0 }
 0x13c   : > { %v901_v63 = vmax.f32 %v891_v59, 0.0  ;;  %v1331_v3 = vpack.c.bf16 %v898_v52, %v897_v47 }
 0x13d   : > { %v1336_v4 = vpack.c.bf16 %v900_v56, %v899_v55  ;;  %1327 = vst [vmem:[%s1510_s26] sm:$0xff] %v1326_v62  }
 0x13e   : > { %v894_v1 = vld [vmem:[#allocation2 + $0x38] sm:$0xff]  ;;  %v1341_v6 = vpack.c.bf16 %v902_v0, %v901_v63  ;;  %1348 = vst [vmem:[%s1510_s26 + $0x8] sm:$0xff] %v1331_v3  }
 0x13f   : > { %v904_v5 = vmax.f32 %v894_v1, 0.0  ;;  %1349 = vst [vmem:[%s1510_s26 + $0x10] sm:$0xff] %v1336_v4  }
 0x140   : > { %1350 = vst [vmem:[%s1510_s26 + $0x18] sm:$0xff] %v1341_v6  }
 0x141   : > { %v1346_v7 = vpack.c.bf16 %v904_v5, %v903_v2 }
 0x143   : > { %1351 = vst [vmem:[%s1510_s26 + $0x20] sm:$0xff] %v1346_v7  }
 0x144 PF: > { %s13_s16 = sadd.s32 1, %s1450_s16   ;;  %s1736_s12 = smov %s1442_s14 }
 0x145   : > { %p10_p9 = scmp.ge.s32.totalorder %s13_s16, 10   ;;  %s1737_s13 = smov %s1446_s15 }
 0x146   : > { %s1738_s14 = smov %s1741_s17  ;;  %s1739_s15 = smov %s1745_s18 }
 0x147   :  { %12 = sbr.rel (!%p10_p9) target bundleno = 3 (0x3), region = 70 }

// kernel: net_forward.5
= control target key start
LH: loop header
LB: loop body
LE: loop exit
PB: predicated region body
PF: predicated region fallthrough
CT: control target
= control target key end

     0   :  { %vm6117_vm0 = vcmask 80896   ;;  %s11779_s1 = inlined_call_operand.vmem [shape: bf16[9216,128], index: 1, kind: input, shape index: {}]   ;;  %s11780_s0 = inlined_call_operand.vmem [shape: bf16[16,9216], index: 0, kind: input, shape index: {}]   ;;  %s11781_s2 = inlined_call_operand.vmem [shape: f32[1,128], index: 2, kind: input, shape index: {}]   ;;  %s11782_s4 = inlined_call_operand.vmem [shape: f32[1,10], index: 4, kind: input, shape index: {}]   ;;  %s11783_s3 = inlined_call_operand.vmem [shape: f32[128,10], index: 3, kind: input, shape index: {}]   ;;  %s11784_s5 = inlined_call_operand.vmem [shape: f32[16,10], index: 5, kind: output, shape index: {}]  }
   0x1   :  { %v8819_v0 = vld [vmem:[%s11779_s1 + $0x38] sm:$0xff]  ;;  %v8818_v4 = vld [vmem:[%s11779_s1 + $0x30] sm:$0xff]  ;;  %v8817_v8 = vld [vmem:[%s11779_s1 + $0x28] sm:$0xff] }
   0x2   :  { %v8827_v1 = vld [vmem:[%s11779_s1 + $0x78] sm:$0xff]  ;;  %5064 = vmatpush.bf16.msra.mxu0 %v8819_v0  ;;  %v8826_v5 = vld [vmem:[%s11779_s1 + $0x70] sm:$0xff]  ;;  %v8825_v9 = vld [vmem:[%s11779_s1 + $0x68] sm:$0xff] }
   0x3   :  { %v8835_v2 = vld [vmem:[%s11779_s1 + $0xb8] sm:$0xff]  ;;  %5078 = vmatpush.bf16.msra.mxu1 %v8827_v1  ;;  %v8834_v6 = vld [vmem:[%s11779_s1 + $0xb0] sm:$0xff]  ;;  %v8833_v10 = vld [vmem:[%s11779_s1 + $0xa8] sm:$0xff] }
   0x4   :  { %v8843_v3 = vld [vmem:[%s11779_s1 + $0xf8] sm:$0xff]  ;;  %5092 = vmatpush.bf16.msra.mxu2 %v8835_v2  ;;  %v8842_v7 = vld [vmem:[%s11779_s1 + $0xf0] sm:$0xff]  ;;  %v8841_v11 = vld [vmem:[%s11779_s1 + $0xe8] sm:$0xff] }
   0x5   :  { %5106 = vmatpush.bf16.msra.mxu3 %v8843_v3  ;;  %v8816_v12 = vld [vmem:[%s11779_s1 + $0x20] sm:$0xff]  ;;  %v8815_v16 = vld [vmem:[%s11779_s1 + $0x18] sm:$0xff]  ;;  %v8814_v20 = vld [vmem:[%s11779_s1 + $0x10] sm:$0xff] }
   0x6   :  { %5065 = vmatpush.bf16.msra.mxu0 %v8818_v4  ;;  %v8824_v13 = vld [vmem:[%s11779_s1 + $0x60] sm:$0xff]  ;;  %v8823_v17 = vld [vmem:[%s11779_s1 + $0x58] sm:$0xff]  ;;  %v8822_v21 = vld [vmem:[%s11779_s1 + $0x50] sm:$0xff] }
   0x7   :  { %5079 = vmatpush.bf16.msra.mxu1 %v8826_v5  ;;  %v8832_v14 = vld [vmem:[%s11779_s1 + $0xa0] sm:$0xff]  ;;  %v8831_v18 = vld [vmem:[%s11779_s1 + $0x98] sm:$0xff]  ;;  %v8830_v22 = vld [vmem:[%s11779_s1 + $0x90] sm:$0xff] }
   0x8   :  { %5093 = vmatpush.bf16.msra.mxu2 %v8834_v6  ;;  %v8840_v15 = vld [vmem:[%s11779_s1 + $0xe0] sm:$0xff]  ;;  %v8839_v19 = vld [vmem:[%s11779_s1 + $0xd8] sm:$0xff]  ;;  %v8838_v23 = vld [vmem:[%s11779_s1 + $0xd0] sm:$0xff] }
   0x9   :  { %5107 = vmatpush.bf16.msra.mxu3 %v8842_v7  ;;  %v8813_v24 = vld [vmem:[%s11779_s1 + $0x8] sm:$0xff]  ;;  %v8812_v28 = vld [vmem:[%s11779_s1] sm:$0xff]  ;;  %v8851_v32 = vld [vmem:[%s11779_s1 + $0x138] sm:$0xff] }
   0xa   :  { %5066 = vmatpush.bf16.msra.mxu0 %v8817_v8  ;;  %v8821_v25 = vld [vmem:[%s11779_s1 + $0x48] sm:$0xff]  ;;  %v8820_v29 = vld [vmem:[%s11779_s1 + $0x40] sm:$0xff]  ;;  %v8859_v33 = vld [vmem:[%s11779_s1 + $0x178] sm:$0xff] }
   0xb   :  { %5080 = vmatpush.bf16.msra.mxu1 %v8825_v9  ;;  %v8829_v26 = vld [vmem:[%s11779_s1 + $0x88] sm:$0xff]  ;;  %v8828_v30 = vld [vmem:[%s11779_s1 + $0x80] sm:$0xff]  ;;  %v8867_v42 = vld [vmem:[%s11779_s1 + $0x1b8] sm:$0xff] }
   0xc   :  { %5094 = vmatpush.bf16.msra.mxu2 %v8833_v10  ;;  %v8837_v27 = vld [vmem:[%s11779_s1 + $0xc8] sm:$0xff]  ;;  %v8836_v31 = vld [vmem:[%s11779_s1 + $0xc0] sm:$0xff]  ;;  %v8875_v43 = vld [vmem:[%s11779_s1 + $0x1f8] sm:$0xff] }
   0xd   :  { %5108 = vmatpush.bf16.msra.mxu3 %v8841_v11  ;;  %v6150_v34 = vld [vmem:[%s11780_s0] sm:$0xf]  ;;  %v6158_v36 = vld [vmem:[%s11780_s0 + $0x8] sm:$0xf]  ;;  %v8740_v38 = vld [vmem:[%s11780_s0 + $0x4] sm:$0xf] }
   0xe   :  { %5067 = vmatpush.bf16.msra.mxu0 %v8816_v12  ;;  %v8776_v35 = vld [vmem:[%s11780_s0 + $0x11c] sm:$0xf0]  ;;  %v8777_v37 = vld [vmem:[%s11780_s0 + $0x124] sm:$0xf0]  ;;  %v6152_v39 = vld [vmem:[%s11780_s0 + $0x120] sm:$0xf0] }
   0xf   :  { %5081 = vmatpush.bf16.msra.mxu1 %v8824_v13  ;;  %v8741_v40 = vld [vmem:[%s11780_s0 + $0xc] sm:$0xf]  ;;  %v6151_v44 = vor.u32 %v8776_v35, %v6150_v34  ;;  %v6159_v45 = vor.u32 %v8777_v37, %v6158_v36  ;;  %v6155_v46 = vor.u32 %v8740_v38, %v6152_v39  ;;  %v8850_v48 = vld [vmem:[%s11779_s1 + $0x130] sm:$0xff]  ;;  %v8848_v56 = vld [vmem:[%s11779_s1 + $0x120] sm:$0xff] }
  0x10   :  { %5095 = vmatpush.bf16.msra.mxu2 %v8832_v14  ;;  %v6160_v41 = vld [vmem:[%s11780_s0 + $0x128] sm:$0xf0]  ;;  %v8858_v49 = vld [vmem:[%s11779_s1 + $0x170] sm:$0xff]  ;;  %v8856_v57 = vld [vmem:[%s11779_s1 + $0x160] sm:$0xff] }
  0x11   :  { %5109 = vmatpush.bf16.msra.mxu3 %v8840_v15  ;;  %v6163_v47 = vor.u32 %v8741_v40, %v6160_v41  ;;  %v8866_v50 = vld [vmem:[%s11779_s1 + $0x1b0] sm:$0xff]  ;;  %v8849_v52 = vld [vmem:[%s11779_s1 + $0x128] sm:$0xff]  ;;  %v8864_v58 = vld [vmem:[%s11779_s1 + $0x1a0] sm:$0xff] }
  0x12   :  { %5068 = vmatpush.bf16.msra.mxu0 %v8815_v16  ;;  %v8874_v51 = vld [vmem:[%s11779_s1 + $0x1f0] sm:$0xff]  ;;  %v8857_v53 = vld [vmem:[%s11779_s1 + $0x168] sm:$0xff]  ;;  %v8872_v59 = vld [vmem:[%s11779_s1 + $0x1e0] sm:$0xff] }
  0x13   :  { %5082 = vmatpush.bf16.msra.mxu1 %v8823_v17  ;;  %v8865_v54 = vld [vmem:[%s11779_s1 + $0x1a8] sm:$0xff]  ;;  %v8847_v60 = vld [vmem:[%s11779_s1 + $0x118] sm:$0xff]  ;;  %v8846_v0 = vld [vmem:[%s11779_s1 + $0x110] sm:$0xff] }
  0x14   :  { %5096 = vmatpush.bf16.msra.mxu2 %v8831_v18  ;;  %v8873_v55 = vld [vmem:[%s11779_s1 + $0x1e8] sm:$0xff]  ;;  %v8855_v61 = vld [vmem:[%s11779_s1 + $0x158] sm:$0xff]  ;;  %v8854_v1 = vld [vmem:[%s11779_s1 + $0x150] sm:$0xff] }
  0x15   :  { %5110 = vmatpush.bf16.msra.mxu3 %v8839_v19  ;;  %v8863_v62 = vld [vmem:[%s11779_s1 + $0x198] sm:$0xff]  ;;  %v8862_v2 = vld [vmem:[%s11779_s1 + $0x190] sm:$0xff]  ;;  %v8845_v4 = vld [vmem:[%s11779_s1 + $0x108] sm:$0xff] }
  0x16   :  { %5069 = vmatpush.bf16.msra.mxu0 %v8814_v20  ;;  %v8871_v63 = vld [vmem:[%s11779_s1 + $0x1d8] sm:$0xff]  ;;  %v8870_v3 = vld [vmem:[%s11779_s1 + $0x1d0] sm:$0xff]  ;;  %v8853_v5 = vld [vmem:[%s11779_s1 + $0x148] sm:$0xff] }
  0x17   :  { %5083 = vmatpush.bf16.msra.mxu1 %v8822_v21  ;;  %v8861_v6 = vld [vmem:[%s11779_s1 + $0x188] sm:$0xff]  ;;  %v8844_v8 = vld [vmem:[%s11779_s1 + $0x100] sm:$0xff]  ;;  %v8883_v12 = vld [vmem:[%s11779_s1 + $0x238] sm:$0xff] }
  0x18   :  { %5097 = vmatpush.bf16.msra.mxu2 %v8830_v22  ;;  %v8869_v7 = vld [vmem:[%s11779_s1 + $0x1c8] sm:$0xff]  ;;  %v8852_v9 = vld [vmem:[%s11779_s1 + $0x140] sm:$0xff]  ;;  %v8891_v13 = vld [vmem:[%s11779_s1 + $0x278] sm:$0xff] }
  0x19   :  { %5111 = vmatpush.bf16.msra.mxu3 %v8838_v23  ;;  %v8860_v10 = vld [vmem:[%s11779_s1 + $0x180] sm:$0xff]  ;;  %v6166_v14 = vld [vmem:[%s11780_s0 + $0x10] sm:$0xf]  ;;  %v6174_v16 = vld [vmem:[%s11780_s0 + $0x18] sm:$0xf] }
  0x1a   :  { %5070 = vmatpush.bf16.msra.mxu0 %v8813_v24  ;;  %v8868_v11 = vld [vmem:[%s11779_s1 + $0x1c0] sm:$0xff]  ;;  %v8778_v15 = vld [vmem:[%s11780_s0 + $0x12c] sm:$0xf0]  ;;  %v8779_v17 = vld [vmem:[%s11780_s0 + $0x134] sm:$0xf0] }
  0x1b   :  { %5084 = vmatpush.bf16.msra.mxu1 %v8821_v25  ;;  %v8742_v18 = vld [vmem:[%s11780_s0 + $0x14] sm:$0xf]  ;;  %v8743_v20 = vld [vmem:[%s11780_s0 + $0x1c] sm:$0xf]  ;;  %v6167_v24 = vor.u32 %v8778_v15, %v6166_v14  ;;  %v6175_v25 = vor.u32 %v8779_v17, %v6174_v16  ;;  %v8897_v34 = vld [vmem:[%s11779_s1 + $0x2a8] sm:$0xff] }
  0x1c   :  { %5098 = vmatpush.bf16.msra.mxu2 %v8829_v26  ;;  %v6168_v19 = vld [vmem:[%s11780_s0 + $0x130] sm:$0xf0]  ;;  %v6176_v21 = vld [vmem:[%s11780_s0 + $0x138] sm:$0xf0]  ;;  %v8905_v35 = vld [vmem:[%s11779_s1 + $0x2e8] sm:$0xff] }
  0x1d   :  { %5112 = vmatpush.bf16.msra.mxu3 %v8837_v27  ;;  %v8899_v22 = vld [vmem:[%s11779_s1 + $0x2b8] sm:$0xff]  ;;  %v6171_v26 = vor.u32 %v8742_v18, %v6168_v19  ;;  %v6179_v27 = vor.u32 %v8743_v20, %v6176_v21  ;;  %v8880_v36 = vld [vmem:[%s11779_s1 + $0x220] sm:$0xff]  ;;  %v8929_v14 = vld [vmem:[%s11779_s1 + $0x3a8] sm:$0xff] }
  0x1e   :  { %5071 = vmatpush.bf16.msra.mxu0 %v8812_v28  ;;  %v8907_v23 = vld [vmem:[%s11779_s1 + $0x2f8] sm:$0xff]  ;;  %v8882_v28 = vld [vmem:[%s11779_s1 + $0x230] sm:$0xff]  ;;  %v8888_v37 = vld [vmem:[%s11779_s1 + $0x260] sm:$0xff] }
  0x1f   :  { %5085 = vmatpush.bf16.msra.mxu1 %v8820_v29  ;;  %v8890_v29 = vld [vmem:[%s11779_s1 + $0x270] sm:$0xff]  ;;  %v8896_v38 = vld [vmem:[%s11779_s1 + $0x2a0] sm:$0xff]  ;;  %v8879_v40 = vld [vmem:[%s11779_s1 + $0x218] sm:$0xff] }
  0x20   :  { %5099 = vmatpush.bf16.msra.mxu2 %v8828_v30  ;;  %v8898_v30 = vld [vmem:[%s11779_s1 + $0x2b0] sm:$0xff]  ;;  %v8904_v39 = vld [vmem:[%s11779_s1 + $0x2e0] sm:$0xff]  ;;  %v8887_v41 = vld [vmem:[%s11779_s1 + $0x258] sm:$0xff] }
  0x21   :  { %5113 = vmatpush.bf16.msra.mxu3 %v8836_v31  ;;  %5072 = vmatmul.bf16.vlgmr.msra.gmra.mxu0 %v6151_v44  ;;  %v8906_v31 = vld [vmem:[%s11779_s1 + $0x2f0] sm:$0xff]  ;;  %v8937_v15 = vld [vmem:[%s11779_s1 + $0x3e8] sm:$0xff]  ;;  %v8912_v16 = vld [vmem:[%s11779_s1 + $0x320] sm:$0xff] }
  0x22   :  { %5120 = vmatpush.bf16.msrb.mxu0 %v8851_v32  ;;  %5086 = vmatmul.bf16.vlgmr.msra.gmra.mxu1 %v6155_v46  ;;  %v8881_v32 = vld [vmem:[%s11779_s1 + $0x228] sm:$0xff]  ;;  %v8878_v44 = vld [vmem:[%s11779_s1 + $0x210] sm:$0xff]  ;;  %v8920_v17 = vld [vmem:[%s11779_s1 + $0x360] sm:$0xff] }
  0x23   :  { %5134 = vmatpush.bf16.msrb.mxu1 %v8859_v33  ;;  %5100 = vmatmul.bf16.vlgmr.msra.gmra.mxu2 %v6159_v45  ;;  %v8889_v33 = vld [vmem:[%s11779_s1 + $0x268] sm:$0xff]  ;;  %v8886_v45 = vld [vmem:[%s11779_s1 + $0x250] sm:$0xff]  ;;  %v8928_v18 = vld [vmem:[%s11779_s1 + $0x3a0] sm:$0xff] }
  0x24   :  { %5148 = vmatpush.bf16.msrb.mxu2 %v8867_v42  ;;  %5114 = vmatmul.bf16.vlgmr.msra.gmra.mxu3 %v6163_v47  ;;  %v8895_v42 = vld [vmem:[%s11779_s1 + $0x298] sm:$0xff]  ;;  %v8894_v46 = vld [vmem:[%s11779_s1 + $0x290] sm:$0xff]  ;;  %v8936_v19 = vld [vmem:[%s11779_s1 + $0x3e0] sm:$0xff] }
  0x25   :  { %5162 = vmatpush.bf16.msrb.mxu3 %v8875_v43  ;;  %v8903_v43 = vld [vmem:[%s11779_s1 + $0x2d8] sm:$0xff]  ;;  %v8902_v47 = vld [vmem:[%s11779_s1 + $0x2d0] sm:$0xff] }
  0x26   :  { %5121 = vmatpush.bf16.msrb.mxu0 %v8850_v48  ;;  %v8877_v48 = vld [vmem:[%s11779_s1 + $0x208] sm:$0xff]  ;;  %v8911_v20 = vld [vmem:[%s11779_s1 + $0x318] sm:$0xff] }
  0x27   :  { %5135 = vmatpush.bf16.msrb.mxu1 %v8858_v49  ;;  %v8885_v49 = vld [vmem:[%s11779_s1 + $0x248] sm:$0xff]  ;;  %v8919_v21 = vld [vmem:[%s11779_s1 + $0x358] sm:$0xff] }
  0x28   :  { %5149 = vmatpush.bf16.msrb.mxu2 %v8866_v50  ;;  %v8893_v50 = vld [vmem:[%s11779_s1 + $0x288] sm:$0xff] }
  0x29   :  { %5163 = vmatpush.bf16.msrb.mxu3 %v8874_v51  ;;  %v8901_v51 = vld [vmem:[%s11779_s1 + $0x2c8] sm:$0xff] }
  0x2a   :  { %5122 = vmatpush.bf16.msrb.mxu0 %v8849_v52  ;;  %v8876_v52 = vld [vmem:[%s11779_s1 + $0x200] sm:$0xff] }
  0x2b   :  { %5136 = vmatpush.bf16.msrb.mxu1 %v8857_v53  ;;  %v8884_v53 = vld [vmem:[%s11779_s1 + $0x240] sm:$0xff] }
  0x2c   :  { %5150 = vmatpush.bf16.msrb.mxu2 %v8865_v54  ;;  %v8892_v54 = vld [vmem:[%s11779_s1 + $0x280] sm:$0xff] }
  0x2d   :  { %5164 = vmatpush.bf16.msrb.mxu3 %v8873_v55  ;;  %v8900_v55 = vld [vmem:[%s11779_s1 + $0x2c0] sm:$0xff] }
  0x2e   :  { %5123 = vmatpush.bf16.msrb.mxu0 %v8848_v56  ;;  %v8915_v56 = vld [vmem:[%s11779_s1 + $0x338] sm:$0xff] }
  0x2f   :  { %5137 = vmatpush.bf16.msrb.mxu1 %v8856_v57  ;;  %v8923_v57 = vld [vmem:[%s11779_s1 + $0x378] sm:$0xff] }
  0x30   :  { %5151 = vmatpush.bf16.msrb.mxu2 %v8864_v58  ;;  %v6182_v58 = vld [vmem:[%s11780_s0 + $0x20] sm:$0xf] }
  0x31   :  { %5165 = vmatpush.bf16.msrb.mxu3 %v8872_v59  ;;  %v8780_v59 = vld [vmem:[%s11780_s0 + $0x13c] sm:$0xf0] }
  0x32   :  { %5124 = vmatpush.bf16.msrb.mxu0 %v8847_v60  ;;  %v6190_v60 = vld [vmem:[%s11780_s0 + $0x28] sm:$0xf] }
  0x33   :  { %5138 = vmatpush.bf16.msrb.mxu1 %v8855_v61  ;;  %v8781_v61 = vld [vmem:[%s11780_s0 + $0x144] sm:$0xf0] }
  0x34   :  { %5152 = vmatpush.bf16.msrb.mxu2 %v8863_v62  ;;  %v8744_v62 = vld [vmem:[%s11780_s0 + $0x24] sm:$0xf] }
  0x35   :  { %5166 = vmatpush.bf16.msrb.mxu3 %v8871_v63  ;;  %v6184_v63 = vld [vmem:[%s11780_s0 + $0x140] sm:$0xf0] }
  0x36   :  { %5125 = vmatpush.bf16.msrb.mxu0 %v8846_v0  ;;  %v8745_v0 = vld [vmem:[%s11780_s0 + $0x2c] sm:$0xf] }
  0x37   :  { %5139 = vmatpush.bf16.msrb.mxu1 %v8854_v1  ;;  %v6192_v1 = vld [vmem:[%s11780_s0 + $0x148] sm:$0xf0] }
  0x38   :  { %5153 = vmatpush.bf16.msrb.mxu2 %v8862_v2  ;;  %v8931_v2 = vld [vmem:[%s11779_s1 + $0x3b8] sm:$0xff] }
  0x39   :  { %5167 = vmatpush.bf16.msrb.mxu3 %v8870_v3  ;;  %v8939_v3 = vld [vmem:[%s11779_s1 + $0x3f8] sm:$0xff] }
  0x3a   :  { %5126 = vmatpush.bf16.msrb.mxu0 %v8845_v4  ;;  %v6183_v4 = vor.u32 %v8780_v59, %v6182_v58  ;;  %v8961_v58 = vld [vmem:[%s11779_s1 + $0x4a8] sm:$0xff] }
  0x3b   :  { %5140 = vmatpush.bf16.msrb.mxu1 %v8853_v5  ;;  %v6191_v5 = vor.u32 %v8781_v61, %v6190_v60  ;;  %v8969_v59 = vld [vmem:[%s11779_s1 + $0x4e8] sm:$0xff]  ;;  %v8944_v60 = vld [vmem:[%s11779_s1 + $0x420] sm:$0xff] }
  0x3c   :  { %5154 = vmatpush.bf16.msrb.mxu2 %v8861_v6  ;;  %v6187_v6 = vor.u32 %v8744_v62, %v6184_v63  ;;  %v8952_v61 = vld [vmem:[%s11779_s1 + $0x460] sm:$0xff] }
  0x3d   :  { %5168 = vmatpush.bf16.msrb.mxu3 %v8869_v7  ;;  %v6195_v7 = vor.u32 %v8745_v0, %v6192_v1  ;;  %v8960_v62 = vld [vmem:[%s11779_s1 + $0x4a0] sm:$0xff]  ;;  %v8943_v0 = vld [vmem:[%s11779_s1 + $0x418] sm:$0xff] }
  0x3e   :  { %5127 = vmatpush.bf16.msrb.mxu0 %v8844_v8  ;;  %v8914_v8 = vld [vmem:[%s11779_s1 + $0x330] sm:$0xff]  ;;  %v8968_v63 = vld [vmem:[%s11779_s1 + $0x4e0] sm:$0xff]  ;;  %v8951_v1 = vld [vmem:[%s11779_s1 + $0x458] sm:$0xff] }
  0x3f   :  { %5141 = vmatpush.bf16.msrb.mxu1 %v8852_v9  ;;  %v8922_v9 = vld [vmem:[%s11779_s1 + $0x370] sm:$0xff] }
  0x40   :  { %5155 = vmatpush.bf16.msrb.mxu2 %v8860_v10  ;;  %v8930_v10 = vld [vmem:[%s11779_s1 + $0x3b0] sm:$0xff] }
  0x41   :  { %5169 = vmatpush.bf16.msrb.mxu3 %v8868_v11  ;;  %5128 = vmatmul.bf16.vlgmr.msrb.gmra.mxu0 %v6167_v24  ;;  %v8938_v11 = vld [vmem:[%s11779_s1 + $0x3f0] sm:$0xff] }
  0x42   :  { %5176 = vmatpush.bf16.msra.mxu0 %v8883_v12  ;;  %5142 = vmatmul.bf16.vlgmr.msrb.gmra.mxu1 %v6171_v26  ;;  %v8913_v12 = vld [vmem:[%s11779_s1 + $0x328] sm:$0xff]  ;;  %v8910_v24 = vld [vmem:[%s11779_s1 + $0x310] sm:$0xff] }
  0x43   :  { %5190 = vmatpush.bf16.msra.mxu1 %v8891_v13  ;;  %5156 = vmatmul.bf16.vlgmr.msrb.gmra.mxu2 %v6175_v25  ;;  %v8921_v13 = vld [vmem:[%s11779_s1 + $0x368] sm:$0xff]  ;;  %v8918_v25 = vld [vmem:[%s11779_s1 + $0x350] sm:$0xff] }
  0x44   :  { %5204 = vmatpush.bf16.msra.mxu2 %v8899_v22  ;;  %5170 = vmatmul.bf16.vlgmr.msrb.gmra.mxu3 %v6179_v27  ;;  %v8927_v22 = vld [vmem:[%s11779_s1 + $0x398] sm:$0xff]  ;;  %v8926_v26 = vld [vmem:[%s11779_s1 + $0x390] sm:$0xff] }
  0x45   :  { %5218 = vmatpush.bf16.msra.mxu3 %v8907_v23  ;;  %v8935_v23 = vld [vmem:[%s11779_s1 + $0x3d8] sm:$0xff]  ;;  %v8934_v27 = vld [vmem:[%s11779_s1 + $0x3d0] sm:$0xff] }
  0x46   :  { %5177 = vmatpush.bf16.msra.mxu0 %v8882_v28  ;;  %v8909_v28 = vld [vmem:[%s11779_s1 + $0x308] sm:$0xff] }
  0x47   :  { %5191 = vmatpush.bf16.msra.mxu1 %v8890_v29  ;;  %v8917_v29 = vld [vmem:[%s11779_s1 + $0x348] sm:$0xff] }
  0x48   :  { %5205 = vmatpush.bf16.msra.mxu2 %v8898_v30  ;;  %v8925_v30 = vld [vmem:[%s11779_s1 + $0x388] sm:$0xff] }
  0x49   :  { %5219 = vmatpush.bf16.msra.mxu3 %v8906_v31  ;;  %v8933_v31 = vld [vmem:[%s11779_s1 + $0x3c8] sm:$0xff] }
  0x4a   :  { %5178 = vmatpush.bf16.msra.mxu0 %v8881_v32  ;;  %v8908_v32 = vld [vmem:[%s11779_s1 + $0x300] sm:$0xff] }
  0x4b   :  { %5192 = vmatpush.bf16.msra.mxu1 %v8889_v33  ;;  %v8916_v33 = vld [vmem:[%s11779_s1 + $0x340] sm:$0xff] }
  0x4c   :  { %5206 = vmatpush.bf16.msra.mxu2 %v8897_v34  ;;  %v8924_v34 = vld [vmem:[%s11779_s1 + $0x380] sm:$0xff] }
  0x4d   :  { %5220 = vmatpush.bf16.msra.mxu3 %v8905_v35  ;;  %v8932_v35 = vld [vmem:[%s11779_s1 + $0x3c0] sm:$0xff] }
  0x4e   :  { %5179 = vmatpush.bf16.msra.mxu0 %v8880_v36  ;;  %v8947_v36 = vld [vmem:[%s11779_s1 + $0x438] sm:$0xff] }
  0x4f   :  { %5193 = vmatpush.bf16.msra.mxu1 %v8888_v37  ;;  %v8955_v37 = vld [vmem:[%s11779_s1 + $0x478] sm:$0xff] }
  0x50   :  { %5207 = vmatpush.bf16.msra.mxu2 %v8896_v38  ;;  %v6198_v38 = vld [vmem:[%s11780_s0 + $0x30] sm:$0xf] }
  0x51   :  { %5221 = vmatpush.bf16.msra.mxu3 %v8904_v39  ;;  %v8782_v39 = vld [vmem:[%s11780_s0 + $0x14c] sm:$0xf0] }
  0x52   :  { %5180 = vmatpush.bf16.msra.mxu0 %v8879_v40  ;;  %v6206_v40 = vld [vmem:[%s11780_s0 + $0x38] sm:$0xf] }
  0x53   :  { %5194 = vmatpush.bf16.msra.mxu1 %v8887_v41  ;;  %v8783_v41 = vld [vmem:[%s11780_s0 + $0x154] sm:$0xf0] }
  0x54   :  { %5208 = vmatpush.bf16.msra.mxu2 %v8895_v42  ;;  %v8746_v42 = vld [vmem:[%s11780_s0 + $0x34] sm:$0xf] }
  0x55   :  { %5222 = vmatpush.bf16.msra.mxu3 %v8903_v43  ;;  %v6200_v43 = vld [vmem:[%s11780_s0 + $0x150] sm:$0xf0] }
  0x56   :  { %5181 = vmatpush.bf16.msra.mxu0 %v8878_v44  ;;  %v8747_v44 = vld [vmem:[%s11780_s0 + $0x3c] sm:$0xf] }
  0x57   :  { %5195 = vmatpush.bf16.msra.mxu1 %v8886_v45  ;;  %v6208_v45 = vld [vmem:[%s11780_s0 + $0x158] sm:$0xf0] }
  0x58   :  { %5209 = vmatpush.bf16.msra.mxu2 %v8894_v46  ;;  %v8963_v46 = vld [vmem:[%s11779_s1 + $0x4b8] sm:$0xff] }
  0x59   :  { %5223 = vmatpush.bf16.msra.mxu3 %v8902_v47  ;;  %v8971_v47 = vld [vmem:[%s11779_s1 + $0x4f8] sm:$0xff] }
  0x5a   :  { %5182 = vmatpush.bf16.msra.mxu0 %v8877_v48  ;;  %v6199_v48 = vor.u32 %v8782_v39, %v6198_v38  ;;  %v10077_v38 = vld [vmem:[%s11781_s2] ss:$0 sm:$0xff]  ;;  %v8993_v39 = vld [vmem:[%s11779_s1 + $0x5a8] sm:$0xff] }
  0x5b   :  { %5196 = vmatpush.bf16.msra.mxu1 %v8885_v49  ;;  %v6207_v49 = vor.u32 %v8783_v41, %v6206_v40  ;;  %v9001_v40 = vld [vmem:[%s11779_s1 + $0x5e8] sm:$0xff] }
  0x5c   :  { %5210 = vmatpush.bf16.msra.mxu2 %v8893_v50  ;;  %v6203_v50 = vor.u32 %v8746_v42, %v6200_v43  ;;  %v8976_v42 = vld [vmem:[%s11779_s1 + $0x520] sm:$0xff] }
  0x5d   :  { %5224 = vmatpush.bf16.msra.mxu3 %v8901_v51  ;;  %v6211_v51 = vor.u32 %v8747_v44, %v6208_v45  ;;  %v8984_v43 = vld [vmem:[%s11779_s1 + $0x560] sm:$0xff] }
  0x5e   :  { %5183 = vmatpush.bf16.msra.mxu0 %v8876_v52  ;;  %v8946_v52 = vld [vmem:[%s11779_s1 + $0x430] sm:$0xff]  ;;  %v8992_v45 = vld [vmem:[%s11779_s1 + $0x5a0] sm:$0xff] }
  0x5f   :  { %5197 = vmatpush.bf16.msra.mxu1 %v8884_v53  ;;  %v8954_v53 = vld [vmem:[%s11779_s1 + $0x470] sm:$0xff] }
  0x60   :  { %5211 = vmatpush.bf16.msra.mxu2 %v8892_v54  ;;  %v8962_v54 = vld [vmem:[%s11779_s1 + $0x4b0] sm:$0xff] }
  0x61   :  { %5225 = vmatpush.bf16.msra.mxu3 %v8900_v55  ;;  %5184 = vmatmul.bf16.vlgmr.msra.gmra.mxu0 %v6183_v4  ;;  %v8970_v55 = vld [vmem:[%s11779_s1 + $0x4f0] sm:$0xff] }
  0x62   :  { %5232 = vmatpush.bf16.msrb.mxu0 %v8915_v56  ;;  %5198 = vmatmul.bf16.vlgmr.msra.gmra.mxu1 %v6187_v6  ;;  %v8945_v56 = vld [vmem:[%s11779_s1 + $0x428] sm:$0xff]  ;;  %v8942_v4 = vld [vmem:[%s11779_s1 + $0x410] sm:$0xff] }
  0x63   :  { %5246 = vmatpush.bf16.msrb.mxu1 %v8923_v57  ;;  %5212 = vmatmul.bf16.vlgmr.msra.gmra.mxu2 %v6191_v5  ;;  %v8953_v57 = vld [vmem:[%s11779_s1 + $0x468] sm:$0xff]  ;;  %v8950_v5 = vld [vmem:[%s11779_s1 + $0x450] sm:$0xff] }
  0x64   :  { %5260 = vmatpush.bf16.msrb.mxu2 %v8931_v2  ;;  %5226 = vmatmul.bf16.vlgmr.msra.gmra.mxu3 %v6195_v7  ;;  %v8959_v2 = vld [vmem:[%s11779_s1 + $0x498] sm:$0xff]  ;;  %v8958_v6 = vld [vmem:[%s11779_s1 + $0x490] sm:$0xff] }
  0x65   :  { %5274 = vmatpush.bf16.msrb.mxu3 %v8939_v3  ;;  %v8967_v3 = vld [vmem:[%s11779_s1 + $0x4d8] sm:$0xff]  ;;  %v8966_v7 = vld [vmem:[%s11779_s1 + $0x4d0] sm:$0xff] }
  0x66   :  { %5233 = vmatpush.bf16.msrb.mxu0 %v8914_v8  ;;  %v8941_v8 = vld [vmem:[%s11779_s1 + $0x408] sm:$0xff] }
  0x67   :  { %5247 = vmatpush.bf16.msrb.mxu1 %v8922_v9  ;;  %v8949_v9 = vld [vmem:[%s11779_s1 + $0x448] sm:$0xff] }
  0x68   :  { %5261 = vmatpush.bf16.msrb.mxu2 %v8930_v10  ;;  %v8957_v10 = vld [vmem:[%s11779_s1 + $0x488] sm:$0xff] }
  0x69   :  { %5275 = vmatpush.bf16.msrb.mxu3 %v8938_v11  ;;  %v8965_v11 = vld [vmem:[%s11779_s1 + $0x4c8] sm:$0xff] }
  0x6a   :  { %5234 = vmatpush.bf16.msrb.mxu0 %v8913_v12  ;;  %v8940_v12 = vld [vmem:[%s11779_s1 + $0x400] sm:$0xff] }
  0x6b   :  { %5248 = vmatpush.bf16.msrb.mxu1 %v8921_v13  ;;  %v8948_v13 = vld [vmem:[%s11779_s1 + $0x440] sm:$0xff] }
  0x6c   :  { %5262 = vmatpush.bf16.msrb.mxu2 %v8929_v14  ;;  %v8956_v14 = vld [vmem:[%s11779_s1 + $0x480] sm:$0xff] }
  0x6d   :  { %5276 = vmatpush.bf16.msrb.mxu3 %v8937_v15  ;;  %v8964_v15 = vld [vmem:[%s11779_s1 + $0x4c0] sm:$0xff] }
  0x6e   :  { %5235 = vmatpush.bf16.msrb.mxu0 %v8912_v16  ;;  %v8979_v16 = vld [vmem:[%s11779_s1 + $0x538] sm:$0xff] }
  0x6f   :  { %5249 = vmatpush.bf16.msrb.mxu1 %v8920_v17  ;;  %v8987_v17 = vld [vmem:[%s11779_s1 + $0x578] sm:$0xff] }
  0x70   :  { %5263 = vmatpush.bf16.msrb.mxu2 %v8928_v18  ;;  %v6214_v18 = vld [vmem:[%s11780_s0 + $0x40] sm:$0xf] }
  0x71   :  { %5277 = vmatpush.bf16.msrb.mxu3 %v8936_v19  ;;  %v8784_v19 = vld [vmem:[%s11780_s0 + $0x15c] sm:$0xf0] }
  0x72   :  { %5236 = vmatpush.bf16.msrb.mxu0 %v8911_v20  ;;  %v6222_v20 = vld [vmem:[%s11780_s0 + $0x48] sm:$0xf] }
  0x73   :  { %5250 = vmatpush.bf16.msrb.mxu1 %v8919_v21  ;;  %v8785_v21 = vld [vmem:[%s11780_s0 + $0x164] sm:$0xf0] }
  0x74   :  { %5264 = vmatpush.bf16.msrb.mxu2 %v8927_v22  ;;  %v8748_v22 = vld [vmem:[%s11780_s0 + $0x44] sm:$0xf] }
  0x75   :  { %5278 = vmatpush.bf16.msrb.mxu3 %v8935_v23  ;;  %v6216_v23 = vld [vmem:[%s11780_s0 + $0x160] sm:$0xf0] }
  0x76   :  { %5237 = vmatpush.bf16.msrb.mxu0 %v8910_v24  ;;  %v8749_v24 = vld [vmem:[%s11780_s0 + $0x4c] sm:$0xf] }
  0x77   :  { %5251 = vmatpush.bf16.msrb.mxu1 %v8918_v25  ;;  %v6224_v25 = vld [vmem:[%s11780_s0 + $0x168] sm:$0xf0] }
  0x78   :  { %5265 = vmatpush.bf16.msrb.mxu2 %v8926_v26  ;;  %v8995_v26 = vld [vmem:[%s11779_s1 + $0x5b8] sm:$0xff] }
  0x79   :  { %5279 = vmatpush.bf16.msrb.mxu3 %v8934_v27  ;;  %v9003_v27 = vld [vmem:[%s11779_s1 + $0x5f8] sm:$0xff] }
  0x7a   :  { %5238 = vmatpush.bf16.msrb.mxu0 %v8909_v28  ;;  %v6215_v28 = vor.u32 %v8784_v19, %v6214_v18 }
  0x7b   :  { %5252 = vmatpush.bf16.msrb.mxu1 %v8917_v29  ;;  %v6223_v29 = vor.u32 %v8785_v21, %v6222_v20 }
  0x7c   :  { %5266 = vmatpush.bf16.msrb.mxu2 %v8925_v30  ;;  %v6219_v30 = vor.u32 %v8748_v22, %v6216_v23  ;;  %v9010_v23 = vld [vmem:[%s11779_s1 + $0x630] sm:$0xff] }
  0x7d   :  { %5280 = vmatpush.bf16.msrb.mxu3 %v8933_v31  ;;  %v6227_v31 = vor.u32 %v8749_v24, %v6224_v25  ;;  %v9018_v24 = vld [vmem:[%s11779_s1 + $0x670] sm:$0xff] }
  0x7e   :  { %5239 = vmatpush.bf16.msrb.mxu0 %v8908_v32  ;;  %v8978_v32 = vld [vmem:[%s11779_s1 + $0x530] sm:$0xff] }
  0x7f   :  { %5253 = vmatpush.bf16.msrb.mxu1 %v8916_v33  ;;  %v8986_v33 = vld [vmem:[%s11779_s1 + $0x570] sm:$0xff] }
  0x80   :  { %5267 = vmatpush.bf16.msrb.mxu2 %v8924_v34  ;;  %v8994_v34 = vld [vmem:[%s11779_s1 + $0x5b0] sm:$0xff] }
  0x81   :  { %5281 = vmatpush.bf16.msrb.mxu3 %v8932_v35  ;;  %5240 = vmatmul.bf16.vlgmr.msrb.gmra.mxu0 %v6199_v48  ;;  %v9002_v35 = vld [vmem:[%s11779_s1 + $0x5f0] sm:$0xff] }
  0x82   :  { %5288 = vmatpush.bf16.msra.mxu0 %v8947_v36  ;;  %5254 = vmatmul.bf16.vlgmr.msrb.gmra.mxu1 %v6203_v50  ;;  %v8977_v36 = vld [vmem:[%s11779_s1 + $0x528] sm:$0xff]  ;;  %v8983_v50 = vld [vmem:[%s11779_s1 + $0x558] sm:$0xff]  ;;  %v9026_v25 = vld [vmem:[%s11779_s1 + $0x6b0] sm:$0xff] }
  0x83   :  { %5302 = vmatpush.bf16.msra.mxu1 %v8955_v37  ;;  %5268 = vmatmul.bf16.vlgmr.msrb.gmra.mxu2 %v6207_v49  ;;  %v8985_v37 = vld [vmem:[%s11779_s1 + $0x568] sm:$0xff]  ;;  %v8975_v49 = vld [vmem:[%s11779_s1 + $0x518] sm:$0xff] }
  0x84   :  { %5316 = vmatpush.bf16.msra.mxu2 %v8963_v46  ;;  %5282 = vmatmul.bf16.vlgmr.msrb.gmra.mxu3 %v6211_v51  ;;  %v9000_v46 = vld [vmem:[%s11779_s1 + $0x5e0] sm:$0xff]  ;;  %v8991_v51 = vld [vmem:[%s11779_s1 + $0x598] sm:$0xff] }
  0x85   :  { %5330 = vmatpush.bf16.msra.mxu3 %v8971_v47 }
  0x86   :  { %5289 = vmatpush.bf16.msra.mxu0 %v8946_v52  ;;  %v8999_v52 = vld [vmem:[%s11779_s1 + $0x5d8] sm:$0xff] }
  0x87   :  { %5303 = vmatpush.bf16.msra.mxu1 %v8954_v53 }
  0x88   :  { %5317 = vmatpush.bf16.msra.mxu2 %v8962_v54 }
  0x89   :  { %5331 = vmatpush.bf16.msra.mxu3 %v8970_v55 }
  0x8a   :  { %5290 = vmatpush.bf16.msra.mxu0 %v8945_v56  ;;  %v8974_v56 = vld [vmem:[%s11779_s1 + $0x510] sm:$0xff] }
  0x8b   :  { %5304 = vmatpush.bf16.msra.mxu1 %v8953_v57  ;;  %v8982_v57 = vld [vmem:[%s11779_s1 + $0x550] sm:$0xff] }
  0x8c   :  { %5318 = vmatpush.bf16.msra.mxu2 %v8961_v58 }
  0x8d   :  { %5332 = vmatpush.bf16.msra.mxu3 %v8969_v59  ;;  %v8990_v59 = vld [vmem:[%s11779_s1 + $0x590] sm:$0xff] }
  0x8e   :  { %5291 = vmatpush.bf16.msra.mxu0 %v8944_v60  ;;  %v8998_v60 = vld [vmem:[%s11779_s1 + $0x5d0] sm:$0xff] }
  0x8f   :  { %5305 = vmatpush.bf16.msra.mxu1 %v8952_v61  ;;  %v8973_v61 = vld [vmem:[%s11779_s1 + $0x508] sm:$0xff] }
  0x90   :  { %5319 = vmatpush.bf16.msra.mxu2 %v8960_v62  ;;  %v8981_v62 = vld [vmem:[%s11779_s1 + $0x548] sm:$0xff] }
  0x91   :  { %5333 = vmatpush.bf16.msra.mxu3 %v8968_v63  ;;  %v8989_v63 = vld [vmem:[%s11779_s1 + $0x588] sm:$0xff] }
  0x92   :  { %5292 = vmatpush.bf16.msra.mxu0 %v8943_v0  ;;  %v8997_v0 = vld [vmem:[%s11779_s1 + $0x5c8] sm:$0xff] }
  0x93   :  { %5306 = vmatpush.bf16.msra.mxu1 %v8951_v1  ;;  %v8972_v1 = vld [vmem:[%s11779_s1 + $0x500] sm:$0xff] }
  0x94   :  { %5320 = vmatpush.bf16.msra.mxu2 %v8959_v2  ;;  %v8980_v2 = vld [vmem:[%s11779_s1 + $0x540] sm:$0xff] }
  0x95   :  { %5334 = vmatpush.bf16.msra.mxu3 %v8967_v3  ;;  %v8988_v3 = vld [vmem:[%s11779_s1 + $0x580] sm:$0xff] }
  0x96   :  { %5293 = vmatpush.bf16.msra.mxu0 %v8942_v4  ;;  %v8996_v4 = vld [vmem:[%s11779_s1 + $0x5c0] sm:$0xff] }
  0x97   :  { %5307 = vmatpush.bf16.msra.mxu1 %v8950_v5  ;;  %v9011_v5 = vld [vmem:[%s11779_s1 + $0x638] sm:$0xff] }
  0x98   :  { %5321 = vmatpush.bf16.msra.mxu2 %v8958_v6  ;;  %v9019_v6 = vld [vmem:[%s11779_s1 + $0x678] sm:$0xff] }
  0x99   :  { %5335 = vmatpush.bf16.msra.mxu3 %v8966_v7  ;;  %v6230_v7 = vld [vmem:[%s11780_s0 + $0x50] sm:$0xf] }
  0x9a   :  { %5294 = vmatpush.bf16.msra.mxu0 %v8941_v8  ;;  %v8786_v8 = vld [vmem:[%s11780_s0 + $0x16c] sm:$0xf0] }
  0x9b   :  { %5308 = vmatpush.bf16.msra.mxu1 %v8949_v9  ;;  %v6238_v9 = vld [vmem:[%s11780_s0 + $0x58] sm:$0xf]  ;;  %v6231_v18 = vor.u32 %v8786_v8, %v6230_v7  ;;  %v6256_v7 = vld [vmem:[%s11780_s0 + $0x188] sm:$0xf0] }
  0x9c   :  { %5322 = vmatpush.bf16.msra.mxu2 %v8957_v10  ;;  %v8787_v10 = vld [vmem:[%s11780_s0 + $0x174] sm:$0xf0] }
  0x9d   :  { %5336 = vmatpush.bf16.msra.mxu3 %v8965_v11  ;;  %v8750_v11 = vld [vmem:[%s11780_s0 + $0x54] sm:$0xf]  ;;  %v6239_v19 = vor.u32 %v8787_v10, %v6238_v9  ;;  %v9059_v8 = vld [vmem:[%s11779_s1 + $0x7b8] sm:$0xff] }
  0x9e   :  { %5295 = vmatpush.bf16.msra.mxu0 %v8940_v12  ;;  %v5073_v41 = vpop.f32.mrf.mxu0  ;;  %v6232_v12 = vld [vmem:[%s11780_s0 + $0x170] sm:$0xf0]  ;;  %v9067_v9 = vld [vmem:[%s11779_s1 + $0x7f8] sm:$0xff] }
  0x9f   :  { %5309 = vmatpush.bf16.msra.mxu1 %v8948_v13  ;;  %v5074_v44 = vadd.f32 %v10077_v38, %v5073_v41  ;;  %v5087_v47 = vpop.f32.mrf.mxu1  ;;  %v8751_v13 = vld [vmem:[%s11780_s0 + $0x5c] sm:$0xf]  ;;  %v6235_v20 = vor.u32 %v8750_v11, %v6232_v12 }
  0xa0   :  { %5323 = vmatpush.bf16.msra.mxu2 %v8956_v14  ;;  %v6240_v14 = vld [vmem:[%s11780_s0 + $0x178] sm:$0xf0] }
  0xa1   :  { %5337 = vmatpush.bf16.msra.mxu3 %v8964_v15  ;;  %5296 = vmatmul.bf16.vlgmr.msra.gmra.mxu0 %v6215_v28  ;;  %v5088_v48 = vadd.f32 %v5087_v47, %v5074_v44  ;;  %v9027_v15 = vld [vmem:[%s11779_s1 + $0x6b8] sm:$0xff]  ;;  %v6243_v21 = vor.u32 %v8751_v13, %v6240_v14  ;;  %v9009_v28 = vld [vmem:[%s11779_s1 + $0x628] sm:$0xff] }
  0xa2   :  { %5344 = vmatpush.bf16.msrb.mxu0 %v8979_v16  ;;  %5310 = vmatmul.bf16.vlgmr.msra.gmra.mxu1 %v6219_v30  ;;  %v9035_v16 = vld [vmem:[%s11779_s1 + $0x6f8] sm:$0xff]  ;;  %v9025_v30 = vld [vmem:[%s11779_s1 + $0x6a8] sm:$0xff] }
  0xa3   :  { %5358 = vmatpush.bf16.msrb.mxu1 %v8987_v17  ;;  %5324 = vmatmul.bf16.vlgmr.msra.gmra.mxu2 %v6223_v29  ;;  %v9017_v29 = vld [vmem:[%s11779_s1 + $0x668] sm:$0xff]  ;;  %v9023_v44 = vld [vmem:[%s11779_s1 + $0x698] sm:$0xff] }
  0xa4   :  { %5372 = vmatpush.bf16.msrb.mxu2 %v8995_v26  ;;  %5338 = vmatmul.bf16.vlgmr.msra.gmra.mxu3 %v6227_v31  ;;  %v9034_v26 = vld [vmem:[%s11779_s1 + $0x6f0] sm:$0xff]  ;;  %v9033_v31 = vld [vmem:[%s11779_s1 + $0x6e8] sm:$0xff] }
  0xa5   :  { %5386 = vmatpush.bf16.msrb.mxu3 %v9003_v27 }
  0xa6   :  { %5345 = vmatpush.bf16.msrb.mxu0 %v8978_v32  ;;  %v5101_v53 = vpop.f32.mrf.mxu2  ;;  %v10184_v17 = vpop.f32.mrf.mxu0 }
  0xa7   :  { %5359 = vmatpush.bf16.msrb.mxu1 %v8986_v33  ;;  %v5102_v54 = vadd.f32 %v5101_v53, %v5088_v48  ;;  %v5115_v55 = vpop.f32.mrf.mxu3  ;;  %v10186_v22 = vpop.f32.mrf.mxu1  ;;  %v9030_v53 = vld [vmem:[%s11779_s1 + $0x6d0] sm:$0xff] }
  0xa8   :  { %5373 = vmatpush.bf16.msrb.mxu2 %v8994_v34 }
  0xa9   :  { %5387 = vmatpush.bf16.msrb.mxu3 %v9002_v35  ;;  %v10116_v58 = vadd.f32 %v5115_v55, %v5102_v54  ;;  %v9008_v35 = vld [vmem:[%s11779_s1 + $0x620] sm:$0xff]  ;;  %v9005_v54 = vld [vmem:[%s11779_s1 + $0x608] sm:$0xff] }
  0xaa   :  { %5346 = vmatpush.bf16.msrb.mxu0 %v8977_v36  ;;  %v9016_v36 = vld [vmem:[%s11779_s1 + $0x660] sm:$0xff]  ;;  %v9013_v55 = vld [vmem:[%s11779_s1 + $0x648] sm:$0xff] }
  0xab   :  { %5360 = vmatpush.bf16.msrb.mxu1 %v8985_v37  ;;  %v9024_v37 = vld [vmem:[%s11779_s1 + $0x6a0] sm:$0xff] }
  0xac   :  { %5374 = vmatpush.bf16.msrb.mxu2 %v8993_v39  ;;  %v9032_v39 = vld [vmem:[%s11779_s1 + $0x6e0] sm:$0xff] }
  0xad   :  { %5388 = vmatpush.bf16.msrb.mxu3 %v9001_v40 }
  0xae   :  { %5347 = vmatpush.bf16.msrb.mxu0 %v8976_v42  ;;  %v10200_v27 = vpop.f32.mrf.mxu2  ;;  %v9007_v42 = vld [vmem:[%s11779_s1 + $0x618] sm:$0xff] }
  0xaf   :  { %5361 = vmatpush.bf16.msrb.mxu1 %v8984_v43  ;;  %v10214_v32 = vpop.f32.mrf.mxu3  ;;  %v9015_v43 = vld [vmem:[%s11779_s1 + $0x658] sm:$0xff] }
  0xb0   :  { %5375 = vmatpush.bf16.msrb.mxu2 %v8992_v45  ;;  %v9031_v45 = vld [vmem:[%s11779_s1 + $0x6d8] sm:$0xff] }
  0xb1   :  { %5389 = vmatpush.bf16.msrb.mxu3 %v9000_v46 }
  0xb2   :  { %5348 = vmatpush.bf16.msrb.mxu0 %v8975_v49 }
  0xb3   :  { %5362 = vmatpush.bf16.msrb.mxu1 %v8983_v50  ;;  %v9006_v50 = vld [vmem:[%s11779_s1 + $0x610] sm:$0xff] }
  0xb4   :  { %5376 = vmatpush.bf16.msrb.mxu2 %v8991_v51  ;;  %v9014_v51 = vld [vmem:[%s11779_s1 + $0x650] sm:$0xff] }
  0xb5   :  { %5390 = vmatpush.bf16.msrb.mxu3 %v8999_v52  ;;  %v9022_v52 = vld [vmem:[%s11779_s1 + $0x690] sm:$0xff] }
  0xb6   :  { %5349 = vmatpush.bf16.msrb.mxu0 %v8974_v56  ;;  %v9021_v56 = vld [vmem:[%s11779_s1 + $0x688] sm:$0xff] }
  0xb7   :  { %5363 = vmatpush.bf16.msrb.mxu1 %v8982_v57  ;;  %v9029_v57 = vld [vmem:[%s11779_s1 + $0x6c8] sm:$0xff] }
  0xb8   :  { %5377 = vmatpush.bf16.msrb.mxu2 %v8990_v59  ;;  %v9012_v59 = vld [vmem:[%s11779_s1 + $0x640] sm:$0xff] }
  0xb9   :  { %5391 = vmatpush.bf16.msrb.mxu3 %v8998_v60  ;;  %v9020_v60 = vld [vmem:[%s11779_s1 + $0x680] sm:$0xff] }
  0xba   :  { %5350 = vmatpush.bf16.msrb.mxu0 %v8973_v61  ;;  %v9028_v61 = vld [vmem:[%s11779_s1 + $0x6c0] sm:$0xff] }
  0xbb   :  { %5364 = vmatpush.bf16.msrb.mxu1 %v8981_v62  ;;  %v9043_v62 = vld [vmem:[%s11779_s1 + $0x738] sm:$0xff] }
  0xbc   :  { %5378 = vmatpush.bf16.msrb.mxu2 %v8989_v63  ;;  %v9051_v63 = vld [vmem:[%s11779_s1 + $0x778] sm:$0xff] }
  0xbd   :  { %5392 = vmatpush.bf16.msrb.mxu3 %v8997_v0  ;;  %v6246_v0 = vld [vmem:[%s11780_s0 + $0x60] sm:$0xf] }
  0xbe   :  { %5351 = vmatpush.bf16.msrb.mxu0 %v8972_v1  ;;  %v5129_v33 = vpop.f32.mrf.mxu0  ;;  %v8788_v1 = vld [vmem:[%s11780_s0 + $0x17c] sm:$0xf0] }
  0xbf   :  { %5365 = vmatpush.bf16.msrb.mxu1 %v8980_v2  ;;  %v5130_v34 = vadd.f32 %v5129_v33, %v10116_v58  ;;  %v5143_v40 = vpop.f32.mrf.mxu1  ;;  %v9004_v58 = vld [vmem:[%s11779_s1 + $0x600] sm:$0xff]  ;;  %v6254_v2 = vld [vmem:[%s11780_s0 + $0x68] sm:$0xf]  ;;  %v6247_v10 = vor.u32 %v8788_v1, %v6246_v0  ;;  %v8791_v0 = vld [vmem:[%s11780_s0 + $0x194] sm:$0xf0] }
  0xc0   :  { %5379 = vmatpush.bf16.msrb.mxu2 %v8988_v3  ;;  %v8789_v3 = vld [vmem:[%s11780_s0 + $0x184] sm:$0xf0]  ;;  %v9048_v33 = vld [vmem:[%s11779_s1 + $0x760] sm:$0xff]  ;;  %v8754_v1 = vld [vmem:[%s11780_s0 + $0x74] sm:$0xf] }
  0xc1   :  { %5393 = vmatpush.bf16.msrb.mxu3 %v8996_v4  ;;  %5352 = vmatmul.bf16.vlgmr.msrb.gmra.mxu0 %v6231_v18  ;;  %v5144_v41 = vadd.f32 %v5143_v40, %v5130_v34  ;;  %v8752_v4 = vld [vmem:[%s11780_s0 + $0x64] sm:$0xf]  ;;  %v6255_v11 = vor.u32 %v8789_v3, %v6254_v2  ;;  %v9050_v18 = vld [vmem:[%s11779_s1 + $0x770] sm:$0xff]  ;;  %v9047_v40 = vld [vmem:[%s11779_s1 + $0x758] sm:$0xff] }
  0xc2   :  { %5400 = vmatpush.bf16.msra.mxu0 %v9011_v5  ;;  %5366 = vmatmul.bf16.vlgmr.msrb.gmra.mxu1 %v6235_v20  ;;  %v6248_v5 = vld [vmem:[%s11780_s0 + $0x180] sm:$0xf0]  ;;  %v9066_v20 = vld [vmem:[%s11779_s1 + $0x7f0] sm:$0xff]  ;;  %v8755_v3 = vld [vmem:[%s11780_s0 + $0x7c] sm:$0xf] }
  0xc3   :  { %5414 = vmatpush.bf16.msra.mxu1 %v9019_v6  ;;  %5380 = vmatmul.bf16.vlgmr.msrb.gmra.mxu2 %v6239_v19  ;;  %v8753_v6 = vld [vmem:[%s11780_s0 + $0x6c] sm:$0xf]  ;;  %v6251_v13 = vor.u32 %v8752_v4, %v6248_v5  ;;  %v9058_v19 = vld [vmem:[%s11779_s1 + $0x7b0] sm:$0xff]  ;;  %v6272_v4 = vld [vmem:[%s11780_s0 + $0x198] sm:$0xf0] }
  0xc4   :  { %5428 = vmatpush.bf16.msra.mxu2 %v9027_v15  ;;  %5394 = vmatmul.bf16.vlgmr.msrb.gmra.mxu3 %v6243_v21  ;;  %v6259_v14 = vor.u32 %v8753_v6, %v6256_v7  ;;  %v9041_v21 = vld [vmem:[%s11779_s1 + $0x728] sm:$0xff]  ;;  %v6264_v2 = vld [vmem:[%s11780_s0 + $0x190] sm:$0xf0]  ;;  %v9091_v5 = vld [vmem:[%s11779_s1 + $0x8b8] sm:$0xff] }
  0xc5   :  { %5442 = vmatpush.bf16.msra.mxu3 %v9035_v16  ;;  %v9042_v16 = vld [vmem:[%s11779_s1 + $0x730] sm:$0xff]  ;;  %v9099_v6 = vld [vmem:[%s11779_s1 + $0x8f8] sm:$0xff] }
  0xc6   :  { %5401 = vmatpush.bf16.msra.mxu0 %v9010_v23  ;;  %v5157_v46 = vpop.f32.mrf.mxu2  ;;  %v10315_v12 = vpop.f32.mrf.mxu0  ;;  %v9049_v23 = vld [vmem:[%s11779_s1 + $0x768] sm:$0xff] }
  0xc7   :  { %5415 = vmatpush.bf16.msra.mxu1 %v9018_v24  ;;  %v5158_v47 = vadd.f32 %v5157_v46, %v5144_v41  ;;  %v5171_v48 = vpop.f32.mrf.mxu3  ;;  %v10317_v15 = vpop.f32.mrf.mxu1  ;;  %v9055_v41 = vld [vmem:[%s11779_s1 + $0x798] sm:$0xff] }
  0xc8   :  { %5429 = vmatpush.bf16.msra.mxu2 %v9026_v25  ;;  %v9057_v25 = vld [vmem:[%s11779_s1 + $0x7a8] sm:$0xff] }
  0xc9   :  { %5443 = vmatpush.bf16.msra.mxu3 %v9034_v26  ;;  %v10241_v49 = vadd.f32 %v5171_v48, %v5158_v47  ;;  %v9065_v26 = vld [vmem:[%s11779_s1 + $0x7e8] sm:$0xff]  ;;  %v9038_v47 = vld [vmem:[%s11779_s1 + $0x710] sm:$0xff] }
  0xca   :  { %5402 = vmatpush.bf16.msra.mxu0 %v9009_v28  ;;  %v9046_v48 = vld [vmem:[%s11779_s1 + $0x750] sm:$0xff] }
  0xcb   :  { %5416 = vmatpush.bf16.msra.mxu1 %v9017_v29 }
  0xcc   :  { %5430 = vmatpush.bf16.msra.mxu2 %v9025_v30 }
  0xcd   :  { %5444 = vmatpush.bf16.msra.mxu3 %v9033_v31  ;;  %v9040_v31 = vld [vmem:[%s11779_s1 + $0x720] sm:$0xff] }
  0xce   :  { %5403 = vmatpush.bf16.msra.mxu0 %v9008_v35  ;;  %v10337_v24 = vpop.f32.mrf.mxu2  ;;  %v9056_v35 = vld [vmem:[%s11779_s1 + $0x7a0] sm:$0xff] }
  0xcf   :  { %5417 = vmatpush.bf16.msra.mxu1 %v9016_v36  ;;  %v10345_v28 = vpop.f32.mrf.mxu3  ;;  %v9064_v36 = vld [vmem:[%s11779_s1 + $0x7e0] sm:$0xff] }
  0xd0   :  { %5431 = vmatpush.bf16.msra.mxu2 %v9024_v37 }
  0xd1   :  { %5445 = vmatpush.bf16.msra.mxu3 %v9032_v39  ;;  %v9039_v39 = vld [vmem:[%s11779_s1 + $0x718] sm:$0xff] }
  0xd2   :  { %5404 = vmatpush.bf16.msra.mxu0 %v9007_v42  ;;  %v9063_v42 = vld [vmem:[%s11779_s1 + $0x7d8] sm:$0xff] }
  0xd3   :  { %5418 = vmatpush.bf16.msra.mxu1 %v9015_v43 }
  0xd4   :  { %5432 = vmatpush.bf16.msra.mxu2 %v9023_v44 }
  0xd5   :  { %5446 = vmatpush.bf16.msra.mxu3 %v9031_v45 }
  0xd6   :  { %5405 = vmatpush.bf16.msra.mxu0 %v9006_v50  ;;  %v9062_v50 = vld [vmem:[%s11779_s1 + $0x7d0] sm:$0xff] }
  0xd7   :  { %5419 = vmatpush.bf16.msra.mxu1 %v9014_v51  ;;  %v9037_v51 = vld [vmem:[%s11779_s1 + $0x708] sm:$0xff] }
  0xd8   :  { %5433 = vmatpush.bf16.msra.mxu2 %v9022_v52  ;;  %v9045_v52 = vld [vmem:[%s11779_s1 + $0x748] sm:$0xff] }
  0xd9   :  { %5447 = vmatpush.bf16.msra.mxu3 %v9030_v53  ;;  %v9053_v53 = vld [vmem:[%s11779_s1 + $0x788] sm:$0xff] }
  0xda   :  { %5406 = vmatpush.bf16.msra.mxu0 %v9005_v54  ;;  %v9061_v54 = vld [vmem:[%s11779_s1 + $0x7c8] sm:$0xff] }
  0xdb   :  { %5420 = vmatpush.bf16.msra.mxu1 %v9013_v55  ;;  %v9036_v55 = vld [vmem:[%s11779_s1 + $0x700] sm:$0xff] }
  0xdc   :  { %5434 = vmatpush.bf16.msra.mxu2 %v9021_v56  ;;  %v9044_v56 = vld [vmem:[%s11779_s1 + $0x740] sm:$0xff] }
  0xdd   :  { %5448 = vmatpush.bf16.msra.mxu3 %v9029_v57  ;;  %v9052_v57 = vld [vmem:[%s11779_s1 + $0x780] sm:$0xff] }
  0xde   :  { %5407 = vmatpush.bf16.msra.mxu0 %v9004_v58  ;;  %v5185_v29 = vpop.f32.mrf.mxu0  ;;  %v9060_v58 = vld [vmem:[%s11779_s1 + $0x7c0] sm:$0xff] }
  0xdf   :  { %5421 = vmatpush.bf16.msra.mxu1 %v9012_v59  ;;  %v5186_v30 = vadd.f32 %v5185_v29, %v10241_v49  ;;  %v5199_v34 = vpop.f32.mrf.mxu1  ;;  %v9054_v49 = vld [vmem:[%s11779_s1 + $0x790] sm:$0xff]  ;;  %v9075_v59 = vld [vmem:[%s11779_s1 + $0x838] sm:$0xff] }
  0xe0   :  { %5435 = vmatpush.bf16.msra.mxu2 %v9020_v60  ;;  %v9083_v60 = vld [vmem:[%s11779_s1 + $0x878] sm:$0xff] }
  0xe1   :  { %5449 = vmatpush.bf16.msra.mxu3 %v9028_v61  ;;  %5408 = vmatmul.bf16.vlgmr.msra.gmra.mxu0 %v6247_v10  ;;  %v5200_v37 = vadd.f32 %v5199_v34, %v5186_v30  ;;  %v6262_v61 = vld [vmem:[%s11780_s0 + $0x70] sm:$0xf]  ;;  %v6267_v10 = vor.u32 %v8754_v1, %v6264_v2  ;;  %v9080_v34 = vld [vmem:[%s11779_s1 + $0x860] sm:$0xff]  ;;  %v8793_v1 = vld [vmem:[%s11780_s0 + $0x1a4] sm:$0xf0] }
  0xe2   :  { %5456 = vmatpush.bf16.msrb.mxu0 %v9043_v62  ;;  %5422 = vmatmul.bf16.vlgmr.msra.gmra.mxu1 %v6251_v13  ;;  %v8790_v62 = vld [vmem:[%s11780_s0 + $0x18c] sm:$0xf0]  ;;  %v8756_v2 = vld [vmem:[%s11780_s0 + $0x84] sm:$0xf] }
  0xe3   :  { %5470 = vmatpush.bf16.msrb.mxu1 %v9051_v63  ;;  %5436 = vmatmul.bf16.vlgmr.msra.gmra.mxu2 %v6255_v11  ;;  %v6270_v63 = vld [vmem:[%s11780_s0 + $0x78] sm:$0xf]  ;;  %v6263_v7 = vor.u32 %v8790_v62, %v6262_v61  ;;  %v6275_v11 = vor.u32 %v8755_v3, %v6272_v4  ;;  %v6278_v62 = vld [vmem:[%s11780_s0 + $0x80] sm:$0xf]  ;;  %v6280_v3 = vld [vmem:[%s11780_s0 + $0x1a0] sm:$0xf0] }
  0xe4   :  { %5484 = vmatpush.bf16.msrb.mxu2 %v9059_v8  ;;  %5450 = vmatmul.bf16.vlgmr.msra.gmra.mxu3 %v6259_v14  ;;  %v6271_v8 = vor.u32 %v8791_v0, %v6270_v63  ;;  %v9074_v14 = vld [vmem:[%s11779_s1 + $0x830] sm:$0xff]  ;;  %v9115_v61 = vld [vmem:[%s11779_s1 + $0x978] sm:$0xff]  ;;  %v8792_v63 = vld [vmem:[%s11780_s0 + $0x19c] sm:$0xf0] }
  0xe5   :  { %5498 = vmatpush.bf16.msrb.mxu3 %v9067_v9  ;;  %v6286_v0 = vld [vmem:[%s11780_s0 + $0x88] sm:$0xf]  ;;  %v8757_v4 = vld [vmem:[%s11780_s0 + $0x8c] sm:$0xf] }
  0xe6   :  { %5457 = vmatpush.bf16.msrb.mxu0 %v9042_v16  ;;  %v5213_v43 = vpop.f32.mrf.mxu2  ;;  %v10446_v9 = vpop.f32.mrf.mxu0  ;;  %v9082_v16 = vld [vmem:[%s11779_s1 + $0x870] sm:$0xff] }
  0xe7   :  { %5471 = vmatpush.bf16.msrb.mxu1 %v9050_v18  ;;  %v5214_v44 = vadd.f32 %v5213_v43, %v5200_v37  ;;  %v5227_v45 = vpop.f32.mrf.mxu3  ;;  %v10448_v13 = vpop.f32.mrf.mxu1  ;;  %v9090_v18 = vld [vmem:[%s11779_s1 + $0x8b0] sm:$0xff]  ;;  %v9096_v37 = vld [vmem:[%s11779_s1 + $0x8e0] sm:$0xff]  ;;  %v9095_v43 = vld [vmem:[%s11779_s1 + $0x8d8] sm:$0xff] }
  0xe8   :  { %5485 = vmatpush.bf16.msrb.mxu2 %v9058_v19  ;;  %v9098_v19 = vld [vmem:[%s11779_s1 + $0x8f0] sm:$0xff] }
  0xe9   :  { %5499 = vmatpush.bf16.msrb.mxu3 %v9066_v20  ;;  %v10372_v46 = vadd.f32 %v5227_v45, %v5214_v44  ;;  %v9073_v20 = vld [vmem:[%s11779_s1 + $0x828] sm:$0xff] }
  0xea   :  { %5458 = vmatpush.bf16.msrb.mxu0 %v9041_v21  ;;  %v9081_v21 = vld [vmem:[%s11779_s1 + $0x868] sm:$0xff] }
  0xeb   :  { %5472 = vmatpush.bf16.msrb.mxu1 %v9049_v23 }
  0xec   :  { %5486 = vmatpush.bf16.msrb.mxu2 %v9057_v25  ;;  %v9089_v25 = vld [vmem:[%s11779_s1 + $0x8a8] sm:$0xff] }
  0xed   :  { %5500 = vmatpush.bf16.msrb.mxu3 %v9065_v26  ;;  %v9097_v26 = vld [vmem:[%s11779_s1 + $0x8e8] sm:$0xff] }
  0xee   :  { %5459 = vmatpush.bf16.msrb.mxu0 %v9040_v31  ;;  %v10468_v23 = vpop.f32.mrf.mxu2 }
  0xef   :  { %5473 = vmatpush.bf16.msrb.mxu1 %v9048_v33  ;;  %v10476_v29 = vpop.f32.mrf.mxu3  ;;  %v9072_v33 = vld [vmem:[%s11779_s1 + $0x820] sm:$0xff] }
  0xf0   :  { %5487 = vmatpush.bf16.msrb.mxu2 %v9056_v35 }
  0xf1   :  { %5501 = vmatpush.bf16.msrb.mxu3 %v9064_v36  ;;  %v9088_v36 = vld [vmem:[%s11779_s1 + $0x8a0] sm:$0xff] }
  0xf2   :  { %5460 = vmatpush.bf16.msrb.mxu0 %v9039_v39 }
  0xf3   :  { %5474 = vmatpush.bf16.msrb.mxu1 %v9047_v40  ;;  %v9071_v40 = vld [vmem:[%s11779_s1 + $0x818] sm:$0xff] }
  0xf4   :  { %5488 = vmatpush.bf16.msrb.mxu2 %v9055_v41  ;;  %v9079_v41 = vld [vmem:[%s11779_s1 + $0x858] sm:$0xff] }
  0xf5   :  { %5502 = vmatpush.bf16.msrb.mxu3 %v9063_v42  ;;  %v9087_v42 = vld [vmem:[%s11779_s1 + $0x898] sm:$0xff] }
  0xf6   :  { %5461 = vmatpush.bf16.msrb.mxu0 %v9038_v47 }
  0xf7   :  { %5475 = vmatpush.bf16.msrb.mxu1 %v9046_v48  ;;  %v9070_v48 = vld [vmem:[%s11779_s1 + $0x810] sm:$0xff] }
  0xf8   :  { %5489 = vmatpush.bf16.msrb.mxu2 %v9054_v49  ;;  %v9078_v49 = vld [vmem:[%s11779_s1 + $0x850] sm:$0xff] }
  0xf9   :  { %5503 = vmatpush.bf16.msrb.mxu3 %v9062_v50  ;;  %v9086_v50 = vld [vmem:[%s11779_s1 + $0x890] sm:$0xff] }
  0xfa   :  { %5462 = vmatpush.bf16.msrb.mxu0 %v9037_v51  ;;  %v9094_v51 = vld [vmem:[%s11779_s1 + $0x8d0] sm:$0xff] }
  0xfb   :  { %5476 = vmatpush.bf16.msrb.mxu1 %v9045_v52  ;;  %v9069_v52 = vld [vmem:[%s11779_s1 + $0x808] sm:$0xff] }
  0xfc   :  { %5490 = vmatpush.bf16.msrb.mxu2 %v9053_v53  ;;  %v9077_v53 = vld [vmem:[%s11779_s1 + $0x848] sm:$0xff] }
  0xfd   :  { %5504 = vmatpush.bf16.msrb.mxu3 %v9061_v54  ;;  %v9085_v54 = vld [vmem:[%s11779_s1 + $0x888] sm:$0xff] }
  0xfe   :  { %5463 = vmatpush.bf16.msrb.mxu0 %v9036_v55  ;;  %v5241_v30 = vpop.f32.mrf.mxu0  ;;  %v9093_v55 = vld [vmem:[%s11779_s1 + $0x8c8] sm:$0xff] }
  0xff   :  { %5477 = vmatpush.bf16.msrb.mxu1 %v9044_v56  ;;  %v5242_v31 = vadd.f32 %v5241_v30, %v10372_v46  ;;  %v5255_v35 = vpop.f32.mrf.mxu1  ;;  %v9068_v56 = vld [vmem:[%s11779_s1 + $0x800] sm:$0xff]  ;;  %v9113_v30 = vld [vmem:[%s11779_s1 + $0x968] sm:$0xff] }
 0x100   :  { %5491 = vmatpush.bf16.msrb.mxu2 %v9052_v57  ;;  %v9076_v57 = vld [vmem:[%s11779_s1 + $0x840] sm:$0xff] }
 0x101   :  { %5505 = vmatpush.bf16.msrb.mxu3 %v9060_v58  ;;  %5464 = vmatmul.bf16.vlgmr.msrb.gmra.mxu0 %v6263_v7  ;;  %v5256_v39 = vadd.f32 %v5255_v35, %v5242_v31  ;;  %v9084_v58 = vld [vmem:[%s11779_s1 + $0x880] sm:$0xff]  ;;  %v9131_v7 = vld [vmem:[%s11779_s1 + $0x9f8] sm:$0xff] }
 0x102   :  { %5512 = vmatpush.bf16.msra.mxu0 %v9075_v59  ;;  %5478 = vmatmul.bf16.vlgmr.msrb.gmra.mxu1 %v6267_v10  ;;  %v9092_v59 = vld [vmem:[%s11779_s1 + $0x8c0] sm:$0xff]  ;;  %v6287_v10 = vor.u32 %v8793_v1, %v6286_v0  ;;  %v9147_v1 = vld [vmem:[%s11779_s1 + $0xa78] sm:$0xff] }
 0x103   :  { %5526 = vmatpush.bf16.msra.mxu1 %v9083_v60  ;;  %5492 = vmatmul.bf16.vlgmr.msrb.gmra.mxu2 %v6271_v8  ;;  %v9107_v60 = vld [vmem:[%s11779_s1 + $0x938] sm:$0xff]  ;;  %v6279_v8 = vor.u32 %v8792_v63, %v6278_v62  ;;  %v9108_v62 = vld [vmem:[%s11779_s1 + $0x940] sm:$0xff] }
 0x104   :  { %5540 = vmatpush.bf16.msra.mxu2 %v9091_v5  ;;  %5506 = vmatmul.bf16.vlgmr.msrb.gmra.mxu3 %v6275_v11  ;;  %v6288_v5 = vld [vmem:[%s11780_s0 + $0x1a8] sm:$0xf0]  ;;  %v9116_v63 = vld [vmem:[%s11779_s1 + $0x980] sm:$0xff] }
 0x105   :  { %5554 = vmatpush.bf16.msra.mxu3 %v9099_v6  ;;  %v9123_v6 = vld [vmem:[%s11779_s1 + $0x9b8] sm:$0xff]  ;;  %v9124_v0 = vld [vmem:[%s11779_s1 + $0x9c0] sm:$0xff] }
 0x106   :  { %5513 = vmatpush.bf16.msra.mxu0 %v9074_v14  ;;  %v5269_v44 = vpop.f32.mrf.mxu2  ;;  %v10577_v11 = vpop.f32.mrf.mxu0  ;;  %v6283_v14 = vor.u32 %v8756_v2, %v6280_v3  ;;  %v6294_v2 = vld [vmem:[%s11780_s0 + $0x90] sm:$0xf] }
 0x107   :  { %5527 = vmatpush.bf16.msra.mxu1 %v9082_v16  ;;  %v5270_v45 = vadd.f32 %v5269_v44, %v5256_v39  ;;  %v5283_v46 = vpop.f32.mrf.mxu3  ;;  %v6291_v16 = vor.u32 %v8757_v4, %v6288_v5  ;;  %v9104_v39 = vld [vmem:[%s11779_s1 + $0x920] sm:$0xff]  ;;  %v8794_v3 = vld [vmem:[%s11780_s0 + $0x1ac] sm:$0xf0]  ;;  %v6302_v4 = vld [vmem:[%s11780_s0 + $0x98] sm:$0xf] }
 0x108   :  { %5541 = vmatpush.bf16.msra.mxu2 %v9090_v18  ;;  %v5076_v18 = vadd.f32 %v10077_v38, %v10184_v17  ;;  %v9130_v38 = vld [vmem:[%s11779_s1 + $0x9f0] sm:$0xff]  ;;  %v8795_v5 = vld [vmem:[%s11780_s0 + $0x1b4] sm:$0xf0] }
 0x109   :  { %5555 = vmatpush.bf16.msra.mxu3 %v9098_v19  ;;  %v10503_v47 = vadd.f32 %v5283_v46, %v5270_v45  ;;  %v10581_v19 = vpop.f32.mrf.mxu1  ;;  %v9103_v45 = vld [vmem:[%s11779_s1 + $0x918] sm:$0xff] }
 0x10a   :  { %5514 = vmatpush.bf16.msra.mxu0 %v9073_v20  ;;  %v9106_v20 = vld [vmem:[%s11779_s1 + $0x930] sm:$0xff]  ;;  %v5090_v17 = vadd.f32 %v10186_v22, %v5076_v18  ;;  %v9129_v22 = vld [vmem:[%s11779_s1 + $0x9e8] sm:$0xff]  ;;  %v9111_v46 = vld [vmem:[%s11779_s1 + $0x958] sm:$0xff] }
 0x10b   :  { %5528 = vmatpush.bf16.msra.mxu1 %v9081_v21  ;;  %v9114_v21 = vld [vmem:[%s11779_s1 + $0x970] sm:$0xff] }
 0x10c   :  { %5542 = vmatpush.bf16.msra.mxu2 %v9089_v25  ;;  %v9122_v25 = vld [vmem:[%s11779_s1 + $0x9b0] sm:$0xff] }
 0x10d   :  { %5556 = vmatpush.bf16.msra.mxu3 %v9097_v26  ;;  %v9105_v26 = vld [vmem:[%s11779_s1 + $0x928] sm:$0xff] }
 0x10e   :  { %5515 = vmatpush.bf16.msra.mxu0 %v9072_v33  ;;  %v10602_v31 = vpop.f32.mrf.mxu2  ;;  %v9121_v33 = vld [vmem:[%s11779_s1 + $0x9a8] sm:$0xff] }
 0x10f   :  { %5529 = vmatpush.bf16.msra.mxu1 %v9080_v34  ;;  %v10610_v34 = vpop.f32.mrf.mxu3 }
 0x110   :  { %5543 = vmatpush.bf16.msra.mxu2 %v9088_v36  ;;  %v5104_v36 = vadd.f32 %v10200_v27, %v5090_v17  ;;  %v9128_v27 = vld [vmem:[%s11779_s1 + $0x9e0] sm:$0xff] }
 0x111   :  { %5557 = vmatpush.bf16.msra.mxu3 %v9096_v37 }
 0x112   :  { %5516 = vmatpush.bf16.msra.mxu0 %v9071_v40  ;;  %v9112_v40 = vld [vmem:[%s11779_s1 + $0x960] sm:$0xff]  ;;  %v5118_v44 = vadd.f32 %v10214_v32, %v5104_v36  ;;  %v9127_v32 = vld [vmem:[%s11779_s1 + $0x9d8] sm:$0xff] }
 0x113   :  { %5530 = vmatpush.bf16.msra.mxu1 %v9079_v41 }
 0x114   :  { %5544 = vmatpush.bf16.msra.mxu2 %v9087_v42  ;;  %v9120_v42 = vld [vmem:[%s11779_s1 + $0x9a0] sm:$0xff] }
 0x115   :  { %5558 = vmatpush.bf16.msra.mxu3 %v9095_v43 }
 0x116   :  { %5517 = vmatpush.bf16.msra.mxu0 %v9070_v48 }
 0x117   :  { %5531 = vmatpush.bf16.msra.mxu1 %v9078_v49 }
 0x118   :  { %5545 = vmatpush.bf16.msra.mxu2 %v9086_v50 }
 0x119   :  { %5559 = vmatpush.bf16.msra.mxu3 %v9094_v51  ;;  %v5132_v51 = vadd.f32 %v10315_v12, %v5118_v44  ;;  %v9126_v12 = vld [vmem:[%s11779_s1 + $0x9d0] sm:$0xff]  ;;  %v9136_v44 = vld [vmem:[%s11779_s1 + $0xa20] sm:$0xff] }
 0x11a   :  { %5518 = vmatpush.bf16.msra.mxu0 %v9069_v52 }
 0x11b   :  { %5532 = vmatpush.bf16.msra.mxu1 %v9077_v53  ;;  %v9102_v53 = vld [vmem:[%s11779_s1 + $0x910] sm:$0xff] }
 0x11c   :  { %5546 = vmatpush.bf16.msra.mxu2 %v9085_v54  ;;  %v9110_v54 = vld [vmem:[%s11779_s1 + $0x950] sm:$0xff] }
 0x11d   :  { %5560 = vmatpush.bf16.msra.mxu3 %v9093_v55  ;;  %v9118_v55 = vld [vmem:[%s11779_s1 + $0x990] sm:$0xff] }
 0x11e   :  { %5519 = vmatpush.bf16.msra.mxu0 %v9068_v56  ;;  %v5297_v35 = vpop.f32.mrf.mxu0  ;;  %v5146_v56 = vadd.f32 %v10317_v15, %v5132_v51  ;;  %v9125_v15 = vld [vmem:[%s11779_s1 + $0x9c8] sm:$0xff]  ;;  %v9151_v51 = vld [vmem:[%s11779_s1 + $0xa98] sm:$0xff] }
 0x11f   :  { %5533 = vmatpush.bf16.msra.mxu1 %v9076_v57  ;;  %v5298_v37 = vadd.f32 %v5297_v35, %v10503_v47  ;;  %v5311_v41 = vpop.f32.mrf.mxu1  ;;  %v9119_v47 = vld [vmem:[%s11779_s1 + $0x998] sm:$0xff]  ;;  %v9101_v57 = vld [vmem:[%s11779_s1 + $0x908] sm:$0xff] }
 0x120   :  { %5547 = vmatpush.bf16.msra.mxu2 %v9084_v58  ;;  %v9109_v58 = vld [vmem:[%s11779_s1 + $0x948] sm:$0xff] }
 0x121   :  { %5561 = vmatpush.bf16.msra.mxu3 %v9092_v59  ;;  %5520 = vmatmul.bf16.vlgmr.msra.gmra.mxu0 %v6279_v8  ;;  %v5312_v43 = vadd.f32 %v5311_v41, %v5298_v37  ;;  %v9117_v59 = vld [vmem:[%s11779_s1 + $0x988] sm:$0xff]  ;;  %v6296_v8 = vld [vmem:[%s11780_s0 + $0x1b0] sm:$0xf0] }
 0x122   :  { %5568 = vmatpush.bf16.msrb.mxu0 %v9107_v60  ;;  %5534 = vmatmul.bf16.vlgmr.msra.gmra.mxu1 %v6283_v14  ;;  %v5160_v60 = vadd.f32 %v10337_v24, %v5146_v56  ;;  %v9139_v24 = vld [vmem:[%s11779_s1 + $0xa38] sm:$0xff]  ;;  %v9137_v37 = vld [vmem:[%s11779_s1 + $0xa28] sm:$0xff] }
 0x123   :  { %5582 = vmatpush.bf16.msrb.mxu1 %v9115_v61  ;;  %5548 = vmatmul.bf16.vlgmr.msra.gmra.mxu2 %v6287_v10  ;;  %v9100_v61 = vld [vmem:[%s11779_s1 + $0x900] sm:$0xff]  ;;  %v8759_v10 = vld [vmem:[%s11780_s0 + $0x9c] sm:$0xf] }
 0x124   :  { %5596 = vmatpush.bf16.msrb.mxu2 %v9123_v6  ;;  %5562 = vmatmul.bf16.vlgmr.msra.gmra.mxu3 %v6291_v16  ;;  %v8758_v6 = vld [vmem:[%s11780_s0 + $0x94] sm:$0xf]  ;;  %v6304_v14 = vld [vmem:[%s11780_s0 + $0x1b8] sm:$0xf0] }
 0x125   :  { %5610 = vmatpush.bf16.msrb.mxu3 %v9131_v7  ;;  %v5174_v7 = vadd.f32 %v10345_v28, %v5160_v60  ;;  %v9155_v16 = vld [vmem:[%s11779_s1 + $0xab8] sm:$0xff]  ;;  %v6307_v17 = vor.u32 %v8759_v10, %v6304_v14  ;;  %v9141_v60 = vld [vmem:[%s11779_s1 + $0xa48] sm:$0xff]  ;;  %v6312_v14 = vld [vmem:[%s11780_s0 + $0x1c0] sm:$0xf0] }
 0x126   :  { %5569 = vmatpush.bf16.msrb.mxu0 %v9106_v20  ;;  %v5325_v48 = vpop.f32.mrf.mxu2  ;;  %v9163_v28 = vld [vmem:[%s11779_s1 + $0xaf8] sm:$0xff]  ;;  %v6295_v20 = vor.u32 %v8794_v3, %v6294_v2 }
 0x127   :  { %5583 = vmatpush.bf16.msrb.mxu1 %v9114_v21  ;;  %v5326_v49 = vadd.f32 %v5325_v48, %v5312_v43  ;;  %v5339_v50 = vpop.f32.mrf.mxu3  ;;  %v5188_v18 = vadd.f32 %v10446_v9, %v5174_v7  ;;  %v6303_v21 = vor.u32 %v8795_v5, %v6302_v4  ;;  %v9146_v9 = vld [vmem:[%s11779_s1 + $0xa70] sm:$0xff]  ;;  %v9171_v2 = vld [vmem:[%s11779_s1 + $0xb38] sm:$0xff]  ;;  %v6310_v4 = vld [vmem:[%s11780_s0 + $0xa0] sm:$0xf] }
 0x128   :  { %5597 = vmatpush.bf16.msrb.mxu2 %v9122_v25  ;;  %v10718_v25 = vpop.f32.mrf.mxu0  ;;  %v9179_v3 = vld [vmem:[%s11779_s1 + $0xb78] sm:$0xff]  ;;  %v8796_v5 = vld [vmem:[%s11780_s0 + $0x1bc] sm:$0xf0]  ;;  %v8797_v7 = vld [vmem:[%s11780_s0 + $0x1c4] sm:$0xf0] }
 0x129   :  { %5611 = vmatpush.bf16.msrb.mxu3 %v9130_v38  ;;  %v10640_v52 = vadd.f32 %v5339_v50, %v5326_v49  ;;  %v6299_v38 = vor.u32 %v8758_v6, %v6296_v8  ;;  %v5202_v35 = vadd.f32 %v10448_v13, %v5188_v18  ;;  %v9153_v13 = vld [vmem:[%s11779_s1 + $0xaa8] sm:$0xff]  ;;  %v9135_v49 = vld [vmem:[%s11779_s1 + $0xa18] sm:$0xff]  ;;  %v8760_v8 = vld [vmem:[%s11780_s0 + $0xa4] sm:$0xf] }
 0x12a   :  { %5570 = vmatpush.bf16.msrb.mxu0 %v9105_v26  ;;  %v10720_v26 = vpop.f32.mrf.mxu1  ;;  %v9143_v50 = vld [vmem:[%s11779_s1 + $0xa58] sm:$0xff]  ;;  %v6318_v6 = vld [vmem:[%s11780_s0 + $0xa8] sm:$0xf] }
 0x12b   :  { %5584 = vmatpush.bf16.msrb.mxu1 %v9113_v30  ;;  %v9138_v30 = vld [vmem:[%s11779_s1 + $0xa30] sm:$0xff]  ;;  %v5216_v36 = vadd.f32 %v10468_v23, %v5202_v35  ;;  %v9161_v23 = vld [vmem:[%s11779_s1 + $0xae8] sm:$0xff]  ;;  %v9187_v18 = vld [vmem:[%s11779_s1 + $0xbb8] sm:$0xff] }
 0x12c   :  { %5598 = vmatpush.bf16.msrb.mxu2 %v9121_v33  ;;  %v9154_v33 = vld [vmem:[%s11779_s1 + $0xab0] sm:$0xff] }
 0x12d   :  { %5612 = vmatpush.bf16.msrb.mxu3 %v9129_v22  ;;  %v9162_v22 = vld [vmem:[%s11779_s1 + $0xaf0] sm:$0xff] }
 0x12e   :  { %5571 = vmatpush.bf16.msrb.mxu0 %v9104_v39  ;;  %v9145_v39 = vld [vmem:[%s11779_s1 + $0xa68] sm:$0xff]  ;;  %v9186_v35 = vld [vmem:[%s11779_s1 + $0xbb0] sm:$0xff] }
 0x12f   :  { %5585 = vmatpush.bf16.msrb.mxu1 %v9112_v40  ;;  %v10742_v40 = vpop.f32.mrf.mxu2  ;;  %v10750_v41 = vpop.f32.mrf.mxu3 }
 0x130   :  { %5599 = vmatpush.bf16.msrb.mxu2 %v9120_v42 }
 0x131   :  { %5613 = vmatpush.bf16.msrb.mxu3 %v9128_v27  ;;  %v5230_v27 = vadd.f32 %v10476_v29, %v5216_v36  ;;  %v9160_v29 = vld [vmem:[%s11779_s1 + $0xae0] sm:$0xff]  ;;  %v9194_v36 = vld [vmem:[%s11779_s1 + $0xbf0] sm:$0xff] }
 0x132   :  { %5572 = vmatpush.bf16.msrb.mxu0 %v9103_v45  ;;  %v9144_v45 = vld [vmem:[%s11779_s1 + $0xa60] sm:$0xff] }
 0x133   :  { %5586 = vmatpush.bf16.msrb.mxu1 %v9111_v46 }
 0x134   :  { %5600 = vmatpush.bf16.msrb.mxu2 %v9119_v47  ;;  %v9152_v47 = vld [vmem:[%s11779_s1 + $0xaa0] sm:$0xff] }
 0x135   :  { %5614 = vmatpush.bf16.msrb.mxu3 %v9127_v32  ;;  %v5244_v32 = vadd.f32 %v10577_v11, %v5230_v27  ;;  %v9159_v11 = vld [vmem:[%s11779_s1 + $0xad8] sm:$0xff] }
 0x136   :  { %5573 = vmatpush.bf16.msrb.mxu0 %v9102_v53 }
 0x137   :  { %5587 = vmatpush.bf16.msrb.mxu1 %v9110_v54  ;;  %v5258_v53 = vadd.f32 %v10581_v19, %v5244_v32  ;;  %v9150_v19 = vld [vmem:[%s11779_s1 + $0xa90] sm:$0xff]  ;;  %v9184_v32 = vld [vmem:[%s11779_s1 + $0xba0] sm:$0xff] }
 0x138   :  { %5601 = vmatpush.bf16.msrb.mxu2 %v9118_v55 }
 0x139   :  { %5615 = vmatpush.bf16.msrb.mxu3 %v9126_v12  ;;  %v5272_v12 = vadd.f32 %v10602_v31, %v5258_v53  ;;  %v9158_v31 = vld [vmem:[%s11779_s1 + $0xad0] sm:$0xff]  ;;  %v9191_v53 = vld [vmem:[%s11779_s1 + $0xbd8] sm:$0xff] }
 0x13a   :  { %5574 = vmatpush.bf16.msrb.mxu0 %v9101_v57  ;;  %v9134_v57 = vld [vmem:[%s11779_s1 + $0xa10] sm:$0xff] }
 0x13b   :  { %5588 = vmatpush.bf16.msrb.mxu1 %v9109_v58  ;;  %v9142_v58 = vld [vmem:[%s11779_s1 + $0xa50] sm:$0xff] }
 0x13c   :  { %5602 = vmatpush.bf16.msrb.mxu2 %v9117_v59  ;;  %v5286_v59 = vadd.f32 %v10610_v34, %v5272_v12  ;;  %v9157_v34 = vld [vmem:[%s11779_s1 + $0xac8] sm:$0xff] }
 0x13d   :  { %5616 = vmatpush.bf16.msrb.mxu3 %v9125_v15  ;;  %v9133_v15 = vld [vmem:[%s11779_s1 + $0xa08] sm:$0xff] }
 0x13e   :  { %5575 = vmatpush.bf16.msrb.mxu0 %v9100_v61  ;;  %v5353_v42 = vpop.f32.mrf.mxu0  ;;  %v9149_v61 = vld [vmem:[%s11779_s1 + $0xa88] sm:$0xff] }
 0x13f   :  { %5589 = vmatpush.bf16.msrb.mxu1 %v9108_v62  ;;  %v5354_v43 = vadd.f32 %v5353_v42, %v10640_v52  ;;  %v5367_v46 = vpop.f32.mrf.mxu1  ;;  %v5300_v62 = vadd.f32 %v10718_v25, %v5286_v59  ;;  %v6311_v25 = vor.u32 %v8796_v5, %v6310_v4  ;;  %v9193_v42 = vld [vmem:[%s11779_s1 + $0xbe8] sm:$0xff]  ;;  %v9174_v59 = vld [vmem:[%s11779_s1 + $0xb50] sm:$0xff]  ;;  %v9164_v4 = vld [vmem:[%s11779_s1 + $0xb00] sm:$0xff] }
 0x140   :  { %5603 = vmatpush.bf16.msrb.mxu2 %v9116_v63  ;;  %v9132_v63 = vld [vmem:[%s11779_s1 + $0xa00] sm:$0xff] }
 0x141   :  { %5617 = vmatpush.bf16.msrb.mxu3 %v9124_v0  ;;  %5576 = vmatmul.bf16.vlgmr.msrb.gmra.mxu0 %v6295_v20  ;;  %v5368_v48 = vadd.f32 %v5367_v46, %v5354_v43  ;;  %v9140_v0 = vld [vmem:[%s11779_s1 + $0xa40] sm:$0xff]  ;;  %v5314_v10 = vadd.f32 %v10720_v26, %v5300_v62  ;;  %v9195_v20 = vld [vmem:[%s11779_s1 + $0xbf8] sm:$0xff]  ;;  %v6315_v26 = vor.u32 %v8760_v8, %v6312_v14  ;;  %v9165_v62 = vld [vmem:[%s11779_s1 + $0xb08] sm:$0xff] }
 0x142   :  { %5624 = vmatpush.bf16.msra.mxu0 %v9139_v24  ;;  %5590 = vmatmul.bf16.vlgmr.msrb.gmra.mxu1 %v6299_v38  ;;  %v9148_v24 = vld [vmem:[%s11779_s1 + $0xa80] sm:$0xff]  ;;  %v6319_v38 = vor.u32 %v8797_v7, %v6318_v6  ;;  %v9211_v14 = vld [vmem:[%s11779_s1 + $0xc78] sm:$0xff] }
 0x143   :  { %5638 = vmatpush.bf16.msra.mxu1 %v9147_v1  ;;  %5604 = vmatmul.bf16.vlgmr.msrb.gmra.mxu2 %v6303_v21  ;;  %v9156_v1 = vld [vmem:[%s11779_s1 + $0xac0] sm:$0xff]  ;;  %v5328_v21 = vadd.f32 %v10742_v40, %v5314_v10  ;;  %v9169_v40 = vld [vmem:[%s11779_s1 + $0xb28] sm:$0xff]  ;;  %v9203_v10 = vld [vmem:[%s11779_s1 + $0xc38] sm:$0xff] }
 0x144   :  { %5652 = vmatpush.bf16.msra.mxu2 %v9155_v16  ;;  %5618 = vmatmul.bf16.vlgmr.msrb.gmra.mxu3 %v6307_v17  ;;  %v8761_v16 = vld [vmem:[%s11780_s0 + $0xac] sm:$0xf]  ;;  %v9168_v46 = vld [vmem:[%s11779_s1 + $0xb20] sm:$0xff] }
 0x145   :  { %5666 = vmatpush.bf16.msra.mxu3 %v9163_v28  ;;  %v6320_v28 = vld [vmem:[%s11780_s0 + $0x1c8] sm:$0xf0]  ;;  %v9172_v5 = vld [vmem:[%s11779_s1 + $0xb40] sm:$0xff] }
 0x146   :  { %5625 = vmatpush.bf16.msra.mxu0 %v9138_v30  ;;  %v5381_v52 = vpop.f32.mrf.mxu2  ;;  %v5355_v17 = vpop.f32.mrf.mxu0  ;;  %v6323_v30 = vor.u32 %v8761_v16, %v6320_v28  ;;  %v9180_v6 = vld [vmem:[%s11779_s1 + $0xb80] sm:$0xff]  ;;  %v6326_v16 = vld [vmem:[%s11780_s0 + $0xb0] sm:$0xf] }
 0x147   :  { %5639 = vmatpush.bf16.msra.mxu1 %v9146_v9  ;;  %v5382_v54 = vadd.f32 %v5381_v52, %v5368_v48  ;;  %v5395_v55 = vpop.f32.mrf.mxu3  ;;  %v5369_v9 = vpop.f32.mrf.mxu1  ;;  %v9192_v48 = vld [vmem:[%s11779_s1 + $0xbe0] sm:$0xff]  ;;  %v9183_v52 = vld [vmem:[%s11779_s1 + $0xb98] sm:$0xff]  ;;  %v8798_v28 = vld [vmem:[%s11780_s0 + $0x1cc] sm:$0xf0] }
 0x148   :  { %5653 = vmatpush.bf16.msra.mxu2 %v9154_v33  ;;  %v9170_v33 = vld [vmem:[%s11779_s1 + $0xb30] sm:$0xff]  ;;  %v9188_v7 = vld [vmem:[%s11779_s1 + $0xbc0] sm:$0xff] }
 0x149   :  { %5667 = vmatpush.bf16.msra.mxu3 %v9162_v22  ;;  %v10781_v56 = vadd.f32 %v5395_v55, %v5382_v54  ;;  %v9178_v22 = vld [vmem:[%s11779_s1 + $0xb70] sm:$0xff] }
 0x14a   :  { %5626 = vmatpush.bf16.msra.mxu0 %v9137_v37  ;;  %v5342_v37 = vadd.f32 %v10750_v41, %v5328_v21  ;;  %v9185_v41 = vld [vmem:[%s11779_s1 + $0xba8] sm:$0xff]  ;;  %v8762_v21 = vld [vmem:[%s11780_s0 + $0xb4] sm:$0xf] }
 0x14b   :  { %5640 = vmatpush.bf16.msra.mxu1 %v9145_v39 }
 0x14c   :  { %5654 = vmatpush.bf16.msra.mxu2 %v9153_v13  ;;  %v5356_v39 = vadd.f32 %v5355_v17, %v5342_v37  ;;  %v9177_v13 = vld [vmem:[%s11779_s1 + $0xb68] sm:$0xff]  ;;  %v6336_v17 = vld [vmem:[%s11780_s0 + $0x1d8] sm:$0xf0]  ;;  %v9210_v37 = vld [vmem:[%s11779_s1 + $0xc70] sm:$0xff] }
 0x14d   :  { %5668 = vmatpush.bf16.msra.mxu3 %v9161_v23 }
 0x14e   :  { %5627 = vmatpush.bf16.msra.mxu0 %v9136_v44  ;;  %v5383_v23 = vpop.f32.mrf.mxu2  ;;  %v5370_v44 = vadd.f32 %v5369_v9, %v5356_v39  ;;  %v6327_v9 = vor.u32 %v8798_v28, %v6326_v16  ;;  %v9218_v39 = vld [vmem:[%s11779_s1 + $0xcb0] sm:$0xff]  ;;  %v8764_v16 = vld [vmem:[%s11780_s0 + $0xc4] sm:$0xf] }
 0x14f   :  { %5641 = vmatpush.bf16.msra.mxu1 %v9144_v45  ;;  %v5397_v27 = vpop.f32.mrf.mxu3  ;;  %v6344_v28 = vld [vmem:[%s11780_s0 + $0x1e0] sm:$0xf0] }
 0x150   :  { %5655 = vmatpush.bf16.msra.mxu2 %v9152_v47  ;;  %v9176_v47 = vld [vmem:[%s11779_s1 + $0xb60] sm:$0xff] }
 0x151   :  { %5669 = vmatpush.bf16.msra.mxu3 %v9160_v29 }
 0x152   :  { %5628 = vmatpush.bf16.msra.mxu0 %v9135_v49  ;;  %v5384_v49 = vadd.f32 %v5383_v23, %v5370_v44  ;;  %v9209_v23 = vld [vmem:[%s11779_s1 + $0xc68] sm:$0xff]  ;;  %v9200_v44 = vld [vmem:[%s11779_s1 + $0xc20] sm:$0xff] }
 0x153   :  { %5642 = vmatpush.bf16.msra.mxu1 %v9143_v50 }
 0x154   :  { %5656 = vmatpush.bf16.msra.mxu2 %v9151_v51  ;;  %v9167_v51 = vld [vmem:[%s11779_s1 + $0xb18] sm:$0xff]  ;;  %v5398_v55 = vadd.f32 %v5397_v27, %v5384_v49 }
 0x155   :  { %5670 = vmatpush.bf16.msra.mxu3 %v9159_v11  ;;  %v9175_v11 = vld [vmem:[%s11779_s1 + $0xb58] sm:$0xff] }
 0x156   :  { %5629 = vmatpush.bf16.msra.mxu0 %v9134_v57  ;;  %v9207_v49 = vld [vmem:[%s11779_s1 + $0xc58] sm:$0xff] }
 0x157   :  { %5643 = vmatpush.bf16.msra.mxu1 %v9142_v58 }
 0x158   :  { %5657 = vmatpush.bf16.msra.mxu2 %v9150_v19 }
 0x159   :  { %5671 = vmatpush.bf16.msra.mxu3 %v9158_v31  ;;  %v9166_v31 = vld [vmem:[%s11779_s1 + $0xb10] sm:$0xff] }
 0x15a   :  { %5630 = vmatpush.bf16.msra.mxu0 %v9133_v15 }
 0x15b   :  { %5644 = vmatpush.bf16.msra.mxu1 %v9141_v60  ;;  %v9182_v60 = vld [vmem:[%s11779_s1 + $0xb90] sm:$0xff] }
 0x15c   :  { %5658 = vmatpush.bf16.msra.mxu2 %v9149_v61  ;;  %v9190_v61 = vld [vmem:[%s11779_s1 + $0xbd0] sm:$0xff] }
 0x15d   :  { %5672 = vmatpush.bf16.msra.mxu3 %v9157_v34 }
 0x15e   :  { %5631 = vmatpush.bf16.msra.mxu0 %v9132_v63  ;;  %v5409_v43 = vpop.f32.mrf.mxu0  ;;  %v9173_v63 = vld [vmem:[%s11779_s1 + $0xb48] sm:$0xff] }
 0x15f   :  { %5645 = vmatpush.bf16.msra.mxu1 %v9140_v0  ;;  %v5410_v45 = vadd.f32 %v5409_v43, %v10781_v56  ;;  %v5423_v29 = vpop.f32.mrf.mxu1  ;;  %v9181_v0 = vld [vmem:[%s11779_s1 + $0xb88] sm:$0xff] }
 0x160   :  { %5659 = vmatpush.bf16.msra.mxu2 %v9148_v24  ;;  %v9189_v24 = vld [vmem:[%s11779_s1 + $0xbc8] sm:$0xff] }
 0x161   :  { %5673 = vmatpush.bf16.msra.mxu3 %v9156_v1  ;;  %5632 = vmatmul.bf16.vlgmr.msra.gmra.mxu0 %v6311_v25  ;;  %v5424_v50 = vadd.f32 %v5423_v29, %v5410_v45  ;;  %v6328_v25 = vld [vmem:[%s11780_s0 + $0x1d0] sm:$0xf0]  ;;  %v9208_v45 = vld [vmem:[%s11779_s1 + $0xc60] sm:$0xff] }
 0x162   :  { %5680 = vmatpush.bf16.msrb.mxu0 %v9171_v2  ;;  %5646 = vmatmul.bf16.vlgmr.msra.gmra.mxu1 %v6315_v26  ;;  %v9219_v26 = vld [vmem:[%s11779_s1 + $0xcb8] sm:$0xff]  ;;  %v9224_v29 = vld [vmem:[%s11779_s1 + $0xce0] sm:$0xff] }
 0x163   :  { %5694 = vmatpush.bf16.msrb.mxu1 %v9179_v3  ;;  %5660 = vmatmul.bf16.vlgmr.msra.gmra.mxu2 %v6319_v38  ;;  %v8763_v38 = vld [vmem:[%s11780_s0 + $0xbc] sm:$0xf] }
 0x164   :  { %5708 = vmatpush.bf16.msrb.mxu2 %v9187_v18  ;;  %5674 = vmatmul.bf16.vlgmr.msra.gmra.mxu3 %v6323_v30  ;;  %v6334_v18 = vld [vmem:[%s11780_s0 + $0xb8] sm:$0xf] }
 0x165   :  { %5722 = vmatpush.bf16.msrb.mxu3 %v9195_v20  ;;  %v8799_v20 = vld [vmem:[%s11780_s0 + $0x1d4] sm:$0xf0] }
 0x166   :  { %5681 = vmatpush.bf16.msrb.mxu0 %v9170_v33  ;;  %v5437_v54 = vpop.f32.mrf.mxu2  ;;  %v5411_v57 = vpop.f32.mrf.mxu0  ;;  %v9227_v30 = vld [vmem:[%s11779_s1 + $0xcf8] sm:$0xff]  ;;  %v6335_v33 = vor.u32 %v8799_v20, %v6334_v18  ;;  %v8765_v18 = vld [vmem:[%s11780_s0 + $0xcc] sm:$0xf] }
 0x167   :  { %5695 = vmatpush.bf16.msrb.mxu1 %v9178_v22  ;;  %v5438_v12 = vadd.f32 %v5437_v54, %v5424_v50  ;;  %v5451_v56 = vpop.f32.mrf.mxu3  ;;  %v5412_v58 = vadd.f32 %v5411_v57, %v5398_v55  ;;  %v5425_v15 = vpop.f32.mrf.mxu1  ;;  %v6331_v22 = vor.u32 %v8762_v21, %v6328_v25  ;;  %v9215_v50 = vld [vmem:[%s11779_s1 + $0xc98] sm:$0xff]  ;;  %v9206_v57 = vld [vmem:[%s11779_s1 + $0xc50] sm:$0xff]  ;;  %v6352_v20 = vld [vmem:[%s11780_s0 + $0x1e8] sm:$0xf0] }
 0x168   :  { %5709 = vmatpush.bf16.msrb.mxu2 %v9186_v35  ;;  %v6339_v35 = vor.u32 %v8763_v38, %v6336_v17  ;;  %v9251_v21 = vld [vmem:[%s11779_s1 + $0xdb8] sm:$0xff] }
 0x169   :  { %5723 = vmatpush.bf16.msrb.mxu3 %v9194_v36  ;;  %v10909_v19 = vadd.f32 %v5451_v56, %v5438_v12  ;;  %v5426_v34 = vadd.f32 %v5425_v15, %v5412_v58  ;;  %v9202_v36 = vld [vmem:[%s11779_s1 + $0xc30] sm:$0xff]  ;;  %v9197_v15 = vld [vmem:[%s11779_s1 + $0xc08] sm:$0xff]  ;;  %v9259_v25 = vld [vmem:[%s11779_s1 + $0xdf8] sm:$0xff] }
 0x16a   :  { %5682 = vmatpush.bf16.msrb.mxu0 %v9169_v40  ;;  %v9226_v40 = vld [vmem:[%s11779_s1 + $0xcf0] sm:$0xff] }
 0x16b   :  { %5696 = vmatpush.bf16.msrb.mxu1 %v9177_v13  ;;  %v9201_v13 = vld [vmem:[%s11779_s1 + $0xc28] sm:$0xff]  ;;  %v9198_v56 = vld [vmem:[%s11779_s1 + $0xc10] sm:$0xff] }
 0x16c   :  { %5710 = vmatpush.bf16.msrb.mxu2 %v9185_v41  ;;  %v9217_v41 = vld [vmem:[%s11779_s1 + $0xca8] sm:$0xff] }
 0x16d   :  { %5724 = vmatpush.bf16.msrb.mxu3 %v9193_v42  ;;  %v9225_v42 = vld [vmem:[%s11779_s1 + $0xce8] sm:$0xff] }
 0x16e   :  { %5683 = vmatpush.bf16.msrb.mxu0 %v9168_v46  ;;  %v5439_v1 = vpop.f32.mrf.mxu2 }
 0x16f   :  { %5697 = vmatpush.bf16.msrb.mxu1 %v9176_v47  ;;  %v5440_v2 = vadd.f32 %v5439_v1, %v5426_v34  ;;  %v5453_v3 = vpop.f32.mrf.mxu3  ;;  %v9216_v47 = vld [vmem:[%s11779_s1 + $0xca0] sm:$0xff]  ;;  %v9221_v34 = vld [vmem:[%s11779_s1 + $0xcc8] sm:$0xff] }
 0x170   :  { %5711 = vmatpush.bf16.msrb.mxu2 %v9184_v32  ;;  %v9204_v1 = vld [vmem:[%s11779_s1 + $0xc40] sm:$0xff] }
 0x171   :  { %5725 = vmatpush.bf16.msrb.mxu3 %v9192_v48  ;;  %v10947_v8 = vadd.f32 %v5453_v3, %v5440_v2  ;;  %v9199_v48 = vld [vmem:[%s11779_s1 + $0xc18] sm:$0xff]  ;;  %v9212_v2 = vld [vmem:[%s11779_s1 + $0xc80] sm:$0xff] }
 0x172   :  { %5684 = vmatpush.bf16.msrb.mxu0 %v9167_v51  ;;  %v9223_v51 = vld [vmem:[%s11779_s1 + $0xcd8] sm:$0xff]  ;;  %v9220_v3 = vld [vmem:[%s11779_s1 + $0xcc0] sm:$0xff] }
 0x173   :  { %5698 = vmatpush.bf16.msrb.mxu1 %v9175_v11 }
 0x174   :  { %5712 = vmatpush.bf16.msrb.mxu2 %v9183_v52 }
 0x175   :  { %5726 = vmatpush.bf16.msrb.mxu3 %v9191_v53 }
 0x176   :  { %5685 = vmatpush.bf16.msrb.mxu0 %v9166_v31  ;;  %v9222_v31 = vld [vmem:[%s11779_s1 + $0xcd0] sm:$0xff] }
 0x177   :  { %5699 = vmatpush.bf16.msrb.mxu1 %v9174_v59 }
 0x178   :  { %5713 = vmatpush.bf16.msrb.mxu2 %v9182_v60  ;;  %v9205_v60 = vld [vmem:[%s11779_s1 + $0xc48] sm:$0xff] }
 0x179   :  { %5727 = vmatpush.bf16.msrb.mxu3 %v9190_v61  ;;  %v9213_v61 = vld [vmem:[%s11779_s1 + $0xc88] sm:$0xff] }
 0x17a   :  { %5686 = vmatpush.bf16.msrb.mxu0 %v9165_v62 }
 0x17b   :  { %5700 = vmatpush.bf16.msrb.mxu1 %v9173_v63 }
 0x17c   :  { %5714 = vmatpush.bf16.msrb.mxu2 %v9181_v0 }
 0x17d   :  { %5728 = vmatpush.bf16.msrb.mxu3 %v9189_v24  ;;  %v9196_v24 = vld [vmem:[%s11779_s1 + $0xc00] sm:$0xff] }
 0x17e   :  { %5687 = vmatpush.bf16.msrb.mxu0 %v9164_v4  ;;  %v5465_v27 = vpop.f32.mrf.mxu0 }
 0x17f   :  { %5701 = vmatpush.bf16.msrb.mxu1 %v9172_v5  ;;  %v5466_v43 = vadd.f32 %v5465_v27, %v10909_v19  ;;  %v5479_v46 = vpop.f32.mrf.mxu1  ;;  %v9214_v19 = vld [vmem:[%s11779_s1 + $0xc90] sm:$0xff]  ;;  %v9235_v5 = vld [vmem:[%s11779_s1 + $0xd38] sm:$0xff] }
 0x180   :  { %5715 = vmatpush.bf16.msrb.mxu2 %v9180_v6  ;;  %v9243_v6 = vld [vmem:[%s11779_s1 + $0xd78] sm:$0xff] }
 0x181   :  { %5729 = vmatpush.bf16.msrb.mxu3 %v9188_v7  ;;  %5688 = vmatmul.bf16.vlgmr.msrb.gmra.mxu0 %v6327_v9  ;;  %v5480_v32 = vadd.f32 %v5479_v46, %v5466_v43  ;;  %v6342_v7 = vld [vmem:[%s11780_s0 + $0xc0] sm:$0xf]  ;;  %v9234_v9 = vld [vmem:[%s11779_s1 + $0xd30] sm:$0xff]  ;;  %v9231_v46 = vld [vmem:[%s11779_s1 + $0xd18] sm:$0xff] }
 0x182   :  { %5736 = vmatpush.bf16.msra.mxu0 %v9203_v10  ;;  %5702 = vmatmul.bf16.vlgmr.msrb.gmra.mxu1 %v6331_v22  ;;  %v6350_v10 = vld [vmem:[%s11780_s0 + $0xc8] sm:$0xf]  ;;  %v9250_v22 = vld [vmem:[%s11779_s1 + $0xdb0] sm:$0xff]  ;;  %v9248_v43 = vld [vmem:[%s11779_s1 + $0xda0] sm:$0xff] }
 0x183   :  { %5750 = vmatpush.bf16.msra.mxu1 %v9211_v14  ;;  %5716 = vmatmul.bf16.vlgmr.msrb.gmra.mxu2 %v6335_v33  ;;  %v8801_v14 = vld [vmem:[%s11780_s0 + $0x1e4] sm:$0xf0]  ;;  %v9242_v33 = vld [vmem:[%s11779_s1 + $0xd70] sm:$0xff] }
 0x184   :  { %5764 = vmatpush.bf16.msra.mxu2 %v9219_v26  ;;  %5730 = vmatmul.bf16.vlgmr.msrb.gmra.mxu3 %v6339_v35  ;;  %v6351_v17 = vor.u32 %v8801_v14, %v6350_v10  ;;  %v6347_v26 = vor.u32 %v8764_v16, %v6344_v28  ;;  %v9258_v35 = vld [vmem:[%s11779_s1 + $0xdf0] sm:$0xff]  ;;  %v8767_v10 = vld [vmem:[%s11780_s0 + $0xdc] sm:$0xf] }
 0x185   :  { %5778 = vmatpush.bf16.msra.mxu3 %v9227_v30  ;;  %v6355_v30 = vor.u32 %v8765_v18, %v6352_v20  ;;  %v6368_v14 = vld [vmem:[%s11780_s0 + $0x1f8] sm:$0xf0] }
 0x186   :  { %5737 = vmatpush.bf16.msra.mxu0 %v9202_v36  ;;  %v5493_v11 = vpop.f32.mrf.mxu2  ;;  %v5467_v54 = vpop.f32.mrf.mxu0  ;;  %v9233_v36 = vld [vmem:[%s11779_s1 + $0xd28] sm:$0xff]  ;;  %v9283_v16 = vld [vmem:[%s11779_s1 + $0xeb8] sm:$0xff] }
 0x187   :  { %5751 = vmatpush.bf16.msra.mxu1 %v9210_v37  ;;  %v5494_v52 = vadd.f32 %v5493_v11, %v5480_v32  ;;  %v5507_v53 = vpop.f32.mrf.mxu3  ;;  %v5468_v55 = vadd.f32 %v5467_v54, %v10947_v8  ;;  %v5481_v58 = vpop.f32.mrf.mxu1  ;;  %v8800_v8 = vld [vmem:[%s11780_s0 + $0x1dc] sm:$0xf0]  ;;  %v9241_v37 = vld [vmem:[%s11779_s1 + $0xd68] sm:$0xff]  ;;  %v9255_v32 = vld [vmem:[%s11779_s1 + $0xdd8] sm:$0xff] }
 0x188   :  { %5765 = vmatpush.bf16.msra.mxu2 %v9218_v39  ;;  %v6343_v38 = vor.u32 %v8800_v8, %v6342_v7  ;;  %v9249_v39 = vld [vmem:[%s11779_s1 + $0xda8] sm:$0xff]  ;;  %v9238_v54 = vld [vmem:[%s11779_s1 + $0xd50] sm:$0xff]  ;;  %v9291_v28 = vld [vmem:[%s11779_s1 + $0xef8] sm:$0xff] }
 0x189   :  { %5779 = vmatpush.bf16.msra.mxu3 %v9226_v40  ;;  %v11035_v12 = vadd.f32 %v5507_v53, %v5494_v52  ;;  %v5482_v59 = vadd.f32 %v5481_v58, %v5468_v55  ;;  %v9257_v40 = vld [vmem:[%s11779_s1 + $0xde8] sm:$0xff]  ;;  %v9230_v53 = vld [vmem:[%s11779_s1 + $0xd10] sm:$0xff] }
 0x18a   :  { %5738 = vmatpush.bf16.msra.mxu0 %v9201_v13  ;;  %v9229_v58 = vld [vmem:[%s11779_s1 + $0xd08] sm:$0xff]  ;;  %v8766_v7 = vld [vmem:[%s11780_s0 + $0xd4] sm:$0xf] }
 0x18b   :  { %5752 = vmatpush.bf16.msra.mxu1 %v9209_v23  ;;  %v6360_v8 = vld [vmem:[%s11780_s0 + $0x1f0] sm:$0xf0] }
 0x18c   :  { %5766 = vmatpush.bf16.msra.mxu2 %v9217_v41  ;;  %v9232_v41 = vld [vmem:[%s11779_s1 + $0xd20] sm:$0xff] }
 0x18d   :  { %5780 = vmatpush.bf16.msra.mxu3 %v9225_v42  ;;  %v9240_v42 = vld [vmem:[%s11779_s1 + $0xd60] sm:$0xff] }
 0x18e   :  { %5739 = vmatpush.bf16.msra.mxu0 %v9200_v44  ;;  %v5495_v62 = vpop.f32.mrf.mxu2  ;;  %v9256_v44 = vld [vmem:[%s11779_s1 + $0xde0] sm:$0xff] }
 0x18f   :  { %5753 = vmatpush.bf16.msra.mxu1 %v9208_v45  ;;  %v5496_v63 = vadd.f32 %v5495_v62, %v5482_v59  ;;  %v5509_v0 = vpop.f32.mrf.mxu3  ;;  %v9253_v59 = vld [vmem:[%s11779_s1 + $0xdc8] sm:$0xff]  ;;  %v9236_v62 = vld [vmem:[%s11779_s1 + $0xd40] sm:$0xff] }
 0x190   :  { %5767 = vmatpush.bf16.msra.mxu2 %v9216_v47  ;;  %v9239_v47 = vld [vmem:[%s11779_s1 + $0xd58] sm:$0xff] }
 0x191   :  { %5781 = vmatpush.bf16.msra.mxu3 %v9224_v29  ;;  %v11073_v4 = vadd.f32 %v5509_v0, %v5496_v63  ;;  %v9247_v29 = vld [vmem:[%s11779_s1 + $0xd98] sm:$0xff]  ;;  %v9244_v63 = vld [vmem:[%s11779_s1 + $0xd80] sm:$0xff] }
 0x192   :  { %5740 = vmatpush.bf16.msra.mxu0 %v9199_v48  ;;  %v9252_v0 = vld [vmem:[%s11779_s1 + $0xdc0] sm:$0xff] }
 0x193   :  { %5754 = vmatpush.bf16.msra.mxu1 %v9207_v49 }
 0x194   :  { %5768 = vmatpush.bf16.msra.mxu2 %v9215_v50 }
 0x195   :  { %5782 = vmatpush.bf16.msra.mxu3 %v9223_v51 }
 0x196   :  { %5741 = vmatpush.bf16.msra.mxu0 %v9198_v56  ;;  %v9254_v56 = vld [vmem:[%s11779_s1 + $0xdd0] sm:$0xff] }
 0x197   :  { %5755 = vmatpush.bf16.msra.mxu1 %v9206_v57 }
 0x198   :  { %5769 = vmatpush.bf16.msra.mxu2 %v9214_v19  ;;  %v9237_v19 = vld [vmem:[%s11779_s1 + $0xd48] sm:$0xff] }
 0x199   :  { %5783 = vmatpush.bf16.msra.mxu3 %v9222_v31  ;;  %v9245_v31 = vld [vmem:[%s11779_s1 + $0xd88] sm:$0xff] }
 0x19a   :  { %5742 = vmatpush.bf16.msra.mxu0 %v9197_v15 }
 0x19b   :  { %5756 = vmatpush.bf16.msra.mxu1 %v9205_v60 }
 0x19c   :  { %5770 = vmatpush.bf16.msra.mxu2 %v9213_v61 }
 0x19d   :  { %5784 = vmatpush.bf16.msra.mxu3 %v9221_v34  ;;  %v9228_v34 = vld [vmem:[%s11779_s1 + $0xd00] sm:$0xff] }
 0x19e   :  { %5743 = vmatpush.bf16.msra.mxu0 %v9196_v24  ;;  %v5521_v13 = vpop.f32.mrf.mxu0 }
 0x19f   :  { %5757 = vmatpush.bf16.msra.mxu1 %v9204_v1  ;;  %v5522_v23 = vadd.f32 %v5521_v13, %v11035_v12  ;;  %v5535_v27 = vpop.f32.mrf.mxu1  ;;  %v9246_v12 = vld [vmem:[%s11779_s1 + $0xd90] sm:$0xff]  ;;  %v9267_v1 = vld [vmem:[%s11779_s1 + $0xe38] sm:$0xff] }
 0x1a0   :  { %5771 = vmatpush.bf16.msra.mxu2 %v9212_v2  ;;  %v9275_v2 = vld [vmem:[%s11779_s1 + $0xe78] sm:$0xff] }
 0x1a1   :  { %5785 = vmatpush.bf16.msra.mxu3 %v9220_v3  ;;  %5744 = vmatmul.bf16.vlgmr.msra.gmra.mxu0 %v6343_v38  ;;  %v5536_v45 = vadd.f32 %v5535_v27, %v5522_v23  ;;  %v6358_v3 = vld [vmem:[%s11780_s0 + $0xd0] sm:$0xf]  ;;  %v9280_v23 = vld [vmem:[%s11779_s1 + $0xea0] sm:$0xff]  ;;  %v9263_v27 = vld [vmem:[%s11779_s1 + $0xe18] sm:$0xff] }
 0x1a2   :  { %5792 = vmatpush.bf16.msrb.mxu0 %v9235_v5  ;;  %5758 = vmatmul.bf16.vlgmr.msra.gmra.mxu1 %v6347_v26  ;;  %v6366_v5 = vld [vmem:[%s11780_s0 + $0xd8] sm:$0xf]  ;;  %v9266_v38 = vld [vmem:[%s11779_s1 + $0xe30] sm:$0xff] }
 0x1a3   :  { %5806 = vmatpush.bf16.msrb.mxu1 %v9243_v6  ;;  %5772 = vmatmul.bf16.vlgmr.msra.gmra.mxu2 %v6351_v17  ;;  %v8803_v6 = vld [vmem:[%s11780_s0 + $0x1f4] sm:$0xf0]  ;;  %v9274_v17 = vld [vmem:[%s11779_s1 + $0xe70] sm:$0xff] }
 0x1a4   :  { %5820 = vmatpush.bf16.msrb.mxu2 %v9251_v21  ;;  %5786 = vmatmul.bf16.vlgmr.msra.gmra.mxu3 %v6355_v30  ;;  %v6367_v20 = vor.u32 %v8803_v6, %v6366_v5  ;;  %v6363_v21 = vor.u32 %v8766_v7, %v6360_v8  ;;  %v9282_v26 = vld [vmem:[%s11779_s1 + $0xeb0] sm:$0xff]  ;;  %v8769_v5 = vld [vmem:[%s11780_s0 + $0xec] sm:$0xf]  ;;  %v9315_v7 = vld [vmem:[%s11779_s1 + $0xfb8] sm:$0xff] }
 0x1a5   :  { %5834 = vmatpush.bf16.msrb.mxu3 %v9259_v25  ;;  %v6371_v25 = vor.u32 %v8767_v10, %v6368_v14  ;;  %v9290_v30 = vld [vmem:[%s11779_s1 + $0xef0] sm:$0xff]  ;;  %v6384_v6 = vld [vmem:[%s11780_s0 + $0x208] sm:$0xf0]  ;;  %v9323_v8 = vld [vmem:[%s11779_s1 + $0xff8] sm:$0xff] }
 0x1a6   :  { %5793 = vmatpush.bf16.msrb.mxu0 %v9234_v9  ;;  %v5549_v48 = vpop.f32.mrf.mxu2  ;;  %v5523_v51 = vpop.f32.mrf.mxu0  ;;  %v9265_v9 = vld [vmem:[%s11779_s1 + $0xe28] sm:$0xff] }
 0x1a7   :  { %5807 = vmatpush.bf16.msrb.mxu1 %v9242_v33  ;;  %v5550_v49 = vadd.f32 %v5549_v48, %v5536_v45  ;;  %v5563_v50 = vpop.f32.mrf.mxu3  ;;  %v5524_v11 = vadd.f32 %v5523_v51, %v11073_v4  ;;  %v5537_v55 = vpop.f32.mrf.mxu1  ;;  %v8802_v4 = vld [vmem:[%s11780_s0 + $0x1ec] sm:$0xf0]  ;;  %v9273_v33 = vld [vmem:[%s11779_s1 + $0xe68] sm:$0xff]  ;;  %v9287_v45 = vld [vmem:[%s11779_s1 + $0xed8] sm:$0xff] }
 0x1a8   :  { %5821 = vmatpush.bf16.msrb.mxu2 %v9250_v22  ;;  %v6359_v18 = vor.u32 %v8802_v4, %v6358_v3  ;;  %v9281_v22 = vld [vmem:[%s11779_s1 + $0xea8] sm:$0xff]  ;;  %v9270_v51 = vld [vmem:[%s11779_s1 + $0xe50] sm:$0xff]  ;;  %v8768_v3 = vld [vmem:[%s11780_s0 + $0xe4] sm:$0xf] }
 0x1a9   :  { %5835 = vmatpush.bf16.msrb.mxu3 %v9258_v35  ;;  %v11161_v52 = vadd.f32 %v5563_v50, %v5550_v49  ;;  %v5538_v57 = vadd.f32 %v5537_v55, %v5524_v11  ;;  %v9289_v35 = vld [vmem:[%s11779_s1 + $0xee8] sm:$0xff]  ;;  %v9262_v50 = vld [vmem:[%s11779_s1 + $0xe10] sm:$0xff]  ;;  %v6376_v4 = vld [vmem:[%s11780_s0 + $0x200] sm:$0xf0] }
 0x1aa   :  { %5794 = vmatpush.bf16.msrb.mxu0 %v9233_v36  ;;  %v9261_v55 = vld [vmem:[%s11779_s1 + $0xe08] sm:$0xff] }
 0x1ab   :  { %5808 = vmatpush.bf16.msrb.mxu1 %v9241_v37 }
 0x1ac   :  { %5822 = vmatpush.bf16.msrb.mxu2 %v9249_v39  ;;  %v9264_v39 = vld [vmem:[%s11779_s1 + $0xe20] sm:$0xff] }
 0x1ad   :  { %5836 = vmatpush.bf16.msrb.mxu3 %v9257_v40  ;;  %v9272_v40 = vld [vmem:[%s11779_s1 + $0xe60] sm:$0xff] }
 0x1ae   :  { %5795 = vmatpush.bf16.msrb.mxu0 %v9232_v41  ;;  %v5551_v15 = vpop.f32.mrf.mxu2  ;;  %v9288_v41 = vld [vmem:[%s11779_s1 + $0xee0] sm:$0xff] }
 0x1af   :  { %5809 = vmatpush.bf16.msrb.mxu1 %v9240_v42  ;;  %v5552_v60 = vadd.f32 %v5551_v15, %v5538_v57  ;;  %v5565_v61 = vpop.f32.mrf.mxu3  ;;  %v9285_v57 = vld [vmem:[%s11779_s1 + $0xec8] sm:$0xff]  ;;  %v9268_v15 = vld [vmem:[%s11779_s1 + $0xe40] sm:$0xff] }
 0x1b0   :  { %5823 = vmatpush.bf16.msrb.mxu2 %v9248_v43  ;;  %v9271_v43 = vld [vmem:[%s11779_s1 + $0xe58] sm:$0xff] }
 0x1b1   :  { %5837 = vmatpush.bf16.msrb.mxu3 %v9256_v44  ;;  %v11199_v24 = vadd.f32 %v5565_v61, %v5552_v60  ;;  %v9279_v44 = vld [vmem:[%s11779_s1 + $0xe98] sm:$0xff]  ;;  %v9276_v60 = vld [vmem:[%s11779_s1 + $0xe80] sm:$0xff] }
 0x1b2   :  { %5796 = vmatpush.bf16.msrb.mxu0 %v9231_v46  ;;  %v9284_v61 = vld [vmem:[%s11779_s1 + $0xec0] sm:$0xff] }
 0x1b3   :  { %5810 = vmatpush.bf16.msrb.mxu1 %v9239_v47 }
 0x1b4   :  { %5824 = vmatpush.bf16.msrb.mxu2 %v9247_v29 }
 0x1b5   :  { %5838 = vmatpush.bf16.msrb.mxu3 %v9255_v32 }
 0x1b6   :  { %5797 = vmatpush.bf16.msrb.mxu0 %v9230_v53  ;;  %v9286_v53 = vld [vmem:[%s11779_s1 + $0xed0] sm:$0xff] }
 0x1b7   :  { %5811 = vmatpush.bf16.msrb.mxu1 %v9238_v54 }
 0x1b8   :  { %5825 = vmatpush.bf16.msrb.mxu2 %v9246_v12  ;;  %v9269_v12 = vld [vmem:[%s11779_s1 + $0xe48] sm:$0xff] }
 0x1b9   :  { %5839 = vmatpush.bf16.msrb.mxu3 %v9254_v56  ;;  %v9277_v56 = vld [vmem:[%s11779_s1 + $0xe88] sm:$0xff] }
 0x1ba   :  { %5798 = vmatpush.bf16.msrb.mxu0 %v9229_v58 }
 0x1bb   :  { %5812 = vmatpush.bf16.msrb.mxu1 %v9237_v19 }
 0x1bc   :  { %5826 = vmatpush.bf16.msrb.mxu2 %v9245_v31 }
 0x1bd   :  { %5840 = vmatpush.bf16.msrb.mxu3 %v9253_v59  ;;  %v9260_v59 = vld [vmem:[%s11779_s1 + $0xe00] sm:$0xff] }
 0x1be   :  { %5799 = vmatpush.bf16.msrb.mxu0 %v9228_v34  ;;  %v5577_v36 = vpop.f32.mrf.mxu0 }
 0x1bf   :  { %5813 = vmatpush.bf16.msrb.mxu1 %v9236_v62  ;;  %v5578_v37 = vadd.f32 %v5577_v36, %v11161_v52  ;;  %v5591_v13 = vpop.f32.mrf.mxu1  ;;  %v9278_v52 = vld [vmem:[%s11779_s1 + $0xe90] sm:$0xff]  ;;  %v9299_v62 = vld [vmem:[%s11779_s1 + $0xf38] sm:$0xff] }
 0x1c0   :  { %5827 = vmatpush.bf16.msrb.mxu2 %v9244_v63  ;;  %v9307_v63 = vld [vmem:[%s11779_s1 + $0xf78] sm:$0xff] }
 0x1c1   :  { %5841 = vmatpush.bf16.msrb.mxu3 %v9252_v0  ;;  %5800 = vmatmul.bf16.vlgmr.msrb.gmra.mxu0 %v6359_v18  ;;  %v5592_v42 = vadd.f32 %v5591_v13, %v5578_v37  ;;  %v6374_v0 = vld [vmem:[%s11780_s0 + $0xe0] sm:$0xf]  ;;  %v9298_v18 = vld [vmem:[%s11779_s1 + $0xf30] sm:$0xff]  ;;  %v9295_v36 = vld [vmem:[%s11779_s1 + $0xf18] sm:$0xff] }
 0x1c2   :  { %5848 = vmatpush.bf16.msra.mxu0 %v9267_v1  ;;  %5814 = vmatmul.bf16.vlgmr.msrb.gmra.mxu1 %v6363_v21  ;;  %v6382_v1 = vld [vmem:[%s11780_s0 + $0xe8] sm:$0xf]  ;;  %v9314_v21 = vld [vmem:[%s11779_s1 + $0xfb0] sm:$0xff]  ;;  %v9303_v37 = vld [vmem:[%s11779_s1 + $0xf58] sm:$0xff] }
 0x1c3   :  { %5862 = vmatpush.bf16.msra.mxu1 %v9275_v2  ;;  %5828 = vmatmul.bf16.vlgmr.msrb.gmra.mxu2 %v6367_v20  ;;  %v8805_v2 = vld [vmem:[%s11780_s0 + $0x204] sm:$0xf0]  ;;  %v9306_v20 = vld [vmem:[%s11779_s1 + $0xf70] sm:$0xff] }
 0x1c4   :  { %5876 = vmatpush.bf16.msra.mxu2 %v9283_v16  ;;  %5842 = vmatmul.bf16.vlgmr.msrb.gmra.mxu3 %v6371_v25  ;;  %v6383_v14 = vor.u32 %v8805_v2, %v6382_v1  ;;  %v6379_v16 = vor.u32 %v8768_v3, %v6376_v4  ;;  %v9322_v25 = vld [vmem:[%s11779_s1 + $0xff0] sm:$0xff]  ;;  %v9345_v1 = vld [vmem:[%s11779_s1 + $0x10a8] sm:$0xff]  ;;  %v9328_v3 = vld [vmem:[%s11779_s1 + $0x1020] sm:$0xff] }
 0x1c5   :  { %5890 = vmatpush.bf16.msra.mxu3 %v9291_v28  ;;  %v6387_v28 = vor.u32 %v8769_v5, %v6384_v6  ;;  %v9294_v13 = vld [vmem:[%s11779_s1 + $0xf10] sm:$0xff]  ;;  %v9353_v2 = vld [vmem:[%s11779_s1 + $0x10e8] sm:$0xff]  ;;  %v9336_v4 = vld [vmem:[%s11779_s1 + $0x1060] sm:$0xff] }
 0x1c6   :  { %5849 = vmatpush.bf16.msra.mxu0 %v9266_v38  ;;  %v5605_v46 = vpop.f32.mrf.mxu2  ;;  %v5579_v32 = vpop.f32.mrf.mxu0  ;;  %v9297_v38 = vld [vmem:[%s11779_s1 + $0xf28] sm:$0xff]  ;;  %v9344_v5 = vld [vmem:[%s11779_s1 + $0x10a0] sm:$0xff] }
 0x1c7   :  { %5863 = vmatpush.bf16.msra.mxu1 %v9274_v17  ;;  %v5606_v47 = vadd.f32 %v5605_v46, %v5592_v42  ;;  %v5619_v29 = vpop.f32.mrf.mxu3  ;;  %v5580_v48 = vadd.f32 %v5579_v32, %v11199_v24  ;;  %v5593_v11 = vpop.f32.mrf.mxu1  ;;  %v8804_v24 = vld [vmem:[%s11780_s0 + $0x1fc] sm:$0xf0]  ;;  %v9305_v17 = vld [vmem:[%s11779_s1 + $0xf68] sm:$0xff]  ;;  %v9318_v42 = vld [vmem:[%s11779_s1 + $0xfd0] sm:$0xff] }
 0x1c8   :  { %5877 = vmatpush.bf16.msra.mxu2 %v9282_v26  ;;  %v6375_v10 = vor.u32 %v8804_v24, %v6374_v0  ;;  %v9313_v26 = vld [vmem:[%s11779_s1 + $0xfa8] sm:$0xff]  ;;  %v9292_v46 = vld [vmem:[%s11779_s1 + $0xf00] sm:$0xff] }
 0x1c9   :  { %5891 = vmatpush.bf16.msra.mxu3 %v9290_v30  ;;  %v11287_v49 = vadd.f32 %v5619_v29, %v5606_v47  ;;  %v5594_v54 = vadd.f32 %v5593_v11, %v5580_v48  ;;  %v9321_v30 = vld [vmem:[%s11779_s1 + $0xfe8] sm:$0xff]  ;;  %v9300_v47 = vld [vmem:[%s11779_s1 + $0xf40] sm:$0xff]  ;;  %v9331_v48 = vld [vmem:[%s11779_s1 + $0x1038] sm:$0xff] }
 0x1ca   :  { %5850 = vmatpush.bf16.msra.mxu0 %v9265_v9  ;;  %v9296_v9 = vld [vmem:[%s11779_s1 + $0xf20] sm:$0xff]  ;;  %v8806_v11 = vld [vmem:[%s11780_s0 + $0x20c] sm:$0xf0]  ;;  %v9329_v0 = vld [vmem:[%s11779_s1 + $0x1028] sm:$0xff] }
 0x1cb   :  { %5864 = vmatpush.bf16.msra.mxu1 %v9273_v33  ;;  %v9304_v33 = vld [vmem:[%s11779_s1 + $0xf60] sm:$0xff]  ;;  %v9337_v24 = vld [vmem:[%s11779_s1 + $0x1068] sm:$0xff] }
 0x1cc   :  { %5878 = vmatpush.bf16.msra.mxu2 %v9281_v22  ;;  %v9312_v22 = vld [vmem:[%s11779_s1 + $0xfa0] sm:$0xff] }
 0x1cd   :  { %5892 = vmatpush.bf16.msra.mxu3 %v9289_v35  ;;  %v9320_v35 = vld [vmem:[%s11779_s1 + $0xfe0] sm:$0xff] }
 0x1ce   :  { %5851 = vmatpush.bf16.msra.mxu0 %v9264_v39  ;;  %v5607_v58 = vpop.f32.mrf.mxu2  ;;  %v9311_v39 = vld [vmem:[%s11779_s1 + $0xf98] sm:$0xff]  ;;  %v9308_v29 = vld [vmem:[%s11779_s1 + $0xf80] sm:$0xff] }
 0x1cf   :  { %5865 = vmatpush.bf16.msra.mxu1 %v9272_v40  ;;  %v5608_v19 = vadd.f32 %v5607_v58, %v5594_v54  ;;  %v5621_v31 = vpop.f32.mrf.mxu3  ;;  %v9319_v40 = vld [vmem:[%s11779_s1 + $0xfd8] sm:$0xff]  ;;  %v9316_v32 = vld [vmem:[%s11779_s1 + $0xfc0] sm:$0xff]  ;;  %v8770_v54 = vld [vmem:[%s11780_s0 + $0xf4] sm:$0xf] }
 0x1d0   :  { %5879 = vmatpush.bf16.msra.mxu2 %v9280_v23  ;;  %v9302_v23 = vld [vmem:[%s11779_s1 + $0xf50] sm:$0xff]  ;;  %v9355_v58 = vld [vmem:[%s11779_s1 + $0x10f8] sm:$0xff]  ;;  %v9352_v6 = vld [vmem:[%s11779_s1 + $0x10e0] sm:$0xff] }
 0x1d1   :  { %5893 = vmatpush.bf16.msra.mxu3 %v9288_v41  ;;  %v11325_v34 = vadd.f32 %v5621_v31, %v5608_v19  ;;  %v9310_v41 = vld [vmem:[%s11779_s1 + $0xf90] sm:$0xff] }
 0x1d2   :  { %5852 = vmatpush.bf16.msra.mxu0 %v9263_v27  ;;  %v9293_v27 = vld [vmem:[%s11779_s1 + $0xf08] sm:$0xff] }
 0x1d3   :  { %5866 = vmatpush.bf16.msra.mxu1 %v9271_v43  ;;  %v9301_v43 = vld [vmem:[%s11779_s1 + $0xf48] sm:$0xff] }
 0x1d4   :  { %5880 = vmatpush.bf16.msra.mxu2 %v9279_v44  ;;  %v9309_v44 = vld [vmem:[%s11779_s1 + $0xf88] sm:$0xff] }
 0x1d5   :  { %5894 = vmatpush.bf16.msra.mxu3 %v9287_v45  ;;  %v9317_v45 = vld [vmem:[%s11779_s1 + $0xfc8] sm:$0xff] }
 0x1d6   :  { %5853 = vmatpush.bf16.msra.mxu0 %v9262_v50  ;;  %v9339_v50 = vld [vmem:[%s11779_s1 + $0x1078] sm:$0xff] }
 0x1d7   :  { %5867 = vmatpush.bf16.msra.mxu1 %v9270_v51  ;;  %v6390_v51 = vld [vmem:[%s11780_s0 + $0xf0] sm:$0xf] }
 0x1d8   :  { %5881 = vmatpush.bf16.msra.mxu2 %v9278_v52  ;;  %v6398_v52 = vld [vmem:[%s11780_s0 + $0xf8] sm:$0xf]  ;;  %v6391_v19 = vor.u32 %v8806_v11, %v6390_v51  ;;  %v9361_v51 = vld [vmem:[%s11779_s1 + $0x1128] sm:$0xff] }
 0x1d9   :  { %5895 = vmatpush.bf16.msra.mxu3 %v9286_v53  ;;  %v8807_v53 = vld [vmem:[%s11780_s0 + $0x214] sm:$0xf0]  ;;  %v9369_v11 = vld [vmem:[%s11779_s1 + $0x1168] sm:$0xff] }
 0x1da   :  { %5854 = vmatpush.bf16.msra.mxu0 %v9261_v55  ;;  %v6392_v55 = vld [vmem:[%s11780_s0 + $0x210] sm:$0xf0]  ;;  %v6399_v31 = vor.u32 %v8807_v53, %v6398_v52  ;;  %v9377_v52 = vld [vmem:[%s11779_s1 + $0x11a8] sm:$0xff] }
 0x1db   :  { %5868 = vmatpush.bf16.msra.mxu1 %v9269_v12  ;;  %v8771_v12 = vld [vmem:[%s11780_s0 + $0xfc] sm:$0xf]  ;;  %v9385_v53 = vld [vmem:[%s11779_s1 + $0x11e8] sm:$0xff] }
 0x1dc   :  { %5882 = vmatpush.bf16.msra.mxu2 %v9277_v56  ;;  %v6400_v56 = vld [vmem:[%s11780_s0 + $0x218] sm:$0xf0] }
 0x1dd   :  { %5896 = vmatpush.bf16.msra.mxu3 %v9285_v57  ;;  %v9347_v57 = vld [vmem:[%s11779_s1 + $0x10b8] sm:$0xff] }
 0x1de   :  { %5855 = vmatpush.bf16.msra.mxu0 %v9260_v59  ;;  %v6395_v59 = vor.u32 %v8770_v54, %v6392_v55  ;;  %v9360_v54 = vld [vmem:[%s11779_s1 + $0x1120] sm:$0xff] }
 0x1df   :  { %5869 = vmatpush.bf16.msra.mxu1 %v9268_v15  ;;  %v6403_v15 = vor.u32 %v8771_v12, %v6400_v56  ;;  %v9368_v55 = vld [vmem:[%s11779_s1 + $0x1160] sm:$0xff] }
 0x1e0   :  { %5883 = vmatpush.bf16.msra.mxu2 %v9276_v60  ;;  %v9330_v60 = vld [vmem:[%s11779_s1 + $0x1030] sm:$0xff]  ;;  %v9376_v12 = vld [vmem:[%s11779_s1 + $0x11a0] sm:$0xff] }
 0x1e1   :  { %5897 = vmatpush.bf16.msra.mxu3 %v9284_v61  ;;  %5856 = vmatmul.bf16.vlgmr.msra.gmra.mxu0 %v6375_v10  ;;  %v9338_v61 = vld [vmem:[%s11779_s1 + $0x1070] sm:$0xff]  ;;  %v9343_v10 = vld [vmem:[%s11779_s1 + $0x1098] sm:$0xff]  ;;  %v9384_v56 = vld [vmem:[%s11779_s1 + $0x11e0] sm:$0xff] }
 0x1e2   :  { %5904 = vmatpush.bf16.msrb.mxu0 %v9299_v62  ;;  %5870 = vmatmul.bf16.vlgmr.msra.gmra.mxu1 %v6379_v16  ;;  %v9346_v62 = vld [vmem:[%s11779_s1 + $0x10b0] sm:$0xff] }
 0x1e3   :  { %5918 = vmatpush.bf16.msrb.mxu1 %v9307_v63  ;;  %5884 = vmatmul.bf16.vlgmr.msra.gmra.mxu2 %v6383_v14  ;;  %v9354_v63 = vld [vmem:[%s11779_s1 + $0x10f0] sm:$0xff]  ;;  %v9351_v14 = vld [vmem:[%s11779_s1 + $0x10d8] sm:$0xff] }
 0x1e4   :  { %5932 = vmatpush.bf16.msrb.mxu2 %v9315_v7  ;;  %5898 = vmatmul.bf16.vlgmr.msra.gmra.mxu3 %v6387_v28  ;;  %v9327_v7 = vld [vmem:[%s11779_s1 + $0x1018] sm:$0xff]  ;;  %v9326_v16 = vld [vmem:[%s11779_s1 + $0x1010] sm:$0xff] }
 0x1e5   :  { %5946 = vmatpush.bf16.msrb.mxu3 %v9323_v8  ;;  %v9335_v8 = vld [vmem:[%s11779_s1 + $0x1058] sm:$0xff]  ;;  %v9334_v28 = vld [vmem:[%s11779_s1 + $0x1050] sm:$0xff] }
 0x1e6   :  { %5905 = vmatpush.bf16.msrb.mxu0 %v9298_v18  ;;  %v9342_v18 = vld [vmem:[%s11779_s1 + $0x1090] sm:$0xff] }
 0x1e7   :  { %5919 = vmatpush.bf16.msrb.mxu1 %v9306_v20  ;;  %v9350_v20 = vld [vmem:[%s11779_s1 + $0x10d0] sm:$0xff] }
 0x1e8   :  { %5933 = vmatpush.bf16.msrb.mxu2 %v9314_v21  ;;  %v9325_v21 = vld [vmem:[%s11779_s1 + $0x1008] sm:$0xff] }
 0x1e9   :  { %5947 = vmatpush.bf16.msrb.mxu3 %v9322_v25  ;;  %v9333_v25 = vld [vmem:[%s11779_s1 + $0x1048] sm:$0xff] }
 0x1ea   :  { %5906 = vmatpush.bf16.msrb.mxu0 %v9297_v38  ;;  %v9341_v38 = vld [vmem:[%s11779_s1 + $0x1088] sm:$0xff] }
 0x1eb   :  { %5920 = vmatpush.bf16.msrb.mxu1 %v9305_v17  ;;  %v9349_v17 = vld [vmem:[%s11779_s1 + $0x10c8] sm:$0xff] }
 0x1ec   :  { %5934 = vmatpush.bf16.msrb.mxu2 %v9313_v26  ;;  %v9324_v26 = vld [vmem:[%s11779_s1 + $0x1000] sm:$0xff] }
 0x1ed   :  { %5948 = vmatpush.bf16.msrb.mxu3 %v9321_v30  ;;  %v9332_v30 = vld [vmem:[%s11779_s1 + $0x1040] sm:$0xff] }
 0x1ee   :  { %5907 = vmatpush.bf16.msrb.mxu0 %v9296_v9  ;;  %v9340_v9 = vld [vmem:[%s11779_s1 + $0x1080] sm:$0xff] }
 0x1ef   :  { %5921 = vmatpush.bf16.msrb.mxu1 %v9304_v33  ;;  %v9348_v33 = vld [vmem:[%s11779_s1 + $0x10c0] sm:$0xff] }
 0x1f0   :  { %5935 = vmatpush.bf16.msrb.mxu2 %v9312_v22  ;;  %v9363_v22 = vld [vmem:[%s11779_s1 + $0x1138] sm:$0xff] }
 0x1f1   :  { %5949 = vmatpush.bf16.msrb.mxu3 %v9320_v35  ;;  %v9371_v35 = vld [vmem:[%s11779_s1 + $0x1178] sm:$0xff] }
 0x1f2   :  { %5908 = vmatpush.bf16.msrb.mxu0 %v9295_v36  ;;  %v6406_v36 = vld [vmem:[%s11780_s0 + $0x100] sm:$0xf] }
 0x1f3   :  { %5922 = vmatpush.bf16.msrb.mxu1 %v9303_v37  ;;  %v8808_v37 = vld [vmem:[%s11780_s0 + $0x21c] sm:$0xf0] }
 0x1f4   :  { %5936 = vmatpush.bf16.msrb.mxu2 %v9311_v39  ;;  %v6414_v39 = vld [vmem:[%s11780_s0 + $0x108] sm:$0xf] }
 0x1f5   :  { %5950 = vmatpush.bf16.msrb.mxu3 %v9319_v40  ;;  %v8809_v40 = vld [vmem:[%s11780_s0 + $0x224] sm:$0xf0] }
 0x1f6   :  { %5909 = vmatpush.bf16.msrb.mxu0 %v9294_v13  ;;  %v8772_v13 = vld [vmem:[%s11780_s0 + $0x104] sm:$0xf] }
 0x1f7   :  { %5923 = vmatpush.bf16.msrb.mxu1 %v9302_v23  ;;  %v6408_v23 = vld [vmem:[%s11780_s0 + $0x220] sm:$0xf0] }
 0x1f8   :  { %5937 = vmatpush.bf16.msrb.mxu2 %v9310_v41  ;;  %v8773_v41 = vld [vmem:[%s11780_s0 + $0x10c] sm:$0xf] }
 0x1f9   :  { %5951 = vmatpush.bf16.msrb.mxu3 %v9318_v42  ;;  %v6416_v42 = vld [vmem:[%s11780_s0 + $0x228] sm:$0xf0] }
 0x1fa   :  { %5910 = vmatpush.bf16.msrb.mxu0 %v9293_v27  ;;  %v9379_v27 = vld [vmem:[%s11779_s1 + $0x11b8] sm:$0xff] }
 0x1fb   :  { %5924 = vmatpush.bf16.msrb.mxu1 %v9301_v43  ;;  %v9387_v43 = vld [vmem:[%s11779_s1 + $0x11f8] sm:$0xff] }
 0x1fc   :  { %5938 = vmatpush.bf16.msrb.mxu2 %v9309_v44  ;;  %v6407_v44 = vor.u32 %v8808_v37, %v6406_v36 }
 0x1fd   :  { %5952 = vmatpush.bf16.msrb.mxu3 %v9317_v45  ;;  %v6415_v45 = vor.u32 %v8809_v40, %v6414_v39 }
 0x1fe   :  { %5911 = vmatpush.bf16.msrb.mxu0 %v9292_v46  ;;  %v6411_v46 = vor.u32 %v8772_v13, %v6408_v23 }
 0x1ff   :  { %5925 = vmatpush.bf16.msrb.mxu1 %v9300_v47  ;;  %v6419_v47 = vor.u32 %v8773_v41, %v6416_v42 }
 0x200   :  { %5939 = vmatpush.bf16.msrb.mxu2 %v9308_v29  ;;  %v9362_v29 = vld [vmem:[%s11779_s1 + $0x1130] sm:$0xff] }
 0x201   :  { %5953 = vmatpush.bf16.msrb.mxu3 %v9316_v32  ;;  %5912 = vmatmul.bf16.vlgmr.msrb.gmra.mxu0 %v6391_v19  ;;  %v9370_v32 = vld [vmem:[%s11779_s1 + $0x1170] sm:$0xff]  ;;  %v9375_v19 = vld [vmem:[%s11779_s1 + $0x1198] sm:$0xff] }
 0x202   :  { %5960 = vmatpush.bf16.msra.mxu0 %v9331_v48  ;;  %5926 = vmatmul.bf16.vlgmr.msrb.gmra.mxu1 %v6395_v59  ;;  %v9378_v48 = vld [vmem:[%s11779_s1 + $0x11b0] sm:$0xff] }
 0x203   :  { %5974 = vmatpush.bf16.msra.mxu1 %v9339_v50  ;;  %5940 = vmatmul.bf16.vlgmr.msrb.gmra.mxu2 %v6399_v31  ;;  %v9386_v50 = vld [vmem:[%s11779_s1 + $0x11f0] sm:$0xff]  ;;  %v9383_v31 = vld [vmem:[%s11779_s1 + $0x11d8] sm:$0xff] }
 0x204   :  { %5988 = vmatpush.bf16.msra.mxu2 %v9347_v57  ;;  %5954 = vmatmul.bf16.vlgmr.msrb.gmra.mxu3 %v6403_v15  ;;  %v9359_v57 = vld [vmem:[%s11779_s1 + $0x1118] sm:$0xff]  ;;  %v9358_v59 = vld [vmem:[%s11779_s1 + $0x1110] sm:$0xff] }
 0x205   :  { %6002 = vmatpush.bf16.msra.mxu3 %v9355_v58  ;;  %v9367_v58 = vld [vmem:[%s11779_s1 + $0x1158] sm:$0xff]  ;;  %v9366_v15 = vld [vmem:[%s11779_s1 + $0x1150] sm:$0xff] }
 0x206   :  { %5961 = vmatpush.bf16.msra.mxu0 %v9330_v60  ;;  %v9374_v60 = vld [vmem:[%s11779_s1 + $0x1190] sm:$0xff] }
 0x207   :  { %5975 = vmatpush.bf16.msra.mxu1 %v9338_v61  ;;  %v9382_v61 = vld [vmem:[%s11779_s1 + $0x11d0] sm:$0xff] }
 0x208   :  { %5989 = vmatpush.bf16.msra.mxu2 %v9346_v62  ;;  %v9357_v62 = vld [vmem:[%s11779_s1 + $0x1108] sm:$0xff] }
 0x209   :  { %6003 = vmatpush.bf16.msra.mxu3 %v9354_v63  ;;  %v9365_v63 = vld [vmem:[%s11779_s1 + $0x1148] sm:$0xff] }
 0x20a   :  { %5962 = vmatpush.bf16.msra.mxu0 %v9329_v0  ;;  %v9373_v0 = vld [vmem:[%s11779_s1 + $0x1188] sm:$0xff] }
 0x20b   :  { %5976 = vmatpush.bf16.msra.mxu1 %v9337_v24  ;;  %v9381_v24 = vld [vmem:[%s11779_s1 + $0x11c8] sm:$0xff] }
 0x20c   :  { %5990 = vmatpush.bf16.msra.mxu2 %v9345_v1  ;;  %v9356_v1 = vld [vmem:[%s11779_s1 + $0x1100] sm:$0xff] }
 0x20d   :  { %6004 = vmatpush.bf16.msra.mxu3 %v9353_v2  ;;  %v9364_v2 = vld [vmem:[%s11779_s1 + $0x1140] sm:$0xff] }
 0x20e   :  { %5963 = vmatpush.bf16.msra.mxu0 %v9328_v3  ;;  %v9372_v3 = vld [vmem:[%s11779_s1 + $0x1180] sm:$0xff] }
 0x20f   :  { %5977 = vmatpush.bf16.msra.mxu1 %v9336_v4  ;;  %v9380_v4 = vld [vmem:[%s11779_s1 + $0x11c0] sm:$0xff] }
 0x210   :  { %5991 = vmatpush.bf16.msra.mxu2 %v9344_v5  ;;  %v6422_v5 = vld [vmem:[%s11780_s0 + $0x110] sm:$0xf] }
 0x211   :  { %6005 = vmatpush.bf16.msra.mxu3 %v9352_v6  ;;  %v8810_v6 = vld [vmem:[%s11780_s0 + $0x22c] sm:$0xf0] }
 0x212   :  { %5964 = vmatpush.bf16.msra.mxu0 %v9327_v7  ;;  %v8774_v7 = vld [vmem:[%s11780_s0 + $0x114] sm:$0xf] }
 0x213   :  { %5978 = vmatpush.bf16.msra.mxu1 %v9335_v8  ;;  %v6424_v8 = vld [vmem:[%s11780_s0 + $0x230] sm:$0xf0] }
 0x214   :  { %5992 = vmatpush.bf16.msra.mxu2 %v9343_v10  ;;  %v6430_v10 = vld [vmem:[%s11780_s0 + $0x118] sm:$0xf] }
 0x215   :  { %6006 = vmatpush.bf16.msra.mxu3 %v9351_v14  ;;  %v8811_v14 = vld [vmem:[%s11780_s0 + $0x234] sm:$0xf0] }
 0x216   :  { %5965 = vmatpush.bf16.msra.mxu0 %v9326_v16  ;;  %v8775_v16 = vld [vmem:[%s11780_s0 + $0x11c] sm:$0xf] }
 0x217   :  { %5979 = vmatpush.bf16.msra.mxu1 %v9334_v28  ;;  %v6432_v28 = vld [vmem:[%s11780_s0 + $0x238] sm:$0xf0] }
 0x218   :  { %5993 = vmatpush.bf16.msra.mxu2 %v9342_v18  ;;  %v6423_v18 = vor.u32 %v8810_v6, %v6422_v5 }
 0x219   :  { %6007 = vmatpush.bf16.msra.mxu3 %v9350_v20  ;;  %v6427_v20 = vor.u32 %v8774_v7, %v6424_v8  ;;  %v6089_v7 = vld [vmem:[%s11783_s3 + $0x78] sm:$0xff]  ;;  %v6088_v8 = vld [vmem:[%s11783_s3 + $0x70] sm:$0xff] }
 0x21a   :  { %5966 = vmatpush.bf16.msra.mxu0 %v9325_v21  ;;  %v6431_v21 = vor.u32 %v8811_v14, %v6430_v10 }
 0x21b   :  { %5980 = vmatpush.bf16.msra.mxu1 %v9333_v25  ;;  %v6435_v25 = vor.u32 %v8775_v16, %v6432_v28 }
 0x21c   :  { %5994 = vmatpush.bf16.msra.mxu2 %v9341_v38  ;;  %v5633_v38 = vpop.f32.mrf.mxu0 }
 0x21d   :  { %6008 = vmatpush.bf16.msra.mxu3 %v9349_v17  ;;  %v5647_v17 = vpop.f32.mrf.mxu1 }
 0x21e   :  { %5967 = vmatpush.bf16.msra.mxu0 %v9324_v26  ;;  %v5661_v26 = vpop.f32.mrf.mxu2 }
 0x21f   :  { %5981 = vmatpush.bf16.msra.mxu1 %v9332_v30  ;;  %v5675_v30 = vpop.f32.mrf.mxu3 }
 0x220   :  { %5995 = vmatpush.bf16.msra.mxu2 %v9340_v9 }
 0x221   :  { %6009 = vmatpush.bf16.msra.mxu3 %v9348_v33  ;;  %5968 = vmatmul.bf16.vlgmr.msra.gmra.mxu0 %v6407_v44 }
 0x222   :  { %6016 = vmatpush.bf16.msrb.mxu0 %v9363_v22  ;;  %5982 = vmatmul.bf16.vlgmr.msra.gmra.mxu1 %v6411_v46  ;;  %v5634_v46 = vadd.f32 %v5633_v38, %v11287_v49  ;;  %v6086_v38 = vld [vmem:[%s11783_s3 + $0x60] sm:$0xff] }
 0x223   :  { %6030 = vmatpush.bf16.msrb.mxu1 %v9371_v35  ;;  %5996 = vmatmul.bf16.vlgmr.msra.gmra.mxu2 %v6415_v45 }
 0x224   :  { %6044 = vmatpush.bf16.msrb.mxu2 %v9379_v27  ;;  %6010 = vmatmul.bf16.vlgmr.msra.gmra.mxu3 %v6419_v47  ;;  %v5635_v9 = vpop.f32.mrf.mxu0 }
 0x225   :  { %6058 = vmatpush.bf16.msrb.mxu3 %v9387_v43  ;;  %v5649_v33 = vpop.f32.mrf.mxu1 }
 0x226   :  { %6017 = vmatpush.bf16.msrb.mxu0 %v9362_v29  ;;  %v5663_v22 = vpop.f32.mrf.mxu2  ;;  %v5648_v29 = vadd.f32 %v5647_v17, %v5634_v46  ;;  %v6085_v17 = vld [vmem:[%s11783_s3 + $0x58] sm:$0xff] }
 0x227   :  { %6031 = vmatpush.bf16.msrb.mxu1 %v9370_v32  ;;  %v5677_v35 = vpop.f32.mrf.mxu3 }
 0x228   :  { %6045 = vmatpush.bf16.msrb.mxu2 %v9378_v48  ;;  %v5662_v48 = vadd.f32 %v5661_v26, %v5648_v29 }
 0x229   :  { %6059 = vmatpush.bf16.msrb.mxu3 %v9386_v50  ;;  %v5636_v50 = vadd.f32 %v5635_v9, %v11325_v34 }
 0x22a   :  { %6018 = vmatpush.bf16.msrb.mxu0 %v9361_v51 }
 0x22b   :  { %6032 = vmatpush.bf16.msrb.mxu1 %v9369_v11 }
 0x22c   :  { %6046 = vmatpush.bf16.msrb.mxu2 %v9377_v52  ;;  %v5689_v36 = vpop.f32.mrf.mxu0  ;;  %v5676_v52 = vadd.f32 %v5675_v30, %v5662_v48  ;;  %v6084_v30 = vld [vmem:[%s11783_s3 + $0x50] sm:$0xff]  ;;  %v6078_v48 = vld [vmem:[%s11783_s3 + $0x20] sm:$0xff] }
 0x22d   :  { %6060 = vmatpush.bf16.msrb.mxu3 %v9385_v53  ;;  %v5703_v37 = vpop.f32.mrf.mxu1 }
 0x22e   :  { %6019 = vmatpush.bf16.msrb.mxu0 %v9360_v54  ;;  %v5717_v39 = vpop.f32.mrf.mxu2  ;;  %v5650_v54 = vadd.f32 %v5649_v33, %v5636_v50 }
 0x22f   :  { %6033 = vmatpush.bf16.msrb.mxu1 %v9368_v55  ;;  %v5731_v40 = vpop.f32.mrf.mxu3  ;;  %v5690_v55 = vadd.f32 %v5689_v36, %v5676_v52 }
 0x230   :  { %6047 = vmatpush.bf16.msrb.mxu2 %v9376_v12 }
 0x231   :  { %6061 = vmatpush.bf16.msrb.mxu3 %v9384_v56  ;;  %v5664_v56 = vadd.f32 %v5663_v22, %v5650_v54 }
 0x232   :  { %6020 = vmatpush.bf16.msrb.mxu0 %v9359_v57  ;;  %v5704_v57 = vadd.f32 %v5703_v37, %v5690_v55  ;;  %v6082_v37 = vld [vmem:[%s11783_s3 + $0x40] sm:$0xff]  ;;  %v6076_v55 = vld [vmem:[%s11783_s3 + $0x10] sm:$0xff] }
 0x233   :  { %6034 = vmatpush.bf16.msrb.mxu1 %v9367_v58 }
 0x234   :  { %6048 = vmatpush.bf16.msrb.mxu2 %v9375_v19  ;;  %v5691_v13 = vpop.f32.mrf.mxu0 }
 0x235   :  { %6062 = vmatpush.bf16.msrb.mxu3 %v9383_v31  ;;  %v5705_v23 = vpop.f32.mrf.mxu1  ;;  %v5678_v31 = vadd.f32 %v5677_v35, %v5664_v56  ;;  %v6083_v35 = vld [vmem:[%s11783_s3 + $0x48] sm:$0xff] }
 0x236   :  { %6021 = vmatpush.bf16.msrb.mxu0 %v9358_v59  ;;  %v5719_v41 = vpop.f32.mrf.mxu2  ;;  %v5718_v59 = vadd.f32 %v5717_v39, %v5704_v57 }
 0x237   :  { %6035 = vmatpush.bf16.msrb.mxu1 %v9366_v15  ;;  %v5733_v42 = vpop.f32.mrf.mxu3  ;;  %v5692_v49 = vadd.f32 %v5691_v13, %v5678_v31  ;;  %v6074_v31 = vld [vmem:[%s11783_s3] sm:$0xff] }
 0x238   :  { %6049 = vmatpush.bf16.msrb.mxu2 %v9374_v60  ;;  %v5732_v60 = vadd.f32 %v5731_v40, %v5718_v59 }
 0x239   :  { %6063 = vmatpush.bf16.msrb.mxu3 %v9382_v61 }
 0x23a   :  { %6022 = vmatpush.bf16.msrb.mxu0 %v9357_v62  ;;  %v5706_v62 = vadd.f32 %v5705_v23, %v5692_v49 }
 0x23b   :  { %6036 = vmatpush.bf16.msrb.mxu1 %v9365_v63 }
 0x23c   :  { %6050 = vmatpush.bf16.msrb.mxu2 %v9373_v0  ;;  %v5745_v27 = vpop.f32.mrf.mxu0  ;;  %v5720_v34 = vadd.f32 %v5719_v41, %v5706_v62  ;;  %v6081_v41 = vld [vmem:[%s11783_s3 + $0x38] sm:$0xff] }
 0x23d   :  { %6064 = vmatpush.bf16.msrb.mxu3 %v9381_v24  ;;  %v5759_v43 = vpop.f32.mrf.mxu1  ;;  %v5746_v63 = vadd.f32 %v5745_v27, %v5732_v60 }
 0x23e   :  { %6023 = vmatpush.bf16.msrb.mxu0 %v9356_v1  ;;  %v5773_v44 = vpop.f32.mrf.mxu2 }
 0x23f   :  { %6037 = vmatpush.bf16.msrb.mxu1 %v9364_v2  ;;  %v5787_v45 = vpop.f32.mrf.mxu3  ;;  %v5760_v1 = vadd.f32 %v5759_v43, %v5746_v63 }
 0x240   :  { %6051 = vmatpush.bf16.msrb.mxu2 %v9372_v3  ;;  %v5734_v3 = vadd.f32 %v5733_v42, %v5720_v34 }
 0x241   :  { %6065 = vmatpush.bf16.msrb.mxu3 %v9380_v4  ;;  %6024 = vmatmul.bf16.vlgmr.msrb.gmra.mxu0 %v6423_v18  ;;  %v5774_v4 = vadd.f32 %v5773_v44, %v5760_v1 }
 0x242   :  { %6038 = vmatmul.bf16.vlgmr.msrb.gmra.mxu1 %v6427_v20  ;;  %6094 = vmatpush.msra.mxu0 %v6089_v7  ;;  %v6087_v20 = vld [vmem:[%s11783_s3 + $0x68] sm:$0xff] }
 0x243   :  { %6052 = vmatmul.bf16.vlgmr.msrb.gmra.mxu2 %v6431_v21  ;;  %9388 = vmatpush.msra.mxu1 %v6089_v7  ;;  %v5788_v10 = vadd.f32 %v5787_v45, %v5774_v4  ;;  %v6080_v45 = vld [vmem:[%s11783_s3 + $0x30] sm:$0xff] }
 0x244   :  { %6066 = vmatmul.bf16.vlgmr.msrb.gmra.mxu3 %v6435_v25  ;;  %v5747_v47 = vpop.f32.mrf.mxu0  ;;  %6095 = vmatpush.msra.mxu0 %v6088_v8 }
 0x245   :  { %v5761_v32 = vpop.f32.mrf.mxu1  ;;  %v5748_v6 = vadd.f32 %v5747_v47, %v5734_v3  ;;  %9389 = vmatpush.msra.mxu1 %v6088_v8  ;;  %v6079_v47 = vld [vmem:[%s11783_s3 + $0x28] sm:$0xff] }
 0x246   :  { %v5775_v51 = vpop.f32.mrf.mxu2  ;;  %6096 = vmatpush.msra.mxu0 %v6087_v20 }
 0x247   :  { %v5789_v11 = vpop.f32.mrf.mxu3  ;;  %v5762_v28 = vadd.f32 %v5761_v32, %v5748_v6  ;;  %9390 = vmatpush.msra.mxu1 %v6087_v20 }
 0x248   :  { %6097 = vmatpush.msra.mxu0 %v6086_v38 }
 0x249   :  { %v5776_v21 = vadd.f32 %v5775_v51, %v5762_v28  ;;  %9391 = vmatpush.msra.mxu1 %v6086_v38 }
 0x24a   :  { %6098 = vmatpush.msra.mxu0 %v6085_v17 }
 0x24b   :  { %9392 = vmatpush.msra.mxu1 %v6085_v17  ;;  %v5790_v33 = vadd.f32 %v5789_v11, %v5776_v21 }
 0x24c   :  { %v5801_v53 = vpop.f32.mrf.mxu0  ;;  %6099 = vmatpush.msra.mxu0 %v6084_v30 }
 0x24d   :  { %v5815_v12 = vpop.f32.mrf.mxu1  ;;  %v5802_v18 = vadd.f32 %v5801_v53, %v5788_v10  ;;  %9393 = vmatpush.msra.mxu1 %v6084_v30  ;;  %v6077_v53 = vld [vmem:[%s11783_s3 + $0x18] sm:$0xff] }
 0x24e   :  { %v5829_v58 = vpop.f32.mrf.mxu2  ;;  %6100 = vmatpush.msra.mxu0 %v6083_v35 }
 0x24f   :  { %v5843_v19 = vpop.f32.mrf.mxu3  ;;  %v5816_v26 = vadd.f32 %v5815_v12, %v5802_v18  ;;  %9394 = vmatpush.msra.mxu1 %v6083_v35 }
 0x250   :  { %6101 = vmatpush.msra.mxu0 %v6082_v37 }
 0x251   :  { %v5830_v22 = vadd.f32 %v5829_v58, %v5816_v26  ;;  %9395 = vmatpush.msra.mxu1 %v6082_v37  ;;  %v6075_v58 = vld [vmem:[%s11783_s3 + $0x8] sm:$0xff] }
 0x252   :  { %6102 = vmatpush.msra.mxu0 %v6081_v41 }
 0x253   :  { %v5844_v13 = vadd.f32 %v5843_v19, %v5830_v22  ;;  %9396 = vmatpush.msra.mxu1 %v6081_v41 }
 0x254   :  { %v5803_v15 = vpop.f32.mrf.mxu0  ;;  %6103 = vmatpush.msra.mxu0 %v6080_v45 }
 0x255   :  { %v5817_v61 = vpop.f32.mrf.mxu1  ;;  %v5804_v36 = vadd.f32 %v5803_v15, %v5790_v33  ;;  %9397 = vmatpush.msra.mxu1 %v6080_v45 }
 0x256   :  { %v5831_v0 = vpop.f32.mrf.mxu2  ;;  %6104 = vmatpush.msra.mxu0 %v6079_v47 }
 0x257   :  { %v11713_v24 = vpop.f32.mrf.mxu3  ;;  %v5818_v42 = vadd.f32 %v5817_v61, %v5804_v36  ;;  %9398 = vmatpush.msra.mxu1 %v6079_v47 }
 0x258   :  { %6105 = vmatpush.msra.mxu0 %v6078_v48 }
 0x259   :  { %v5832_v44 = vadd.f32 %v5831_v0, %v5818_v42  ;;  %9399 = vmatpush.msra.mxu1 %v6078_v48 }
 0x25a   :  { %6106 = vmatpush.msra.mxu0 %v6077_v53 }
 0x25b   :  { %v5846_v50 = vadd.f32 %v11713_v24, %v5832_v44  ;;  %9400 = vmatpush.msra.mxu1 %v6077_v53  ;;  %v9405_v44 = vld [vmem:[%s11782_s4] ss:$0 sm:$0xff] }
 0x25c   :  { %6107 = vmatpush.msra.mxu0 %v6076_v55 }
 0x25d   :  { %9401 = vmatpush.msra.mxu1 %v6076_v55 }
 0x25e   :  { %v5857_v2 = vpop.f32.mrf.mxu0  ;;  %6108 = vmatpush.msra.mxu0 %v6075_v58 }
 0x25f   :  { %v5871_v5 = vpop.f32.mrf.mxu1  ;;  %v5858_v27 = vadd.f32 %v5857_v2, %v5844_v13  ;;  %9402 = vmatpush.msra.mxu1 %v6075_v58 }
 0x260   :  { %6109 = vmatpush.msra.mxu0 %v6074_v31 }
 0x261   :  { %v5872_v46 = vadd.f32 %v5871_v5, %v5858_v27  ;;  %9403 = vmatpush.msra.mxu1 %v6074_v31 }
 0x266   :  { %v5885_v14 = vpop.f32.mrf.mxu2  ;;  %v5859_v25 = vpop.f32.mrf.mxu0 }
 0x267   :  { %v5899_v16 = vpop.f32.mrf.mxu3  ;;  %v5873_v9 = vpop.f32.mrf.mxu1  ;;  %v5886_v51 = vadd.f32 %v5885_v14, %v5872_v46  ;;  %v5860_v11 = vadd.f32 %v5859_v25, %v5846_v50 }
 0x269   :  { %v5900_v54 = vadd.f32 %v5899_v16, %v5886_v51  ;;  %v5874_v56 = vadd.f32 %v5873_v9, %v5860_v11 }
 0x26e   :  { %v5887_v39 = vpop.f32.mrf.mxu2 }
 0x26f   :  { %v5901_v40 = vpop.f32.mrf.mxu3  ;;  %v5888_v19 = vadd.f32 %v5887_v39, %v5874_v56 }
 0x271   :  { %v5902_v61 = vadd.f32 %v5901_v40, %v5888_v19 }
 0x27e   :  { %v5913_v23 = vpop.f32.mrf.mxu0 }
 0x27f   :  { %v5927_v43 = vpop.f32.mrf.mxu1  ;;  %v5914_v57 = vadd.f32 %v5913_v23, %v5900_v54 }
 0x281   :  { %v5928_v15 = vadd.f32 %v5927_v43, %v5914_v57 }
 0x286   :  { %v5941_v29 = vpop.f32.mrf.mxu2  ;;  %v5915_v52 = vpop.f32.mrf.mxu0 }
 0x287   :  { %v5955_v32 = vpop.f32.mrf.mxu3  ;;  %v5929_v12 = vpop.f32.mrf.mxu1  ;;  %v5942_v62 = vadd.f32 %v5941_v29, %v5928_v15  ;;  %v5916_v34 = vadd.f32 %v5915_v52, %v5902_v61 }
 0x289   :  { %v5956_v0 = vadd.f32 %v5955_v32, %v5942_v62  ;;  %v5930_v2 = vadd.f32 %v5929_v12, %v5916_v34 }
 0x28e   :  { %v5943_v59 = vpop.f32.mrf.mxu2 }
 0x28f   :  { %v5957_v49 = vpop.f32.mrf.mxu3  ;;  %v5944_v4 = vadd.f32 %v5943_v59, %v5930_v2 }
 0x291   :  { %v5958_v8 = vadd.f32 %v5957_v49, %v5944_v4 }
 0x29e   :  { %v5969_v60 = vpop.f32.mrf.mxu0 }
 0x29f   :  { %v5983_v63 = vpop.f32.mrf.mxu1  ;;  %v5970_v3 = vadd.f32 %v5969_v60, %v5956_v0 }
 0x2a1   :  { %v5984_v6 = vadd.f32 %v5983_v63, %v5970_v3 }
 0x2a6   :  { %v5997_v24 = vpop.f32.mrf.mxu2  ;;  %v5971_v5 = vpop.f32.mrf.mxu0 }
 0x2a7   :  { %v6011_v1 = vpop.f32.mrf.mxu3  ;;  %v5985_v7 = vpop.f32.mrf.mxu1  ;;  %v5998_v10 = vadd.f32 %v5997_v24, %v5984_v6  ;;  %v5972_v14 = vadd.f32 %v5971_v5, %v5958_v8 }
 0x2a9   :  { %v6012_v18 = vadd.f32 %v6011_v1, %v5998_v10  ;;  %v5986_v21 = vadd.f32 %v5985_v7, %v5972_v14 }
 0x2ae   :  { %v5999_v16 = vpop.f32.mrf.mxu2 }
 0x2af   :  { %v6013_v28 = vpop.f32.mrf.mxu3  ;;  %v6000_v17 = vadd.f32 %v5999_v16, %v5986_v21 }
 0x2b1   :  { %v6014_v33 = vadd.f32 %v6013_v28, %v6000_v17 }
 0x2be   :  { %v6025_v20 = vpop.f32.mrf.mxu0 }
 0x2bf   :  { %v6026_v25 = vadd.f32 %v6025_v20, %v6012_v18  ;;  %v6039_v38 = vpop.f32.mrf.mxu1 }
 0x2c1   :  { %v6040_v26 = vadd.f32 %v6039_v38, %v6026_v25 }
 0x2c6   :  { %v6053_v30 = vpop.f32.mrf.mxu2  ;;  %v6027_v35 = vpop.f32.mrf.mxu0 }
 0x2c7   :  { %v6067_v9 = vpop.f32.mrf.mxu3  ;;  %v6054_v22 = vadd.f32 %v6053_v30, %v6040_v26  ;;  %v6028_v37 = vadd.f32 %v6027_v35, %v6014_v33  ;;  %v6041_v40 = vpop.f32.mrf.mxu1 }
 0x2c9   :  { %v6068_v36 = vadd.f32 %v6067_v9, %v6054_v22  ;;  %v6042_v13 = vadd.f32 %v6041_v40, %v6028_v37 }
 0x2cb   :  { %v6072_v39 = vmax.f32 %v6068_v36, 0.0 }
 0x2cd   :  { %6110 = vmatmul.f32.vlgmr.msra.gmra.mxu0 %v6072_v39 }
 0x2ce   :  { %v6055_v23 = vpop.f32.mrf.mxu2 }
 0x2cf   :  { %v6056_v41 = vadd.f32 %v6055_v23, %v6042_v13  ;;  %v6069_v42 = vpop.f32.mrf.mxu3 }
 0x2d1   :  { %v6070_v27 = vadd.f32 %v6069_v42, %v6056_v41 }
 0x2d3   :  { %v6073_v43 = vmax.f32 %v6070_v27, 0.0 }
 0x2d5   :  { %6113 = vmatmul.f32.vlgmr.msra.gmra.mxu1 %v6073_v43 }
 0x34a   :  { %v6111_v45 = vpop.f32.mrf.mxu0 }
 0x34b   :  { %v6112_v46 = vadd.f32 %v9405_v44, %v6111_v45 }
 0x34d   :  { %v6118_v47 = vsel %vm6117_vm0, %v6112_v46, -inf }
 0x34e   :  { %6119 = vmax.xlane.f32.xlu0 %v6118_v47 }
 0x352   :  { %v6114_v29 = vpop.f32.mrf.mxu1 }
 0x353   :  { %v6115_v32 = vadd.f32 %v9405_v44, %v6114_v29 }
 0x355   :  { %v6121_v48 = vsel %vm6117_vm0, %v6115_v32, -inf }
 0x356   :  { %6122 = vmax.xlane.f32.xlu0 %v6121_v48 }
 0x3c1   :  { %v6120_v50 = vpop.xlane.xlu0 %6119 }
 0x3c2   :  { %v6124_v51 = vsub.f32 %v6112_v46, %v6120_v50 }
 0x3c4   :  { %v6126_v11 = vmul.f32 1.442695, %v6124_v51 }
 0x3c6   :  { %9406 = vpow2.f32 %v6126_v11 }
 0x3c9   :  { %v6123_v52 = vpop.xlane.xlu0 %6122 }
 0x3ca   :  { %v6125_v53 = vsub.f32 %v6115_v32, %v6123_v52 }
 0x3cc   :  { %v9407_v54 = vpop.eup %9406  ;;  %v6128_v55 = vmul.f32 1.442695, %v6125_v53 }
 0x3cd   :  { %v6130_v12 = vsel %vm6117_vm0, %v9407_v54, 0.0 }
 0x3ce   :  { %9408 = vpow2.f32 %v6128_v55  ;;  %6131 = vadd.xlane.f32.xlu1 %v6130_v12 }
 0x3d4   :  { %v9409_v56 = vpop.eup %9408 }
 0x3d5   :  { %v6133_v57 = vsel %vm6117_vm0, %v9409_v56, 0.0 }
 0x3d6   :  { %6134 = vadd.xlane.f32.xlu1 %v6133_v57 }
 0x441   :  { %v6132_v58 = vpop.xlane.xlu1 %6131 }
 0x442   :  { %9410 = vlog2.f32 %v6132_v58 }
 0x448   :  { %v9411_v19 = vpop.eup %9410 }
 0x449   :  { %v6137_v31 = vmul.f32 0.6931472, %v9411_v19  ;;  %v6135_v59 = vpop.xlane.xlu1 %6134 }
 0x44a   :  { %9412 = vlog2.f32 %v6135_v59 }
 0x44b   :  { %v6140_v49 = vsub.f32 %v6124_v51, %v6137_v31 }
 0x44d   :  { %6142 = vst.msk [vmem:[%s11784_s5] sm:$0xff] %vm6117_vm0, %v6140_v49 }
 0x450   :  { %v9413_v15 = vpop.eup %9412 }
 0x451   :  { %v6139_v60 = vmul.f32 0.6931472, %v9413_v15 }
 0x453   :  { %v6141_v61 = vsub.f32 %v6125_v53, %v6139_v60 }
 0x455   :  { %6143 = vst.msk [vmem:[%s11784_s5 + $0x8] sm:$0xff] %vm6117_vm0, %v6141_v61 }

</bundles_post_ra>
